<compile_context>
chip_gen: v5e
topology: v5e:2x2
jax: 0.10.0
libtpu: 0.0.40
codegen_flags: <defaults>
</compile_context>

<pallas_src>
import jax
import jax.numpy as jnp
from jax.experimental import pallas as pl
from jax.experimental.pallas import tpu as pltpu

_H1, _H2, _H3 = 1024, 512, 256   # hidden sizes fixed by the module
_LANE = 128


def _round_up(x, m):
    return (x + m - 1) // m * m


def _cdiv(a, b):
    return -(-a // b)


def _physical_vmem_bytes():
    """Per-core physical VMEM, for generation-dependent limits (safe fallback)."""
    try:
        info = pltpu.get_tpu_info()
        for attr in ("vmem_capacity_bytes", "vmem_bytes", "vmem_size_bytes"):
            v = getattr(info, attr, None)
            if v:
                return int(v)
    except Exception:
        pass
    return 64 << 20  # conservative default (v7x); v5e/v6e have 128 MiB.


def _mlp_kernel(x0_ref, x1_ref, w1a_ref, w1b_ref, b1_ref, w2_ref, b2_ref,
                w3_ref, b3_ref, w4_ref, b4_ref, o_ref, acc_ref):
    k = pl.program_id(1)

    @pl.when(k == 0)
    def _():
        acc_ref[...] = jnp.zeros_like(acc_ref)

    # Layer 1, split-K over the virtual concat. Two separate accumulating dots:
    # no extra (TB, 1024) f32 temporary; v7x's MRB accumulates in place.
    acc_ref[...] += jnp.dot(x0_ref[...], w1a_ref[...],
                            preferred_element_type=jnp.float32)
    acc_ref[...] += jnp.dot(x1_ref[...], w1b_ref[...],
                            preferred_element_type=jnp.float32)

    @pl.when(k == pl.num_programs(1) - 1)
    def _():
        # Bias + ReLU in f32 (v5e VPU has no bf16); bf16 only feeds the MXU.
        h = jnp.maximum(acc_ref[...] + b1_ref[...], 0.0)
        h = jnp.dot(h.astype(jnp.bfloat16), w2_ref[...],
                    preferred_element_type=jnp.float32) + b2_ref[...]
        h = jnp.maximum(h, 0.0)
        h = jnp.dot(h.astype(jnp.bfloat16), w3_ref[...],
                    preferred_element_type=jnp.float32) + b3_ref[...]
        h = jnp.maximum(h, 0.0)
        out = jnp.dot(h.astype(jnp.bfloat16), w4_ref[...],
                      preferred_element_type=jnp.float32) + b4_ref[...]
        o_ref[...] = out.astype(o_ref.dtype)


def _pad2(a, rows, cols, dtype):
    """Zero-pad a 2-D array to (rows, cols) and cast."""
    return jnp.zeros((rows, cols), dtype).at[:a.shape[0], :a.shape[1]].set(
        a.astype(dtype))


def baseline_model_forward(mel_tensor_0, mel_tensor_1, params):
    """JAX wrapper reproducing BaselineModel.forward.

    mel_tensor_*: (B, ...) tensors; flattened from dim 1 onward.
    params: dict of w1,b1,...,w4,b4 with w_i:(in, out), b_i:(out,), f32.
    """
    B = mel_tensor_0.shape[0]
    x0 = mel_tensor_0.reshape(B, -1)
    x1 = mel_tensor_1.reshape(B, -1)
    F = x0.shape[1]
    assert x1.shape[1] == F, "both mel tensors must flatten to input_size"

    w1, b1 = params["w1"], params["b1"]
    w2, b2 = params["w2"], params["b2"]
    w3, b3 = params["w3"], params["b3"]
    w4, b4 = params["w4"], params["b4"]
    num_classes = w4.shape[1]
    Np = _round_up(num_classes, _LANE)    # lane-dense output slab

    # ---- generation-aware VMEM budget -------------------------------------
    phys_vmem = _physical_vmem_bytes()
    soft_cap = min(int(phys_vmem * 0.72), 100 << 20)   # ~46 MiB v7x, ~92 MiB v5e/v6e

    # ---- K tile for the W1 halves (no full-tile zero padding for F > max_tk)
    max_tk = 4096 if phys_vmem >= (96 << 20) else 2048
    if F <= max_tk:
        tk = _round_up(F, _LANE)
    else:
        tk = _round_up(_cdiv(F, _cdiv(F, max_tk)), _LANE)
    Fp = _round_up(F, tk)

    # ---- batch tile: as large as VMEM allows (W1 is re-streamed per batch tile)
    Bp = _round_up(max(B, 16), 16)        # >=16 so bf16 sublane groups are full

    def budget(tb, tk_):
        return (2 * 2 * tb * tk_ * 2                           # x0/x1 tiles (bf16, 2-buf)
                + 2 * 2 * tk_ * _H1 * 2                        # w1a/w1b tiles (bf16, 2-buf)
                + 2 * (_H1 * _H2 + _H2 * _H3 + _H3 * Np) * 2   # resident w2..w4 (bf16)
                + 2 * (_H1 + _H2 + _H3 + Np) * 4               # biases (f32)
                + 2 * tb * Np * 4                              # output block (f32)
                + tb * _H1 * 4)                                # f32 accumulator

    if Bp <= 512:
        TB = Bp
    else:
        TB = 512
        while TB > 128 and budget(TB, tk) > soft_cap:
            TB //= 2
        Bp = _round_up(Bp, TB)

    vmem_limit = min(max(int(budget(TB, tk) * 1.5) + (2 << 20), 32 << 20), soft_cap)

    # ---- pad / cast operands (bf16 halves weight DMA; f32 accumulate) -----
    x0p = _pad2(x0, Bp, Fp, jnp.bfloat16)
    x1p = _pad2(x1, Bp, Fp, jnp.bfloat16)
    w1a = _pad2(w1[:F], Fp, _H1, jnp.bfloat16)   # rows multiplying flat_h1
    w1b = _pad2(w1[F:], Fp, _H1, jnp.bfloat16)   # rows multiplying flat_l1
    w2p = w2.astype(jnp.bfloat16)
    w3p = w3.astype(jnp.bfloat16)
    w4p = _pad2(w4, _H3, Np, jnp.bfloat16)
    b1p = b1.reshape(1, _H1).astype(jnp.float32)
    b2p = b2.reshape(1, _H2).astype(jnp.float32)
    b3p = b3.reshape(1, _H3).astype(jnp.float32)
    b4p = _pad2(b4.reshape(1, -1), 1, Np, jnp.float32)

    grid = (Bp // TB, Fp // tk)

    out = pl.pallas_call(
        _mlp_kernel,
        out_shape=jax.ShapeDtypeStruct((Bp, Np), jnp.float32),
        grid_spec=pltpu.PrefetchScalarGridSpec(
            num_scalar_prefetch=0,
            grid=grid,
            in_specs=[
                pl.BlockSpec((TB, tk), lambda b, k: (b, k)),      # x0
                pl.BlockSpec((TB, tk), lambda b, k: (b, k)),      # x1
                pl.BlockSpec((tk, _H1), lambda b, k: (k, 0)),     # w1 (top rows)
                pl.BlockSpec((tk, _H1), lambda b, k: (k, 0)),     # w1 (bottom rows)
                pl.BlockSpec((1, _H1), lambda b, k: (0, 0)),      # b1
                pl.BlockSpec((_H1, _H2), lambda b, k: (0, 0)),    # w2
                pl.BlockSpec((1, _H2), lambda b, k: (0, 0)),      # b2
                pl.BlockSpec((_H2, _H3), lambda b, k: (0, 0)),    # w3
                pl.BlockSpec((1, _H3), lambda b, k: (0, 0)),      # b3
                pl.BlockSpec((_H3, Np), lambda b, k: (0, 0)),     # w4
                pl.BlockSpec((1, Np), lambda b, k: (0, 0)),       # b4
            ],
            out_specs=pl.BlockSpec((TB, Np), lambda b, k: (b, 0)),
            scratch_shapes=[pltpu.VMEM((TB, _H1), jnp.float32)],
        ),
        compiler_params=pltpu.CompilerParams(
            dimension_semantics=("parallel", "arbitrary"),
            vmem_limit_bytes=vmem_limit,
        ),
    )(x0p, x1p, w1a, w1b, b1p, w2p, b2p, w3p, b3p, w4p, b4p)

    return out[:B, :num_classes]


def init_params(input_size, num_classes=1, dtype=jnp.float32):
    """Deterministic synthetic init matching nn.Linear shapes (stored as (in, out))."""
    key = jax.random.PRNGKey(42)
    dims = [(input_size * 2, _H1), (_H1, _H2), (_H2, _H3), (_H3, num_classes)]
    params = {}
    for i, (fan_in, fan_out) in enumerate(dims, start=1):
        key, kw, kb = jax.random.split(key, 3)
        bound = 1.0 / (fan_in ** 0.5)  # same scale as torch's default Linear init
        params[f"w{i}"] = jax.random.uniform(
            kw, (fan_in, fan_out), dtype, minval=-bound, maxval=bound)
        params[f"b{i}"] = jax.random.uniform(
            kb, (fan_out,), dtype, minval=-bound, maxval=bound)
    return params


def _reference_forward(mel_tensor_0, mel_tensor_1, params):
    """Pure-JAX f32 reference for correctness checking."""
    B = mel_tensor_0.shape[0]
    x = jnp.concatenate(
        [mel_tensor_0.reshape(B, -1), mel_tensor_1.reshape(B, -1)], axis=1)
    h = jnp.maximum(x @ params["w1"] + params["b1"], 0.0)
    h = jnp.maximum(h @ params["w2"] + params["b2"], 0.0)
    h = jnp.maximum(h @ params["w3"] + params["b3"], 0.0)
    return h @ params["w4"] + params["b4"]


if __name__ == "__main__":
    # Small mel-spectrogram-like inputs: (batch=2, n_mels=4, frames=16) -> input_size=64
    B, C, T = 2, 4, 16
    input_size = C * T
    num_classes = 1

    key = jax.random.PRNGKey(0)
    k0, k1 = jax.random.split(key)
    mel0 = jax.random.normal(k0, (B, C, T), dtype=jnp.float32)
    mel1 = jax.random.normal(k1, (B, C, T), dtype=jnp.float32)

    params = init_params(input_size, num_classes)

    logits = baseline_model_forward(mel0, mel1, params)
    logits = jax.block_until_ready(logits)

    ref = _reference_forward(mel0, mel1, params)
    assert logits.shape == (B, num_classes), logits.shape
    # bf16 weights/activations vs f32 reference -> loosened tolerance.
    assert jnp.allclose(logits, ref, atol=5e-2, rtol=5e-2), (logits, ref)

    print("KERNEL_OK")
</pallas_src>

<mosaic_0001>
module attributes {stable_mosaic.version = 11 : i64} {
  func.func @_mlp_kernel(%arg0: i32, %arg1: i32, %arg2: memref<16x128xbf16, #tpu.memory_space<vmem>>, %arg3: memref<16x128xbf16, #tpu.memory_space<vmem>>, %arg4: memref<128x1024xbf16, #tpu.memory_space<vmem>>, %arg5: memref<128x1024xbf16, #tpu.memory_space<vmem>>, %arg6: memref<1x1024xf32, #tpu.memory_space<vmem>>, %arg7: memref<1024x512xbf16, #tpu.memory_space<vmem>>, %arg8: memref<1x512xf32, #tpu.memory_space<vmem>>, %arg9: memref<512x256xbf16, #tpu.memory_space<vmem>>, %arg10: memref<1x256xf32, #tpu.memory_space<vmem>>, %arg11: memref<256x128xbf16, #tpu.memory_space<vmem>>, %arg12: memref<1x128xf32, #tpu.memory_space<vmem>>, %arg13: memref<16x128xf32, #tpu.memory_space<vmem>>, %arg14: memref<16x1024xf32, #tpu.memory_space<vmem>>) attributes {dimension_semantics = [#tpu.dimension_semantics<parallel>, #tpu.dimension_semantics<arbitrary>], iteration_bounds = array<i64: 1, 1>, scalar_prefetch = 0 : i64, scratch_operands = 1 : i64, tpu.core_type = #tpu.core_type<tc>, window_params = [{transform_indices = @transform_0, window_bounds = array<i64: 16, 128>}, {transform_indices = @transform_1, window_bounds = array<i64: 16, 128>}, {transform_indices = @transform_2, window_bounds = array<i64: 128, 1024>}, {transform_indices = @transform_3, window_bounds = array<i64: 128, 1024>}, {pipeline_mode = #tpu.pipeline_mode<synchronous>, transform_indices = @transform_4, window_bounds = array<i64: 1, 1024>}, {pipeline_mode = #tpu.pipeline_mode<synchronous>, transform_indices = @transform_5, window_bounds = array<i64: 1024, 512>}, {pipeline_mode = #tpu.pipeline_mode<synchronous>, transform_indices = @transform_6, window_bounds = array<i64: 1, 512>}, {pipeline_mode = #tpu.pipeline_mode<synchronous>, transform_indices = @transform_7, window_bounds = array<i64: 512, 256>}, {pipeline_mode = #tpu.pipeline_mode<synchronous>, transform_indices = @transform_8, window_bounds = array<i64: 1, 256>}, {pipeline_mode = #tpu.pipeline_mode<synchronous>, transform_indices = @transform_9, window_bounds = array<i64: 256, 128>}, {pipeline_mode = #tpu.pipeline_mode<synchronous>, transform_indices = @transform_10, window_bounds = array<i64: 1, 128>}, {transform_indices = @transform_11, window_bounds = array<i64: 16, 128>}]} {
    %c0_i32 = arith.constant 0 : i32
    %0 = arith.cmpi eq, %arg1, %c0_i32 : i32
    %1 = arith.extui %0 : i1 to i32
    %c0_i32_0 = arith.constant 0 : i32
    %2 = arith.cmpi ne, %1, %c0_i32_0 : i32
    scf.if %2 {
      %cst_19 = arith.constant 0.000000e+00 : f32
      %18 = vector.broadcast %cst_19 : f32 to vector<16x1024xf32>
      %c0_20 = arith.constant 0 : index
      %c0_21 = arith.constant 0 : index
      %19 = vector.load %arg14[%c0_20, %c0_21] : memref<16x1024xf32, #tpu.memory_space<vmem>>, vector<16x1024xf32>
      tpu.vector_store %arg14[%c0_20, %c0_21], %18 {strides = array<i32>} : memref<16x1024xf32, #tpu.memory_space<vmem>>, vector<16x1024xf32>,
    } else {
    }
    %c0 = arith.constant 0 : index
    %c0_1 = arith.constant 0 : index
    %3 = vector.load %arg14[%c0, %c0_1] : memref<16x1024xf32, #tpu.memory_space<vmem>>, vector<16x1024xf32>
    %c0_2 = arith.constant 0 : index
    %c0_3 = arith.constant 0 : index
    %4 = vector.load %arg2[%c0_2, %c0_3] : memref<16x128xbf16, #tpu.memory_space<vmem>>, vector<16x128xbf16>
    %c0_4 = arith.constant 0 : index
    %c0_5 = arith.constant 0 : index
    %5 = vector.load %arg4[%c0_4, %c0_5] : memref<128x1024xbf16, #tpu.memory_space<vmem>>, vector<128x1024xbf16>
    %cst = arith.constant dense<0.000000e+00> : vector<16x1024xf32>
    %6 = tpu.matmul %4, %5, %cst {dimension_numbers = #tpu.dot_dimension_numbers<[1], [0], [0], [1], [0, 0, 1, 1], [], []>} : vector<16x128xbf16>, vector<128x1024xbf16>, vector<16x1024xf32> -> vector<16x1024xf32>
    %7 = arith.addf %3, %6 : vector<16x1024xf32>
    %c0_6 = arith.constant 0 : index
    %c0_7 = arith.constant 0 : index
    %8 = vector.load %arg14[%c0_6, %c0_7] : memref<16x1024xf32, #tpu.memory_space<vmem>>, vector<16x1024xf32>
    tpu.vector_store %arg14[%c0_6, %c0_7], %7 {strides = array<i32>} : memref<16x1024xf32, #tpu.memory_space<vmem>>, vector<16x1024xf32>,
    %c0_8 = arith.constant 0 : index
    %c0_9 = arith.constant 0 : index
    %9 = vector.load %arg14[%c0_8, %c0_9] : memref<16x1024xf32, #tpu.memory_space<vmem>>, vector<16x1024xf32>
    %c0_10 = arith.constant 0 : index
    %c0_11 = arith.constant 0 : index
    %10 = vector.load %arg3[%c0_10, %c0_11] : memref<16x128xbf16, #tpu.memory_space<vmem>>, vector<16x128xbf16>
    %c0_12 = arith.constant 0 : index
    %c0_13 = arith.constant 0 : index
    %11 = vector.load %arg5[%c0_12, %c0_13] : memref<128x1024xbf16, #tpu.memory_space<vmem>>, vector<128x1024xbf16>
    %cst_14 = arith.constant dense<0.000000e+00> : vector<16x1024xf32>
    %12 = tpu.matmul %10, %11, %cst_14 {dimension_numbers = #tpu.dot_dimension_numbers<[1], [0], [0], [1], [0, 0, 1, 1], [], []>} : vector<16x128xbf16>, vector<128x1024xbf16>, vector<16x1024xf32> -> vector<16x1024xf32>
    %13 = arith.addf %9, %12 : vector<16x1024xf32>
    %c0_15 = arith.constant 0 : index
    %c0_16 = arith.constant 0 : index
    %14 = vector.load %arg14[%c0_15, %c0_16] : memref<16x1024xf32, #tpu.memory_space<vmem>>, vector<16x1024xf32>
    tpu.vector_store %arg14[%c0_15, %c0_16], %13 {strides = array<i32>} : memref<16x1024xf32, #tpu.memory_space<vmem>>, vector<16x1024xf32>,
    %c0_i32_17 = arith.constant 0 : i32
    %15 = arith.cmpi eq, %arg1, %c0_i32_17 : i32
    %16 = arith.extui %15 : i1 to i32
    %c0_i32_18 = arith.constant 0 : i32
    %17 = arith.cmpi ne, %16, %c0_i32_18 : i32
    scf.if %17 {
      %c0_19 = arith.constant 0 : index
      %c0_20 = arith.constant 0 : index
      %18 = vector.load %arg14[%c0_19, %c0_20] : memref<16x1024xf32, #tpu.memory_space<vmem>>, vector<16x1024xf32>
      %c0_21 = arith.constant 0 : index
      %c0_22 = arith.constant 0 : index
      %19 = vector.load %arg6[%c0_21, %c0_22] : memref<1x1024xf32, #tpu.memory_space<vmem>>, vector<1x1024xf32>
      %20 = vector.broadcast %19 : vector<1x1024xf32> to vector<16x1024xf32>
      %21 = arith.addf %18, %20 : vector<16x1024xf32>
      %cst_23 = arith.constant 0.000000e+00 : f32
      %22 = vector.broadcast %cst_23 : f32 to vector<16x1024xf32>
      %23 = arith.maximumf %21, %22 : vector<16x1024xf32>
      %24 = arith.truncf %23 : vector<16x1024xf32> to vector<16x1024xbf16>
      %c0_24 = arith.constant 0 : index
      %c0_25 = arith.constant 0 : index
      %25 = vector.load %arg7[%c0_24, %c0_25] : memref<1024x512xbf16, #tpu.memory_space<vmem>>, vector<1024x512xbf16>
      %cst_26 = arith.constant dense<0.000000e+00> : vector<16x512xf32>
      %26 = tpu.matmul %24, %25, %cst_26 {dimension_numbers = #tpu.dot_dimension_numbers<[1], [0], [0], [1], [0, 0, 1, 1], [], []>} : vector<16x1024xbf16>, vector<1024x512xbf16>, vector<16x512xf32> -> vector<16x512xf32>
      %c0_27 = arith.constant 0 : index
      %c0_28 = arith.constant 0 : index
      %27 = vector.load %arg8[%c0_27, %c0_28] : memref<1x512xf32, #tpu.memory_space<vmem>>, vector<1x512xf32>
      %28 = vector.broadcast %27 : vector<1x512xf32> to vector<16x512xf32>
      %29 = arith.addf %26, %28 : vector<16x512xf32>
      %cst_29 = arith.constant 0.000000e+00 : f32
      %30 = vector.broadcast %cst_29 : f32 to vector<16x512xf32>
      %31 = arith.maximumf %29, %30 : vector<16x512xf32>
      %32 = arith.truncf %31 : vector<16x512xf32> to vector<16x512xbf16>
      %c0_30 = arith.constant 0 : index
      %c0_31 = arith.constant 0 : index
      %33 = vector.load %arg9[%c0_30, %c0_31] : memref<512x256xbf16, #tpu.memory_space<vmem>>, vector<512x256xbf16>
      %cst_32 = arith.constant dense<0.000000e+00> : vector<16x256xf32>
      %34 = tpu.matmul %32, %33, %cst_32 {dimension_numbers = #tpu.dot_dimension_numbers<[1], [0], [0], [1], [0, 0, 1, 1], [], []>} : vector<16x512xbf16>, vector<512x256xbf16>, vector<16x256xf32> -> vector<16x256xf32>
      %c0_33 = arith.constant 0 : index
      %c0_34 = arith.constant 0 : index
      %35 = vector.load %arg10[%c0_33, %c0_34] : memref<1x256xf32, #tpu.memory_space<vmem>>, vector<1x256xf32>
      %36 = vector.broadcast %35 : vector<1x256xf32> to vector<16x256xf32>
      %37 = arith.addf %34, %36 : vector<16x256xf32>
      %cst_35 = arith.constant 0.000000e+00 : f32
      %38 = vector.broadcast %cst_35 : f32 to vector<16x256xf32>
      %39 = arith.maximumf %37, %38 : vector<16x256xf32>
      %40 = arith.truncf %39 : vector<16x256xf32> to vector<16x256xbf16>
      %c0_36 = arith.constant 0 : index
      %c0_37 = arith.constant 0 : index
      %41 = vector.load %arg11[%c0_36, %c0_37] : memref<256x128xbf16, #tpu.memory_space<vmem>>, vector<256x128xbf16>
      %cst_38 = arith.constant dense<0.000000e+00> : vector<16x128xf32>
      %42 = tpu.matmul %40, %41, %cst_38 {dimension_numbers = #tpu.dot_dimension_numbers<[1], [0], [0], [1], [0, 0, 1, 1], [], []>} : vector<16x256xbf16>, vector<256x128xbf16>, vector<16x128xf32> -> vector<16x128xf32>
      %c0_39 = arith.constant 0 : index
      %c0_40 = arith.constant 0 : index
      %43 = vector.load %arg12[%c0_39, %c0_40] : memref<1x128xf32, #tpu.memory_space<vmem>>, vector<1x128xf32>
      %44 = vector.broadcast %43 : vector<1x128xf32> to vector<16x128xf32>
      %45 = arith.addf %42, %44 : vector<16x128xf32>
      %c0_41 = arith.constant 0 : index
      %c0_42 = arith.constant 0 : index
      %46 = vector.load %arg13[%c0_41, %c0_42] : memref<16x128xf32, #tpu.memory_space<vmem>>, vector<16x128xf32>
      tpu.vector_store %arg13[%c0_41, %c0_42], %45 {strides = array<i32>} : memref<16x128xf32, #tpu.memory_space<vmem>>, vector<16x128xf32>,
    } else {
    }
    return
  }
  func.func @transform_0(%arg0: i32, %arg1: i32) -> (i32, i32) {
    %c0_i32 = arith.constant 0 : i32
    return %arg0, %arg1 : i32, i32
  }
  func.func @transform_1(%arg0: i32, %arg1: i32) -> (i32, i32) {
    %c0_i32 = arith.constant 0 : i32
    return %arg0, %arg1 : i32, i32
  }
  func.func @transform_2(%arg0: i32, %arg1: i32) -> (i32, i32) {
    %c0_i32 = arith.constant 0 : i32
    %c0_i32_0 = arith.constant 0 : i32
    return %arg1, %c0_i32 : i32, i32
  }
  func.func @transform_3(%arg0: i32, %arg1: i32) -> (i32, i32) {
    %c0_i32 = arith.constant 0 : i32
    %c0_i32_0 = arith.constant 0 : i32
    return %arg1, %c0_i32 : i32, i32
  }
  func.func @transform_4(%arg0: i32, %arg1: i32) -> (i32, i32) {
    %c0_i32 = arith.constant 0 : i32
    %c0_i32_0 = arith.constant 0 : i32
    %c0_i32_1 = arith.constant 0 : i32
    return %c0_i32, %c0_i32_0 : i32, i32
  }
  func.func @transform_5(%arg0: i32, %arg1: i32) -> (i32, i32) {
    %c0_i32 = arith.constant 0 : i32
    %c0_i32_0 = arith.constant 0 : i32
    %c0_i32_1 = arith.constant 0 : i32
    return %c0_i32, %c0_i32_0 : i32, i32
  }
  func.func @transform_6(%arg0: i32, %arg1: i32) -> (i32, i32) {
    %c0_i32 = arith.constant 0 : i32
    %c0_i32_0 = arith.constant 0 : i32
    %c0_i32_1 = arith.constant 0 : i32
    return %c0_i32, %c0_i32_0 : i32, i32
  }
  func.func @transform_7(%arg0: i32, %arg1: i32) -> (i32, i32) {
    %c0_i32 = arith.constant 0 : i32
    %c0_i32_0 = arith.constant 0 : i32
    %c0_i32_1 = arith.constant 0 : i32
    return %c0_i32, %c0_i32_0 : i32, i32
  }
  func.func @transform_8(%arg0: i32, %arg1: i32) -> (i32, i32) {
    %c0_i32 = arith.constant 0 : i32
    %c0_i32_0 = arith.constant 0 : i32
    %c0_i32_1 = arith.constant 0 : i32
    return %c0_i32, %c0_i32_0 : i32, i32
  }
  func.func @transform_9(%arg0: i32, %arg1: i32) -> (i32, i32) {
    %c0_i32 = arith.constant 0 : i32
    %c0_i32_0 = arith.constant 0 : i32
    %c0_i32_1 = arith.constant 0 : i32
    return %c0_i32, %c0_i32_0 : i32, i32
  }
  func.func @transform_10(%arg0: i32, %arg1: i32) -> (i32, i32) {
    %c0_i32 = arith.constant 0 : i32
    %c0_i32_0 = arith.constant 0 : i32
    %c0_i32_1 = arith.constant 0 : i32
    return %c0_i32, %c0_i32_0 : i32, i32
  }
  func.func @transform_11(%arg0: i32, %arg1: i32) -> (i32, i32) {
    %c0_i32 = arith.constant 0 : i32
    %c0_i32_0 = arith.constant 0 : i32
    return %arg0, %c0_i32 : i32, i32
  }
}

</mosaic_0001>

<bundles_post_ra>
// kernel: tpu_custom_call.1
= control target key start
LH: loop header
LB: loop body
LE: loop exit
PB: predicated region body
PF: predicated region fallthrough
CT: control target
= control target key end

     0   :  { %16 = vsyncpa [#allocation4], 0  ;;  %s6957_s0 = inlined_call_operand.hbm [shape: bf16[16,128], index: 0, kind: input, shape index: {}]   ;;  %s6958_s1 = inlined_call_operand.hbm [shape: bf16[16,128], index: 1, kind: input, shape index: {}]   ;;  %s6959_s2 = inlined_call_operand.hbm [shape: bf16[128,1024], index: 2, kind: input, shape index: {}]   ;;  %s6960_s3 = inlined_call_operand.hbm [shape: bf16[128,1024], index: 3, kind: input, shape index: {}]   ;;  %s6961_s4 = inlined_call_operand.hbm [shape: f32[1,1024], index: 4, kind: input, shape index: {}]   ;;  %s6962_s5 = inlined_call_operand.hbm [shape: bf16[1024,512], index: 5, kind: input, shape index: {}]   ;;  %s6963_s6 = inlined_call_operand.vmem [shape: f32[1,512], index: 6, kind: input, shape index: {}]   ;;  %s6964_s7 = inlined_call_operand.hbm [shape: bf16[512,256], index: 7, kind: input, shape index: {}]   ;;  %s6965_s8 = inlined_call_operand.vmem [shape: f32[1,256], index: 8, kind: input, shape index: {}]   ;;  %s6966_s9 = inlined_call_operand.hbm [shape: bf16[256,128], index: 9, kind: input, shape index: {}]   ;;  %s6967_s10 = inlined_call_operand.vmem [shape: f32[1,128], index: 10, kind: input, shape index: {}]   ;;  %s6968_s11 = inlined_call_operand.hbm [shape: f32[16,128], index: 11, kind: output, shape index: {}]  }
   0x1   :  { %17 = vsyncpa [#allocation7], 0 }
   0x2   :  { %18 = vsyncpa [#allocation10], 0 }
   0x3   :  { %19 = vsyncpa [#allocation13], 0 }
   0x4   :  { %20 = vsyncpa [#allocation16], 0 }
   0x5   :  { %21 = vsyncpa [#allocation5], 0  ;;  %s39_s19 = sshll.u32 %s6958_s1, 4  ;;  %s6638_s20 = smov [#allocation6]   ;;  %s40_s19 = int_to_ptr.hbm [resolvable:$true] %s39_s19 }
   0x6   :  { %s41_s21 = sshll.u32 %s6638_s20, 4  ;;  %s6639_s22 = smov 64   ;;  %s42_s21 = int_to_ptr.vmem [resolvable:$true] %s41_s21 }
   0x7   :  { %s6640_s23 = smov 4   ;;  %s65_s26 = sshll.u32 %s6960_s3, 4  ;;  %s66_s26 = int_to_ptr.hbm [resolvable:$true] %s65_s26 }
   0x8   :  { %47 = dma.hbm_to_vmem [thread:$0]  %s40_s19, 128, %s42_s21, [#allocation7], %s6639_s22, %s6639_s22, %s6640_s23  }
   0x9   :  { %s6641_s27 = smov [#allocation9]   ;;  %s89_s1 = sshll.u32 %s6962_s5, 4  ;;  %s90_s1 = int_to_ptr.hbm [resolvable:$true] %s89_s1 }
   0xa   :  { %s67_s28 = sshll.u32 %s6641_s27, 4  ;;  %s6642_s12 = smov 512   ;;  %s68_s28 = int_to_ptr.vmem [resolvable:$true] %s67_s28 }
   0xb   :  { %s6643_s13 = smov 32   ;;  %s6644_s14 = smov [#allocation12]  }
   0xc   :  { %73 = dma.hbm_to_vmem [thread:$0]  %s66_s26, 8192, %s68_s28, [#allocation10], %s6642_s12, %s6642_s12, %s6643_s13  }
   0xd   :  { %s91_s15 = sshll.u32 %s6644_s14, 4  ;;  %s26_s18 = sshll.u32 %s6957_s0, 4  ;;  %s92_s15 = int_to_ptr.vmem [resolvable:$true] %s91_s15  ;;  %s27_s18 = int_to_ptr.hbm [resolvable:$true] %s26_s18 }
   0xe   :  { %s6645_s3 = smov 256   ;;  %s6646_s19 = smov 16  }
   0xf   :  { %97 = dma.hbm_to_vmem [thread:$0]  %s90_s1, 32768, %s92_s15, [#allocation13], %s6645_s3, %s6645_s3, %s6646_s19  }
  0x10   :  { %s6647_s20 = smov [#allocation3]   ;;  %s52_s25 = sshll.u32 %s6959_s2, 4  ;;  %s53_s25 = int_to_ptr.hbm [resolvable:$true] %s52_s25 }
  0x11   :  { %s28_s21 = sshll.u32 %s6647_s20, 4  ;;  %s79_s0 = sshll.u32 %s6961_s4, 4  ;;  %s29_s21 = int_to_ptr.vmem [resolvable:$true] %s28_s21  ;;  %s80_s0 = int_to_ptr.hbm [resolvable:$true] %s79_s0 }
  0x12   :  { %34 = dma.hbm_to_vmem [thread:$0]  %s27_s18, 128, %s29_s21, [#allocation4], %s6639_s22, %s6639_s22, %s6640_s23  }
  0x13   :  { %s6648_s28 = smov [#allocation8]   ;;  %s6649_s30 = smov [#allocation11]  }
  0x14   :  { %s54_s29 = sshll.u32 %s6648_s28, 4  ;;  %s81_s1 = sshll.u32 %s6649_s30, 4  ;;  %s55_s29 = int_to_ptr.vmem [resolvable:$true] %s54_s29  ;;  %s82_s1 = int_to_ptr.vmem [resolvable:$true] %s81_s1 }
  0x15   :  { %60 = dma.hbm_to_vmem [thread:$0]  %s53_s25, 8192, %s55_s29, [#allocation7], %s6642_s12, %s6642_s12, %s6643_s13  }
  0x16   :  { %s104_s2 = sshll.u32 %s6964_s7, 4  ;;  %s6650_s16 = smov [#allocation14]   ;;  %s105_s2 = int_to_ptr.hbm [resolvable:$true] %s104_s2 }
  0x17   :  { %84 = dma.hbm_to_vmem [thread:$0]  %s80_s0, 128, %s82_s1, [#allocation10]  }
  0x18   :  { %s106_s17 = sshll.u32 %s6650_s16, 4  ;;  %s119_s4 = sshll.u32 %s6966_s9, 4  ;;  %s107_s17 = int_to_ptr.vmem [resolvable:$true] %s106_s17  ;;  %s120_s4 = int_to_ptr.hbm [resolvable:$true] %s119_s4 }
  0x19   :  { %s6651_s19 = smov 128   ;;  %s6652_s20 = smov 8  }
  0x1a   :  { %112 = dma.hbm_to_vmem [thread:$0]  %s105_s2, 8192, %s107_s17, [#allocation13], %s6651_s19, %s6651_s19, %s6652_s20  }
  0x1b   :  { %s6653_s12 = smov [#allocation15]  }
  0x1c   :  { %s121_s13 = sshll.u32 %s6653_s12, 4  ;;  %s122_s13 = int_to_ptr.vmem [resolvable:$true] %s121_s13 }
  0x1d   :  { %127 = dma.hbm_to_vmem [thread:$0]  %s120_s4, 2048, %s122_s13, [#allocation16], %s6639_s22, %s6639_s22, %s6640_s23  }
  0x1e   :  { %6626 = dma.done.wait [#allocation4], 128  }
  0x1f   :  { %6627 = vsyncadd [#allocation4], 4294967168 }
  0x20   :  { %6628 = dma.done.wait [#allocation7], 8320  }
  0x21   :  { %6629 = vsyncadd [#allocation7], 4294958976 }
  0x22   :  { %6630 = dma.done.wait [#allocation10], 8320  }
  0x23   :  { %6631 = vsyncadd [#allocation10], 4294958976 }
  0x24   :  { %6632 = dma.done.wait [#allocation13], 40960  }
  0x25   :  { %6633 = vsyncadd [#allocation13], 4294926336 }
  0x26   :  { %6634 = dma.done.wait [#allocation16], 2048  }
  0x27   :  { %6635 = vsyncadd [#allocation16], 4294965248  ;;  %v4292_v0 = vld [vmem:[#allocation8 + $0x1c0] sm:$0xf]  ;;  %v5983_v2 = vld [vmem:[#allocation8 + $0x1c4] sm:$0xf] }
  0x28   :  { %v5987_v1 = vld [vmem:[#allocation8 + $0x1dc] sm:$0xf0]  ;;  %v4294_v4 = vld [vmem:[#allocation8 + $0x1e0] sm:$0xf0]  ;;  %v4300_v5 = vld [vmem:[#allocation8 + $0x1c8] sm:$0xf] }
  0x29   :  { %v4293_v3 = vor.u32 %v5987_v1, %v4292_v0  ;;  %v5988_v6 = vld [vmem:[#allocation8 + $0x1e4] sm:$0xf0]  ;;  %v4297_v7 = vor.u32 %v5983_v2, %v4294_v4  ;;  %v5984_v9 = vld [vmem:[#allocation8 + $0x1cc] sm:$0xf]  ;;  %v4260_v11 = vld [vmem:[#allocation8 + $0x180] sm:$0xf] }
  0x2a   :  { %v4301_v8 = vor.u32 %v5988_v6, %v4300_v5  ;;  %v4302_v10 = vld [vmem:[#allocation8 + $0x1e8] sm:$0xf0]  ;;  %v5979_v13 = vld [vmem:[#allocation8 + $0x19c] sm:$0xf0]  ;;  %v5975_v14 = vld [vmem:[#allocation8 + $0x184] sm:$0xf] }
  0x2b   :  { %590 = vmatpush.bf16.msra.mxu0 %v4293_v3  ;;  %v4305_v12 = vor.u32 %v5984_v9, %v4302_v10  ;;  %v4262_v15 = vld [vmem:[#allocation8 + $0x1a0] sm:$0xf0]  ;;  %604 = vmatpush.bf16.msra.mxu1 %v4297_v7  ;;  %v4261_v16 = vor.u32 %v5979_v13, %v4260_v11  ;;  %v4268_v18 = vld [vmem:[#allocation8 + $0x188] sm:$0xf]  ;;  %v5976_v20 = vld [vmem:[#allocation8 + $0x18c] sm:$0xf] }
  0x2c   :  { %618 = vmatpush.bf16.msra.mxu2 %v4301_v8  ;;  %v4265_v17 = vor.u32 %v5975_v14, %v4262_v15  ;;  %v5980_v19 = vld [vmem:[#allocation8 + $0x1a4] sm:$0xf0]  ;;  %v4270_v22 = vld [vmem:[#allocation8 + $0x1a8] sm:$0xf0]  ;;  %v4228_v23 = vld [vmem:[#allocation8 + $0x140] sm:$0xf] }
  0x2d   :  { %632 = vmatpush.bf16.msra.mxu3 %v4305_v12  ;;  %v4269_v21 = vor.u32 %v5980_v19, %v4268_v18  ;;  %v5971_v24 = vld [vmem:[#allocation8 + $0x15c] sm:$0xf0]  ;;  %v4273_v25 = vor.u32 %v5976_v20, %v4270_v22  ;;  %v5967_v26 = vld [vmem:[#allocation8 + $0x144] sm:$0xf]  ;;  %v4236_v28 = vld [vmem:[#allocation8 + $0x148] sm:$0xf] }
  0x2e   :  { %v4230_v27 = vld [vmem:[#allocation8 + $0x160] sm:$0xf0]  ;;  %v4229_v29 = vor.u32 %v5971_v24, %v4228_v23  ;;  %v5972_v30 = vld [vmem:[#allocation8 + $0x164] sm:$0xf0]  ;;  %v5968_v31 = vld [vmem:[#allocation8 + $0x14c] sm:$0xf] }
  0x2f   :  { %591 = vmatpush.bf16.msra.mxu0 %v4261_v16  ;;  %v4238_v32 = vld [vmem:[#allocation8 + $0x168] sm:$0xf0]  ;;  %605 = vmatpush.bf16.msra.mxu1 %v4265_v17  ;;  %v4233_v33 = vor.u32 %v5967_v26, %v4230_v27  ;;  %v4237_v34 = vor.u32 %v5972_v30, %v4236_v28  ;;  %v4196_v35 = vld [vmem:[#allocation8 + $0x100] sm:$0xf]  ;;  %v5959_v37 = vld [vmem:[#allocation8 + $0x104] sm:$0xf] }
  0x30   :  { %619 = vmatpush.bf16.msra.mxu2 %v4269_v21  ;;  %v5963_v36 = vld [vmem:[#allocation8 + $0x11c] sm:$0xf0]  ;;  %v4241_v38 = vor.u32 %v5968_v31, %v4238_v32  ;;  %v4198_v39 = vld [vmem:[#allocation8 + $0x120] sm:$0xf0]  ;;  %v4204_v40 = vld [vmem:[#allocation8 + $0x108] sm:$0xf] }
  0x31   :  { %633 = vmatpush.bf16.msra.mxu3 %v4273_v25  ;;  %v5964_v41 = vld [vmem:[#allocation8 + $0x124] sm:$0xf0]  ;;  %v5960_v42 = vld [vmem:[#allocation8 + $0x10c] sm:$0xf]  ;;  %v4197_v44 = vor.u32 %v5963_v36, %v4196_v35  ;;  %v4201_v45 = vor.u32 %v5959_v37, %v4198_v39  ;;  %v4164_v47 = vld [vmem:[#allocation8 + $0xc0] sm:$0xf] }
  0x32   :  { %v4206_v43 = vld [vmem:[#allocation8 + $0x128] sm:$0xf0]  ;;  %v4205_v46 = vor.u32 %v5964_v41, %v4204_v40  ;;  %v5955_v48 = vld [vmem:[#allocation8 + $0xdc] sm:$0xf0]  ;;  %v5951_v49 = vld [vmem:[#allocation8 + $0xc4] sm:$0xf] }
  0x33   :  { %592 = vmatpush.bf16.msra.mxu0 %v4229_v29  ;;  %606 = vmatpush.bf16.msra.mxu1 %v4233_v33  ;;  %v4209_v50 = vor.u32 %v5960_v42, %v4206_v43  ;;  %v4166_v51 = vld [vmem:[#allocation8 + $0xe0] sm:$0xf0]  ;;  %v4172_v52 = vld [vmem:[#allocation8 + $0xc8] sm:$0xf]  ;;  %v5952_v54 = vld [vmem:[#allocation8 + $0xcc] sm:$0xf]  ;;  %v4165_v56 = vor.u32 %v5955_v48, %v4164_v47 }
  0x34   :  { %620 = vmatpush.bf16.msra.mxu2 %v4237_v34  ;;  %v5956_v53 = vld [vmem:[#allocation8 + $0xe4] sm:$0xf0]  ;;  %v4174_v55 = vld [vmem:[#allocation8 + $0xe8] sm:$0xf0]  ;;  %v4169_v57 = vor.u32 %v5951_v49, %v4166_v51  ;;  %v4132_v59 = vld [vmem:[#allocation8 + $0x80] sm:$0xf] }
  0x35   :  { %634 = vmatpush.bf16.msra.mxu3 %v4241_v38  ;;  %v4173_v58 = vor.u32 %v5956_v53, %v4172_v52  ;;  %v5947_v60 = vld [vmem:[#allocation8 + $0x9c] sm:$0xf0]  ;;  %v5943_v61 = vld [vmem:[#allocation8 + $0x84] sm:$0xf]  ;;  %v4177_v62 = vor.u32 %v5952_v54, %v4174_v55  ;;  %v4140_v0 = vld [vmem:[#allocation8 + $0x88] sm:$0xf] }
  0x36   :  { %v4134_v63 = vld [vmem:[#allocation8 + $0xa0] sm:$0xf0]  ;;  %v5948_v1 = vld [vmem:[#allocation8 + $0xa4] sm:$0xf0]  ;;  %v5944_v2 = vld [vmem:[#allocation8 + $0x8c] sm:$0xf]  ;;  %v4133_v4 = vor.u32 %v5947_v60, %v4132_v59 }
  0x37   :  { %593 = vmatpush.bf16.msra.mxu0 %v4197_v44  ;;  %607 = vmatpush.bf16.msra.mxu1 %v4201_v45  ;;  %v4142_v3 = vld [vmem:[#allocation8 + $0xa8] sm:$0xf0]  ;;  %v4137_v5 = vor.u32 %v5943_v61, %v4134_v63  ;;  %v4141_v6 = vor.u32 %v5948_v1, %v4140_v0  ;;  %v4100_v7 = vld [vmem:[#allocation8 + $0x40] sm:$0xf]  ;;  %v5935_v9 = vld [vmem:[#allocation8 + $0x44] sm:$0xf] }
  0x38   :  { %621 = vmatpush.bf16.msra.mxu2 %v4205_v46  ;;  %v5939_v8 = vld [vmem:[#allocation8 + $0x5c] sm:$0xf0]  ;;  %v4145_v10 = vor.u32 %v5944_v2, %v4142_v3  ;;  %v4102_v11 = vld [vmem:[#allocation8 + $0x60] sm:$0xf0]  ;;  %v4108_v12 = vld [vmem:[#allocation8 + $0x48] sm:$0xf] }
  0x39   :  { %635 = vmatpush.bf16.msra.mxu3 %v4209_v50  ;;  %v5940_v13 = vld [vmem:[#allocation8 + $0x64] sm:$0xf0]  ;;  %v5936_v14 = vld [vmem:[#allocation8 + $0x4c] sm:$0xf]  ;;  %v4101_v16 = vor.u32 %v5939_v8, %v4100_v7  ;;  %v4068_v17 = vld [vmem:[#allocation8] sm:$0xf]  ;;  %v4105_v19 = vor.u32 %v5935_v9, %v4102_v11 }
  0x3a   :  { %v4110_v15 = vld [vmem:[#allocation8 + $0x68] sm:$0xf0]  ;;  %v5931_v18 = vld [vmem:[#allocation8 + $0x1c] sm:$0xf0]  ;;  %v4109_v20 = vor.u32 %v5940_v13, %v4108_v12  ;;  %v5927_v21 = vld [vmem:[#allocation8 + $0x4] sm:$0xf] }
  0x3b   :  { %594 = vmatpush.bf16.msra.mxu0 %v4165_v56  ;;  %608 = vmatpush.bf16.msra.mxu1 %v4169_v57  ;;  %v4070_v22 = vld [vmem:[#allocation8 + $0x20] sm:$0xf0]  ;;  %v4076_v23 = vld [vmem:[#allocation8 + $0x8] sm:$0xf]  ;;  %v4113_v24 = vor.u32 %v5936_v14, %v4110_v15  ;;  %v5928_v26 = vld [vmem:[#allocation8 + $0xc] sm:$0xf]  ;;  %v4069_v31 = vor.u32 %v5931_v18, %v4068_v17 }
  0x3c   :  { %622 = vmatpush.bf16.msra.mxu2 %v4173_v58  ;;  %v5932_v25 = vld [vmem:[#allocation8 + $0x24] sm:$0xf0]  ;;  %v4078_v27 = vld [vmem:[#allocation8 + $0x28] sm:$0xf0]  ;;  %v4308_v28 = vld [vmem:[#allocation8 + $0x1d0] sm:$0xf]  ;;  %v4073_v35 = vor.u32 %v5927_v21, %v4070_v22 }
  0x3d   :  { %636 = vmatpush.bf16.msra.mxu3 %v4177_v62  ;;  %v5989_v29 = vld [vmem:[#allocation8 + $0x1ec] sm:$0xf0]  ;;  %v5985_v30 = vld [vmem:[#allocation8 + $0x1d4] sm:$0xf]  ;;  %v4316_v33 = vld [vmem:[#allocation8 + $0x1d8] sm:$0xf]  ;;  %v4077_v36 = vor.u32 %v5932_v25, %v4076_v23  ;;  %v4081_v39 = vor.u32 %v5928_v26, %v4078_v27 }
  0x3e   :  { %v4310_v32 = vld [vmem:[#allocation8 + $0x1f0] sm:$0xf0]  ;;  %v5990_v34 = vld [vmem:[#allocation8 + $0x1f4] sm:$0xf0]  ;;  %v5986_v37 = vld [vmem:[#allocation8 + $0x1dc] sm:$0xf]  ;;  %v4309_v40 = vor.u32 %v5989_v29, %v4308_v28 }
  0x3f   :  { %595 = vmatpush.bf16.msra.mxu0 %v4133_v4  ;;  %609 = vmatpush.bf16.msra.mxu1 %v4137_v5  ;;  %v4318_v38 = vld [vmem:[#allocation8 + $0x1f8] sm:$0xf0]  ;;  %v4313_v41 = vor.u32 %v5985_v30, %v4310_v32  ;;  %v4317_v42 = vor.u32 %v5990_v34, %v4316_v33  ;;  %v4276_v43 = vld [vmem:[#allocation8 + $0x190] sm:$0xf]  ;;  %v5977_v45 = vld [vmem:[#allocation8 + $0x194] sm:$0xf] }
  0x40   :  { %623 = vmatpush.bf16.msra.mxu2 %v4141_v6  ;;  %v5981_v44 = vld [vmem:[#allocation8 + $0x1ac] sm:$0xf0]  ;;  %v4321_v46 = vor.u32 %v5986_v37, %v4318_v38  ;;  %v4278_v47 = vld [vmem:[#allocation8 + $0x1b0] sm:$0xf0]  ;;  %v4284_v48 = vld [vmem:[#allocation8 + $0x198] sm:$0xf] }
  0x41   :  { %637 = vmatpush.bf16.msra.mxu3 %v4145_v10  ;;  %v5982_v49 = vld [vmem:[#allocation8 + $0x1b4] sm:$0xf0]  ;;  %v5978_v50 = vld [vmem:[#allocation8 + $0x19c] sm:$0xf]  ;;  %v4277_v52 = vor.u32 %v5981_v44, %v4276_v43  ;;  %v4244_v53 = vld [vmem:[#allocation8 + $0x150] sm:$0xf]  ;;  %v4281_v54 = vor.u32 %v5977_v45, %v4278_v47 }
  0x42   :  { %v4286_v51 = vld [vmem:[#allocation8 + $0x1b8] sm:$0xf0]  ;;  %v4285_v55 = vor.u32 %v5982_v49, %v4284_v48  ;;  %v5973_v56 = vld [vmem:[#allocation8 + $0x16c] sm:$0xf0]  ;;  %v5969_v57 = vld [vmem:[#allocation8 + $0x154] sm:$0xf] }
  0x43   :  { %596 = vmatpush.bf16.msra.mxu0 %v4101_v16  ;;  %610 = vmatpush.bf16.msra.mxu1 %v4105_v19  ;;  %v6751_v58 = vld [vmem:[#allocation3] sm:$0xff]  ;;  %v4289_v59 = vor.u32 %v5978_v50, %v4286_v51  ;;  %v4252_v61 = vld [vmem:[#allocation8 + $0x158] sm:$0xf]  ;;  %v5970_v63 = vld [vmem:[#allocation8 + $0x15c] sm:$0xf]  ;;  %v4245_v1 = vor.u32 %v5973_v56, %v4244_v53  ;;  %s6654_s21 = smov [#allocation17]  }
  0x44   :  { %624 = vmatpush.bf16.msra.mxu2 %v4109_v20  ;;  %v4246_v60 = vld [vmem:[#allocation8 + $0x170] sm:$0xf0]  ;;  %v5974_v62 = vld [vmem:[#allocation8 + $0x174] sm:$0xf0]  ;;  %v4254_v0 = vld [vmem:[#allocation8 + $0x178] sm:$0xf0] }
  0x45   :  { %638 = vmatpush.bf16.msra.mxu3 %v4113_v24  ;;  %v4249_v2 = vor.u32 %v5969_v57, %v4246_v60  ;;  %v4253_v3 = vor.u32 %v5974_v62, %v4252_v61  ;;  %v4212_v4 = vld [vmem:[#allocation8 + $0x110] sm:$0xf]  ;;  %v5961_v6 = vld [vmem:[#allocation8 + $0x114] sm:$0xf]  ;;  %v4257_v7 = vor.u32 %v5970_v63, %v4254_v0  ;;  %v4220_v9 = vld [vmem:[#allocation8 + $0x118] sm:$0xf] }
  0x46   :  { %v5965_v5 = vld [vmem:[#allocation8 + $0x12c] sm:$0xf0]  ;;  %v4214_v8 = vld [vmem:[#allocation8 + $0x130] sm:$0xf0]  ;;  %v5966_v10 = vld [vmem:[#allocation8 + $0x134] sm:$0xf0] }
  0x47   :  { %597 = vmatpush.bf16.msra.mxu0 %v4069_v31  ;;  %611 = vmatpush.bf16.msra.mxu1 %v4073_v35  ;;  %v5962_v11 = vld [vmem:[#allocation8 + $0x11c] sm:$0xf]  ;;  %v4213_v13 = vor.u32 %v5965_v5, %v4212_v4  ;;  %v4217_v14 = vor.u32 %v5961_v6, %v4214_v8  ;;  %v4221_v15 = vor.u32 %v5966_v10, %v4220_v9  ;;  %v4180_v16 = vld [vmem:[#allocation8 + $0xd0] sm:$0xf]  ;;  %v5953_v18 = vld [vmem:[#allocation8 + $0xd4] sm:$0xf] }
  0x48   :  { %625 = vmatpush.bf16.msra.mxu2 %v4077_v36  ;;  %v4222_v12 = vld [vmem:[#allocation8 + $0x138] sm:$0xf0]  ;;  %v5957_v17 = vld [vmem:[#allocation8 + $0xec] sm:$0xf0]  ;;  %v4182_v20 = vld [vmem:[#allocation8 + $0xf0] sm:$0xf0] }
  0x49   :  { %639 = vmatpush.bf16.msra.mxu3 %v4081_v39  ;;  %v4225_v19 = vor.u32 %v5962_v11, %v4222_v12  ;;  %v4188_v21 = vld [vmem:[#allocation8 + $0xd8] sm:$0xf]  ;;  %v5954_v23 = vld [vmem:[#allocation8 + $0xdc] sm:$0xf]  ;;  %v4181_v25 = vor.u32 %v5957_v17, %v4180_v16  ;;  %v4185_v26 = vor.u32 %v5953_v18, %v4182_v20  ;;  %v4148_v28 = vld [vmem:[#allocation8 + $0x90] sm:$0xf] }
  0x4a   :  { %612 = vmatmul.bf16.vlgmr.msra.gmra.mxu1 %v6751_v58  ;;  %598 = vmatmul.bf16.vlgmr.msra.gmra.mxu0 %v6751_v58  ;;  %v5958_v22 = vld [vmem:[#allocation8 + $0xf4] sm:$0xf0]  ;;  %v4190_v24 = vld [vmem:[#allocation8 + $0xf8] sm:$0xf0]  ;;  %v5949_v29 = vld [vmem:[#allocation8 + $0xac] sm:$0xf0] }
  0x4b   :  { %646 = vmatpush.bf16.msrb.mxu0 %v4309_v40  ;;  %660 = vmatpush.bf16.msrb.mxu1 %v4313_v41  ;;  %v4189_v27 = vor.u32 %v5958_v22, %v4188_v21  ;;  %v5945_v30 = vld [vmem:[#allocation8 + $0x94] sm:$0xf]  ;;  %v4193_v31 = vor.u32 %v5954_v23, %v4190_v24  ;;  %v4156_v33 = vld [vmem:[#allocation8 + $0x98] sm:$0xf]  ;;  %v5946_v35 = vld [vmem:[#allocation8 + $0x9c] sm:$0xf]  ;;  %v4149_v37 = vor.u32 %v5949_v29, %v4148_v28 }
  0x4c   :  { %674 = vmatpush.bf16.msrb.mxu2 %v4317_v42  ;;  %640 = vmatmul.bf16.vlgmr.msra.gmra.mxu3 %v6751_v58  ;;  %v4150_v32 = vld [vmem:[#allocation8 + $0xb0] sm:$0xf0]  ;;  %v5950_v34 = vld [vmem:[#allocation8 + $0xb4] sm:$0xf0]  ;;  %v4158_v36 = vld [vmem:[#allocation8 + $0xb8] sm:$0xf0] }
  0x4d   :  { %688 = vmatpush.bf16.msrb.mxu3 %v4321_v46  ;;  %626 = vmatmul.bf16.vlgmr.msra.gmra.mxu2 %v6751_v58  ;;  %v4153_v38 = vor.u32 %v5945_v30, %v4150_v32  ;;  %v4157_v39 = vor.u32 %v5950_v34, %v4156_v33  ;;  %v4116_v40 = vld [vmem:[#allocation8 + $0x50] sm:$0xf]  ;;  %v5937_v42 = vld [vmem:[#allocation8 + $0x54] sm:$0xf]  ;;  %v4161_v43 = vor.u32 %v5946_v35, %v4158_v36  ;;  %v4124_v45 = vld [vmem:[#allocation8 + $0x58] sm:$0xf] }
  0x4e   :  { %v5941_v41 = vld [vmem:[#allocation8 + $0x6c] sm:$0xf0]  ;;  %v4118_v44 = vld [vmem:[#allocation8 + $0x70] sm:$0xf0]  ;;  %v5942_v46 = vld [vmem:[#allocation8 + $0x74] sm:$0xf0] }
  0x4f   :  { %647 = vmatpush.bf16.msrb.mxu0 %v4277_v52  ;;  %661 = vmatpush.bf16.msrb.mxu1 %v4281_v54  ;;  %v5938_v47 = vld [vmem:[#allocation8 + $0x5c] sm:$0xf]  ;;  %v4117_v49 = vor.u32 %v5941_v41, %v4116_v40  ;;  %v4084_v50 = vld [vmem:[#allocation8 + $0x10] sm:$0xf]  ;;  %v4121_v52 = vor.u32 %v5937_v42, %v4118_v44  ;;  %v4125_v53 = vor.u32 %v5942_v46, %v4124_v45  ;;  %v5929_v54 = vld [vmem:[#allocation8 + $0x14] sm:$0xf] }
  0x50   :  { %675 = vmatpush.bf16.msrb.mxu2 %v4285_v55  ;;  %v4126_v48 = vld [vmem:[#allocation8 + $0x78] sm:$0xf0]  ;;  %v5933_v51 = vld [vmem:[#allocation8 + $0x2c] sm:$0xf0]  ;;  %v4086_v55 = vld [vmem:[#allocation8 + $0x30] sm:$0xf0] }
  0x51   :  { %689 = vmatpush.bf16.msrb.mxu3 %v4289_v59  ;;  %v4092_v56 = vld [vmem:[#allocation8 + $0x18] sm:$0xf]  ;;  %v4129_v57 = vor.u32 %v5938_v47, %v4126_v48  ;;  %v5930_v60 = vld [vmem:[#allocation8 + $0x1c] sm:$0xf]  ;;  %v4552_v62 = vld [vmem:[#allocation9 + $0x1c0] sm:$0xf]  ;;  %v4089_v5 = vor.u32 %v5929_v54, %v4086_v55 }
  0x52   :  { %v5934_v59 = vld [vmem:[#allocation8 + $0x34] sm:$0xf0]  ;;  %v4094_v61 = vld [vmem:[#allocation8 + $0x38] sm:$0xf0]  ;;  %v6052_v63 = vld [vmem:[#allocation9 + $0x1dc] sm:$0xf0] }
  0x53   :  { %648 = vmatpush.bf16.msrb.mxu0 %v4245_v1  ;;  %662 = vmatpush.bf16.msrb.mxu1 %v4249_v2  ;;  %v6048_v0 = vld [vmem:[#allocation9 + $0x1c4] sm:$0xf]  ;;  %v4085_v1 = vor.u32 %v5933_v51, %v4084_v50  ;;  %v6053_v4 = vld [vmem:[#allocation9 + $0x1e4] sm:$0xf0]  ;;  %v4093_v6 = vor.u32 %v5934_v59, %v4092_v56  ;;  %v4562_v8 = vld [vmem:[#allocation9 + $0x1e8] sm:$0xf0]  ;;  %v4097_v9 = vor.u32 %v5930_v60, %v4094_v61 }
  0x54   :  { %676 = vmatpush.bf16.msrb.mxu2 %v4253_v3  ;;  %v4554_v2 = vld [vmem:[#allocation9 + $0x1e0] sm:$0xf0]  ;;  %v4560_v3 = vld [vmem:[#allocation9 + $0x1c8] sm:$0xf]  ;;  %v4553_v10 = vor.u32 %v6052_v63, %v4552_v62  ;;  %v6041_v20 = vld [vmem:[#allocation9 + $0x18c] sm:$0xf] }
  0x55   :  { %690 = vmatpush.bf16.msrb.mxu3 %v4257_v7  ;;  %v6049_v7 = vld [vmem:[#allocation9 + $0x1cc] sm:$0xf]  ;;  %v4557_v11 = vor.u32 %v6048_v0, %v4554_v2  ;;  %v4561_v12 = vor.u32 %v6053_v4, %v4560_v3  ;;  %v4522_v17 = vld [vmem:[#allocation9 + $0x1a0] sm:$0xf0]  ;;  %v4528_v18 = vld [vmem:[#allocation9 + $0x188] sm:$0xf] }
  0x56   :  { %v4565_v16 = vor.u32 %v6049_v7, %v4562_v8  ;;  %v4530_v21 = vld [vmem:[#allocation9 + $0x1a8] sm:$0xf0]  ;;  %v4490_v29 = vld [vmem:[#allocation9 + $0x160] sm:$0xf0]  ;;  %v4496_v30 = vld [vmem:[#allocation9 + $0x148] sm:$0xf] }
  0x57   :  { %649 = vmatpush.bf16.msrb.mxu0 %v4213_v13  ;;  %663 = vmatpush.bf16.msrb.mxu1 %v4217_v14  ;;  %v4520_v13 = vld [vmem:[#allocation9 + $0x180] sm:$0xf]  ;;  %v4533_v28 = vor.u32 %v6041_v20, %v4530_v21  ;;  %v6033_v32 = vld [vmem:[#allocation9 + $0x14c] sm:$0xf]  ;;  %v4458_v41 = vld [vmem:[#allocation9 + $0x120] sm:$0xf0] }
  0x58   :  { %677 = vmatpush.bf16.msrb.mxu2 %v4221_v15  ;;  %v6044_v14 = vld [vmem:[#allocation9 + $0x19c] sm:$0xf0]  ;;  %v6040_v15 = vld [vmem:[#allocation9 + $0x184] sm:$0xf]  ;;  %v4498_v33 = vld [vmem:[#allocation9 + $0x168] sm:$0xf0] }
  0x59   :  { %691 = vmatpush.bf16.msrb.mxu3 %v4225_v19  ;;  %v6045_v19 = vld [vmem:[#allocation9 + $0x1a4] sm:$0xf0]  ;;  %v4521_v22 = vor.u32 %v6044_v14, %v4520_v13  ;;  %v4525_v23 = vor.u32 %v6040_v15, %v4522_v17  ;;  %v4501_v40 = vor.u32 %v6033_v32, %v4498_v33  ;;  %v6025_v44 = vld [vmem:[#allocation9 + $0x10c] sm:$0xf]  ;;  %v4424_v48 = vld [vmem:[#allocation9 + $0xc0] sm:$0xf] }
  0x5a   :  { %v4529_v24 = vor.u32 %v6045_v19, %v4528_v18  ;;  %v4464_v42 = vld [vmem:[#allocation9 + $0x108] sm:$0xf]  ;;  %v4466_v45 = vld [vmem:[#allocation9 + $0x128] sm:$0xf0]  ;;  %v6016_v50 = vld [vmem:[#allocation9 + $0xc4] sm:$0xf] }
  0x5b   :  { %650 = vmatpush.bf16.msrb.mxu0 %v4181_v25  ;;  %664 = vmatpush.bf16.msrb.mxu1 %v4185_v26  ;;  %v4488_v25 = vld [vmem:[#allocation9 + $0x140] sm:$0xf]  ;;  %v4469_v51 = vor.u32 %v6025_v44, %v4466_v45  ;;  %v6021_v54 = vld [vmem:[#allocation9 + $0xe4] sm:$0xf0]  ;;  %v6017_v55 = vld [vmem:[#allocation9 + $0xcc] sm:$0xf] }
  0x5c   :  { %678 = vmatpush.bf16.msrb.mxu2 %v4189_v27  ;;  %v6036_v26 = vld [vmem:[#allocation9 + $0x15c] sm:$0xf0]  ;;  %v6032_v27 = vld [vmem:[#allocation9 + $0x144] sm:$0xf]  ;;  %v4434_v56 = vld [vmem:[#allocation9 + $0xe8] sm:$0xf0] }
  0x5d   :  { %692 = vmatpush.bf16.msrb.mxu3 %v4193_v31  ;;  %v6037_v31 = vld [vmem:[#allocation9 + $0x164] sm:$0xf0]  ;;  %v4489_v34 = vor.u32 %v6036_v26, %v4488_v25  ;;  %v4493_v35 = vor.u32 %v6032_v27, %v4490_v29  ;;  %v4392_v61 = vld [vmem:[#allocation9 + $0x80] sm:$0xf]  ;;  %v6008_v63 = vld [vmem:[#allocation9 + $0x84] sm:$0xf]  ;;  %v4437_v0 = vor.u32 %v6017_v55, %v4434_v56 }
  0x5e   :  { %v4497_v36 = vor.u32 %v6037_v31, %v4496_v30  ;;  %v6012_v62 = vld [vmem:[#allocation9 + $0x9c] sm:$0xf0]  ;;  %v4400_v2 = vld [vmem:[#allocation9 + $0x88] sm:$0xf]  ;;  %v6009_v4 = vld [vmem:[#allocation9 + $0x8c] sm:$0xf] }
  0x5f   :  { %651 = vmatpush.bf16.msrb.mxu0 %v4149_v37  ;;  %665 = vmatpush.bf16.msrb.mxu1 %v4153_v38  ;;  %v4456_v37 = vld [vmem:[#allocation9 + $0x100] sm:$0xf]  ;;  %v6013_v3 = vld [vmem:[#allocation9 + $0xa4] sm:$0xf0]  ;;  %v4362_v13 = vld [vmem:[#allocation9 + $0x60] sm:$0xf0] }
  0x60   :  { %679 = vmatpush.bf16.msrb.mxu2 %v4157_v39  ;;  %v6028_v38 = vld [vmem:[#allocation9 + $0x11c] sm:$0xf0]  ;;  %v6024_v39 = vld [vmem:[#allocation9 + $0x104] sm:$0xf]  ;;  %v4401_v8 = vor.u32 %v6013_v3, %v4400_v2  ;;  %v4368_v14 = vld [vmem:[#allocation9 + $0x48] sm:$0xf] }
  0x61   :  { %693 = vmatpush.bf16.msrb.mxu3 %v4161_v43  ;;  %v6029_v43 = vld [vmem:[#allocation9 + $0x124] sm:$0xf0]  ;;  %v4457_v46 = vor.u32 %v6028_v38, %v4456_v37  ;;  %v4461_v47 = vor.u32 %v6024_v39, %v4458_v41  ;;  %v4370_v17 = vld [vmem:[#allocation9 + $0x68] sm:$0xf0]  ;;  %v4328_v19 = vld [vmem:[#allocation9] sm:$0xf] }
  0x62   :  { %v6005_v15 = vld [vmem:[#allocation9 + $0x64] sm:$0xf0]  ;;  %v5996_v20 = vld [vmem:[#allocation9 + $0x1c] sm:$0xf0]  ;;  %v4338_v29 = vld [vmem:[#allocation9 + $0x28] sm:$0xf0] }
  0x63   :  { %652 = vmatpush.bf16.msrb.mxu0 %v4117_v49  ;;  %666 = vmatpush.bf16.msrb.mxu1 %v4121_v52  ;;  %v6020_v49 = vld [vmem:[#allocation9 + $0xdc] sm:$0xf0]  ;;  %v4426_v52 = vld [vmem:[#allocation9 + $0xe0] sm:$0xf0]  ;;  %v4336_v25 = vld [vmem:[#allocation9 + $0x8] sm:$0xf]  ;;  %v4329_v33 = vor.u32 %v5996_v20, %v4328_v19 }
  0x64   :  { %680 = vmatpush.bf16.msrb.mxu2 %v4125_v53  ;;  %v4432_v53 = vld [vmem:[#allocation9 + $0xc8] sm:$0xf]  ;;  %v4429_v59 = vor.u32 %v6016_v50, %v4426_v52  ;;  %v4568_v30 = vld [vmem:[#allocation9 + $0x1d0] sm:$0xf]  ;;  %v6050_v32 = vld [vmem:[#allocation9 + $0x1d4] sm:$0xf] }
  0x65   :  { %694 = vmatpush.bf16.msrb.mxu3 %v4129_v57  ;;  %v4425_v57 = vor.u32 %v6020_v49, %v4424_v48  ;;  %v4433_v60 = vor.u32 %v6021_v54, %v4432_v53  ;;  %v5997_v27 = vld [vmem:[#allocation9 + $0x24] sm:$0xf0]  ;;  %v6054_v31 = vld [vmem:[#allocation9 + $0x1ec] sm:$0xf0]  ;;  %v6051_v39 = vld [vmem:[#allocation9 + $0x1dc] sm:$0xf] }
  0x66   :  { %v4337_v38 = vor.u32 %v5997_v27, %v4336_v25  ;;  %v4538_v49 = vld [vmem:[#allocation9 + $0x1b0] sm:$0xf0]  ;;  %v4544_v50 = vld [vmem:[#allocation9 + $0x198] sm:$0xf]  ;;  %v6043_v52 = vld [vmem:[#allocation9 + $0x19c] sm:$0xf] }
  0x67   :  { %653 = vmatpush.bf16.msrb.mxu0 %v4085_v1  ;;  %667 = vmatpush.bf16.msrb.mxu1 %v4089_v5  ;;  %v4394_v1 = vld [vmem:[#allocation9 + $0xa0] sm:$0xf0]  ;;  %v4402_v5 = vld [vmem:[#allocation9 + $0xa8] sm:$0xf0]  ;;  %v4546_v53 = vld [vmem:[#allocation9 + $0x1b8] sm:$0xf0] }
  0x68   :  { %681 = vmatpush.bf16.msrb.mxu2 %v4093_v6  ;;  %v4393_v6 = vor.u32 %v6012_v62, %v4392_v61  ;;  %v4397_v7 = vor.u32 %v6008_v63, %v4394_v1  ;;  %v4549_v61 = vor.u32 %v6043_v52, %v4546_v53  ;;  %v4506_v62 = vld [vmem:[#allocation9 + $0x170] sm:$0xf0]  ;;  %v4512_v63 = vld [vmem:[#allocation9 + $0x158] sm:$0xf]  ;;  %v6035_v1 = vld [vmem:[#allocation9 + $0x15c] sm:$0xf] }
  0x69   :  { %695 = vmatpush.bf16.msrb.mxu3 %v4097_v9  ;;  %v4360_v9 = vld [vmem:[#allocation9 + $0x40] sm:$0xf]  ;;  %v4514_v2 = vld [vmem:[#allocation9 + $0x178] sm:$0xf0]  ;;  %v6022_v19 = vld [vmem:[#allocation9 + $0xec] sm:$0xf0] }
  0x6a   :  { %654 = vmatmul.bf16.vlgmr.msrb.gmra.mxu0 %v6751_v58  ;;  %668 = vmatmul.bf16.vlgmr.msrb.gmra.mxu1 %v6751_v58  ;;  %v6018_v20 = vld [vmem:[#allocation9 + $0xd4] sm:$0xf]  ;;  %v6019_v25 = vld [vmem:[#allocation9 + $0xdc] sm:$0xf]  ;;  %v4344_v52 = vld [vmem:[#allocation9 + $0x10] sm:$0xf] }
  0x6b   :  { %1142 = vmatpush.bf16.msra.mxu0 %v4553_v10  ;;  %1156 = vmatpush.bf16.msra.mxu1 %v4557_v11  ;;  %v6004_v10 = vld [vmem:[#allocation9 + $0x5c] sm:$0xf0]  ;;  %v6000_v11 = vld [vmem:[#allocation9 + $0x44] sm:$0xf]  ;;  %s4043_s24 = sshll.u32 %s6654_s21, 4  ;;  %s4045_s26 = sshll.u32 %s6968_s11, 4  ;;  %s4044_s24 = int_to_ptr.vmem [resolvable:$true] %s4043_s24  ;;  %s4046_s26 = int_to_ptr.hbm [resolvable:$true] %s4045_s26 }
  0x6c   :  { %1170 = vmatpush.bf16.msra.mxu2 %v4561_v12  ;;  %696 = vmatmul.bf16.vlgmr.msrb.gmra.mxu3 %v6751_v58  ;;  %v4405_v12 = vor.u32 %v6009_v4, %v4402_v5  ;;  %v4361_v18 = vor.u32 %v6004_v10, %v4360_v9  ;;  %v4365_v21 = vor.u32 %v6000_v11, %v4362_v13  ;;  %v4474_v10 = vld [vmem:[#allocation9 + $0x130] sm:$0xf0]  ;;  %v4480_v11 = vld [vmem:[#allocation9 + $0x118] sm:$0xf]  ;;  %v6027_v13 = vld [vmem:[#allocation9 + $0x11c] sm:$0xf] }
  0x6d   :  { %1184 = vmatpush.bf16.msra.mxu3 %v4565_v16  ;;  %682 = vmatmul.bf16.vlgmr.msrb.gmra.mxu2 %v6751_v58  ;;  %v4465_v58 = vor.u32 %v6029_v43, %v4464_v42  ;;  %v6001_v16 = vld [vmem:[#allocation9 + $0x4c] sm:$0xf]  ;;  %v4569_v42 = vor.u32 %v6054_v31, %v4568_v30  ;;  %v6761_v43 = vld [vmem:[#allocation6] sm:$0xff]  ;;  %v4517_v9 = vor.u32 %v6035_v1, %v4514_v2  ;;  %v4408_v30 = vld [vmem:[#allocation9 + $0x90] sm:$0xf] }
  0x6e   :  { %v4373_v26 = vor.u32 %v6001_v16, %v4370_v17  ;;  %v6014_v31 = vld [vmem:[#allocation9 + $0xac] sm:$0xf0]  ;;  %v6086_v1 = vld [vmem:[#allocation12 + $0xec] sm:$0xf0] }
  0x6f   :  { %1143 = vmatpush.bf16.msra.mxu0 %v4521_v22  ;;  %1157 = vmatpush.bf16.msra.mxu1 %v4525_v23  ;;  %v4369_v22 = vor.u32 %v6005_v15, %v4368_v14  ;;  %v5992_v23 = vld [vmem:[#allocation9 + $0x4] sm:$0xf]  ;;  %v4482_v14 = vld [vmem:[#allocation9 + $0x138] sm:$0xf0] }
  0x70   :  { %1171 = vmatpush.bf16.msra.mxu2 %v4529_v24  ;;  %v4330_v24 = vld [vmem:[#allocation9 + $0x20] sm:$0xf0] }
  0x71   :  { %1185 = vmatpush.bf16.msra.mxu3 %v4533_v28  ;;  %v5993_v28 = vld [vmem:[#allocation9 + $0xc] sm:$0xf]  ;;  %v4333_v37 = vor.u32 %v5992_v23, %v4330_v24  ;;  %v4448_v23 = vld [vmem:[#allocation9 + $0xd8] sm:$0xf] }
  0x72   :  { %v4341_v41 = vor.u32 %v5993_v28, %v4338_v29  ;;  %v6023_v24 = vld [vmem:[#allocation9 + $0xf4] sm:$0xf0] }
  0x73   :  { %1144 = vmatpush.bf16.msra.mxu0 %v4489_v34  ;;  %1158 = vmatpush.bf16.msra.mxu1 %v4493_v35  ;;  %v4570_v34 = vld [vmem:[#allocation9 + $0x1f0] sm:$0xf0]  ;;  %v4576_v35 = vld [vmem:[#allocation9 + $0x1d8] sm:$0xf]  ;;  %v4449_v29 = vor.u32 %v6023_v24, %v4448_v23  ;;  %v4792_v24 = vld [vmem:[#allocation12 + $0x1a0] sm:$0xf] }
  0x74   :  { %1172 = vmatpush.bf16.msra.mxu2 %v4497_v36  ;;  %v6055_v36 = vld [vmem:[#allocation9 + $0x1f4] sm:$0xf0]  ;;  %v4573_v44 = vor.u32 %v6050_v32, %v4570_v34  ;;  %v6010_v32 = vld [vmem:[#allocation9 + $0x94] sm:$0xf] }
  0x75   :  { %1186 = vmatpush.bf16.msra.mxu3 %v4501_v40  ;;  %v4578_v40 = vld [vmem:[#allocation9 + $0x1f8] sm:$0xf0]  ;;  %v4577_v45 = vor.u32 %v6055_v36, %v4576_v35  ;;  %v4410_v34 = vld [vmem:[#allocation9 + $0xb0] sm:$0xf0]  ;;  %v4416_v35 = vld [vmem:[#allocation9 + $0x98] sm:$0xf] }
  0x76   :  { %v4581_v48 = vor.u32 %v6051_v39, %v4578_v40  ;;  %v6015_v36 = vld [vmem:[#allocation9 + $0xb4] sm:$0xf0]  ;;  %v4409_v39 = vor.u32 %v6014_v31, %v4408_v30  ;;  %v4413_v40 = vor.u32 %v6010_v32, %v4410_v34  ;;  %v5064_v31 = vld [vmem:[#allocation12 + $0x3c0] sm:$0xf] }
  0x77   :  { %1145 = vmatpush.bf16.msra.mxu0 %v4457_v46  ;;  %1159 = vmatpush.bf16.msra.mxu1 %v4461_v47  ;;  %v4536_v46 = vld [vmem:[#allocation9 + $0x190] sm:$0xf]  ;;  %v6078_v23 = vld [vmem:[#allocation12 + $0xac] sm:$0xf0] }
  0x78   :  { %1173 = vmatpush.bf16.msra.mxu2 %v4465_v58  ;;  %v6046_v47 = vld [vmem:[#allocation9 + $0x1ac] sm:$0xf0]  ;;  %v6042_v58 = vld [vmem:[#allocation9 + $0x194] sm:$0xf]  ;;  %v6178_v32 = vld [vmem:[#allocation12 + $0x3cc] sm:$0xf0] }
  0x79   :  { %1187 = vmatpush.bf16.msra.mxu3 %v4469_v51  ;;  %v6047_v51 = vld [vmem:[#allocation9 + $0x1b4] sm:$0xf0]  ;;  %v4537_v54 = vor.u32 %v6046_v47, %v4536_v46  ;;  %v4541_v55 = vor.u32 %v6042_v58, %v4538_v49  ;;  %v4378_v47 = vld [vmem:[#allocation9 + $0x70] sm:$0xf0]  ;;  %v6003_v49 = vld [vmem:[#allocation9 + $0x5c] sm:$0xf]  ;;  %v5065_v34 = vor.u32 %v6178_v32, %v5064_v31 }
  0x7a   :  { %v4545_v56 = vor.u32 %v6047_v51, %v4544_v50  ;;  %v4384_v58 = vld [vmem:[#allocation9 + $0x58] sm:$0xf]  ;;  %v4386_v50 = vld [vmem:[#allocation9 + $0x78] sm:$0xf0] }
  0x7b   :  { %1146 = vmatpush.bf16.msra.mxu0 %v4425_v57  ;;  %1160 = vmatpush.bf16.msra.mxu1 %v4429_v59  ;;  %v4504_v57 = vld [vmem:[#allocation9 + $0x150] sm:$0xf] }
  0x7c   :  { %1174 = vmatpush.bf16.msra.mxu2 %v4433_v60  ;;  %v6038_v59 = vld [vmem:[#allocation9 + $0x16c] sm:$0xf0]  ;;  %v6034_v60 = vld [vmem:[#allocation9 + $0x154] sm:$0xf] }
  0x7d   :  { %1188 = vmatpush.bf16.msra.mxu3 %v4437_v0  ;;  %v6039_v0 = vld [vmem:[#allocation9 + $0x174] sm:$0xf0]  ;;  %v4505_v3 = vor.u32 %v6038_v59, %v4504_v57  ;;  %v4509_v4 = vor.u32 %v6034_v60, %v4506_v62  ;;  %v4346_v57 = vld [vmem:[#allocation9 + $0x30] sm:$0xf0]  ;;  %v4389_v59 = vor.u32 %v6003_v49, %v4386_v50  ;;  %v5995_v62 = vld [vmem:[#allocation9 + $0x1c] sm:$0xf] }
  0x7e   :  { %v4513_v5 = vor.u32 %v6039_v0, %v4512_v63  ;;  %v4352_v60 = vld [vmem:[#allocation9 + $0x18] sm:$0xf]  ;;  %v4354_v63 = vld [vmem:[#allocation9 + $0x38] sm:$0xf0]  ;;  %v4696_v0 = vld [vmem:[#allocation12 + $0xe0] sm:$0xf] }
  0x7f   :  { %1147 = vmatpush.bf16.msra.mxu0 %v4393_v6  ;;  %1161 = vmatpush.bf16.msra.mxu1 %v4397_v7  ;;  %v4472_v6 = vld [vmem:[#allocation9 + $0x110] sm:$0xf]  ;;  %v6102_v49 = vld [vmem:[#allocation12 + $0x16c] sm:$0xf0]  ;;  %v4904_v50 = vld [vmem:[#allocation12 + $0x280] sm:$0xf] }
  0x80   :  { %1175 = vmatpush.bf16.msra.mxu2 %v4401_v8  ;;  %v6030_v7 = vld [vmem:[#allocation9 + $0x12c] sm:$0xf0]  ;;  %v6026_v8 = vld [vmem:[#allocation9 + $0x114] sm:$0xf] }
  0x81   :  { %1189 = vmatpush.bf16.msra.mxu3 %v4405_v12  ;;  %v6031_v12 = vld [vmem:[#allocation9 + $0x134] sm:$0xf0]  ;;  %v4473_v15 = vor.u32 %v6030_v7, %v4472_v6  ;;  %v4477_v16 = vor.u32 %v6026_v8, %v4474_v10  ;;  %v4357_v7 = vor.u32 %v5995_v62, %v4354_v63  ;;  %v4697_v8 = vor.u32 %v6086_v1, %v4696_v0  ;;  %v4952_v10 = vld [vmem:[#allocation12 + $0x2e0] sm:$0xf] }
  0x82   :  { %v4481_v17 = vor.u32 %v6031_v12, %v4480_v11  ;;  %v6150_v11 = vld [vmem:[#allocation12 + $0x2ec] sm:$0xf0]  ;;  %v4888_v0 = vld [vmem:[#allocation12 + $0x260] sm:$0xf] }
  0x83   :  { %1148 = vmatpush.bf16.msra.mxu0 %v4361_v18  ;;  %1162 = vmatpush.bf16.msra.mxu1 %v4365_v21  ;;  %v4440_v18 = vld [vmem:[#allocation9 + $0xd0] sm:$0xf]  ;;  %v4485_v21 = vor.u32 %v6027_v13, %v4482_v14  ;;  %v6082_v13 = vld [vmem:[#allocation12 + $0xcc] sm:$0xf0]  ;;  %v5080_v14 = vld [vmem:[#allocation12 + $0x3e0] sm:$0xf] }
  0x84   :  { %1176 = vmatpush.bf16.msra.mxu2 %v4369_v22  ;;  %v4442_v22 = vld [vmem:[#allocation9 + $0xf0] sm:$0xf0]  ;;  %v4441_v27 = vor.u32 %v6022_v19, %v4440_v18  ;;  %v4953_v18 = vor.u32 %v6150_v11, %v4952_v10  ;;  %v6134_v1 = vld [vmem:[#allocation12 + $0x26c] sm:$0xf0]  ;;  %v4872_v11 = vld [vmem:[#allocation12 + $0x240] sm:$0xf] }
  0x85   :  { %1190 = vmatpush.bf16.msra.mxu3 %v4373_v26  ;;  %v4450_v26 = vld [vmem:[#allocation9 + $0xf8] sm:$0xf0]  ;;  %v4445_v28 = vor.u32 %v6018_v20, %v4442_v22  ;;  %v4664_v22 = vld [vmem:[#allocation12 + $0xa0] sm:$0xf]  ;;  %v6094_v10 = vld [vmem:[#allocation12 + $0x12c] sm:$0xf0] }
  0x87   :  { %1149 = vmatpush.bf16.msra.mxu0 %v4329_v33  ;;  %1163 = vmatpush.bf16.msra.mxu1 %v4333_v37  ;;  %v4453_v33 = vor.u32 %v6019_v25, %v4450_v26  ;;  %v6011_v37 = vld [vmem:[#allocation9 + $0x9c] sm:$0xf]  ;;  %v4665_v25 = vor.u32 %v6078_v23, %v4664_v22  ;;  %v6110_v26 = vld [vmem:[#allocation12 + $0x1ac] sm:$0xf0] }
  0x88   :  { %1177 = vmatpush.bf16.msra.mxu2 %v4337_v38  ;;  %v4418_v38 = vld [vmem:[#allocation9 + $0xb8] sm:$0xf0] }
  0x89   :  { %1191 = vmatpush.bf16.msra.mxu3 %v4341_v41  ;;  %v4417_v41 = vor.u32 %v6015_v36, %v4416_v35  ;;  %v4421_v46 = vor.u32 %v6011_v37, %v4418_v38  ;;  %v6074_v35 = vld [vmem:[#allocation12 + $0x8c] sm:$0xf0] }
  0x8a   :  { %1150 = vmatmul.bf16.vlgmr.msra.gmra.mxu0 %v6761_v43  ;;  %1164 = vmatmul.bf16.vlgmr.msra.gmra.mxu1 %v6761_v43  ;;  %v6106_v36 = vld [vmem:[#allocation12 + $0x18c] sm:$0xf0] }
  0x8b   :  { %1198 = vmatpush.bf16.msrb.mxu0 %v4569_v42  ;;  %1212 = vmatpush.bf16.msrb.mxu1 %v4573_v44  ;;  %v4376_v42 = vld [vmem:[#allocation9 + $0x50] sm:$0xf] }
  0x8c   :  { %1226 = vmatpush.bf16.msrb.mxu2 %v4577_v45  ;;  %1192 = vmatmul.bf16.vlgmr.msra.gmra.mxu3 %v6761_v43  ;;  %v6006_v44 = vld [vmem:[#allocation9 + $0x6c] sm:$0xf0]  ;;  %v6002_v45 = vld [vmem:[#allocation9 + $0x54] sm:$0xf] }
  0x8d   :  { %1240 = vmatpush.bf16.msrb.mxu3 %v4581_v48  ;;  %1178 = vmatmul.bf16.vlgmr.msra.gmra.mxu2 %v6761_v43  ;;  %v6007_v48 = vld [vmem:[#allocation9 + $0x74] sm:$0xf0]  ;;  %v4377_v51 = vor.u32 %v6006_v44, %v4376_v42  ;;  %v4381_v53 = vor.u32 %v6002_v45, %v4378_v47 }
  0x8e   :  { %v6174_v44 = vld [vmem:[#allocation12 + $0x3ac] sm:$0xf0] }
  0x8f   :  { %1199 = vmatpush.bf16.msrb.mxu0 %v4537_v54  ;;  %1213 = vmatpush.bf16.msrb.mxu1 %v4541_v55  ;;  %v4385_v54 = vor.u32 %v6007_v48, %v4384_v58  ;;  %v5998_v55 = vld [vmem:[#allocation9 + $0x2c] sm:$0xf0]  ;;  %v6070_v47 = vld [vmem:[#allocation12 + $0x6c] sm:$0xf0]  ;;  %v4760_v58 = vld [vmem:[#allocation12 + $0x160] sm:$0xf] }
  0x90   :  { %1227 = vmatpush.bf16.msrb.mxu2 %v4545_v56  ;;  %v5994_v56 = vld [vmem:[#allocation9 + $0x14] sm:$0xf]  ;;  %v4345_v2 = vor.u32 %v5998_v55, %v4344_v52  ;;  %v4761_v52 = vor.u32 %v6102_v49, %v4760_v58  ;;  %v6170_v55 = vld [vmem:[#allocation12 + $0x38c] sm:$0xf0]  ;;  %v5592_v49 = vld [vmem:[#allocation12 + $0x7e0] sm:$0xf] }
  0x91   :  { %1241 = vmatpush.bf16.msrb.mxu3 %v4549_v61  ;;  %v5999_v61 = vld [vmem:[#allocation9 + $0x34] sm:$0xf0] }
  0x92   :  { %v4353_v6 = vor.u32 %v5999_v61, %v4352_v60  ;;  %v4744_v60 = vld [vmem:[#allocation12 + $0x140] sm:$0xf]  ;;  %v6098_v61 = vld [vmem:[#allocation12 + $0x14c] sm:$0xf0] }
  0x93   :  { %1200 = vmatpush.bf16.msrb.mxu0 %v4505_v3  ;;  %1214 = vmatpush.bf16.msrb.mxu1 %v4509_v4  ;;  %v4824_v3 = vld [vmem:[#allocation12 + $0x1e0] sm:$0xf]  ;;  %v6118_v4 = vld [vmem:[#allocation12 + $0x1ec] sm:$0xf0]  ;;  %v4745_v63 = vor.u32 %v6098_v61, %v4744_v60 }
  0x94   :  { %1228 = vmatpush.bf16.msrb.mxu2 %v4513_v5  ;;  %v4349_v5 = vor.u32 %v5994_v56, %v4346_v57  ;;  %v4825_v12 = vor.u32 %v6118_v4, %v4824_v3  ;;  %v4616_v56 = vld [vmem:[#allocation12 + $0x40] sm:$0xf]  ;;  %v4889_v3 = vor.u32 %v6134_v1, %v4888_v0  ;;  %v6166_v4 = vld [vmem:[#allocation12 + $0x36c] sm:$0xf0] }
  0x95   :  { %1242 = vmatpush.bf16.msrb.mxu3 %v4517_v9  ;;  %v4680_v9 = vld [vmem:[#allocation12 + $0xc0] sm:$0xf]  ;;  %v6274_v60 = vld [vmem:[#allocation12 + $0x6cc] sm:$0xf0] }
  0x96   :  { %v4681_v19 = vor.u32 %v6082_v13, %v4680_v9  ;;  %v6306_v0 = vld [vmem:[#allocation12 + $0x7cc] sm:$0xf0] }
  0x97   :  { %1201 = vmatpush.bf16.msrb.mxu0 %v4473_v15  ;;  %1215 = vmatpush.bf16.msrb.mxu1 %v4477_v16  ;;  %v6182_v15 = vld [vmem:[#allocation12 + $0x3ec] sm:$0xf0]  ;;  %v4808_v16 = vld [vmem:[#allocation12 + $0x1c0] sm:$0xf] }
  0x98   :  { %1229 = vmatpush.bf16.msrb.mxu2 %v4481_v17  ;;  %v6114_v17 = vld [vmem:[#allocation12 + $0x1cc] sm:$0xf0]  ;;  %v5081_v20 = vor.u32 %v6182_v15, %v5080_v14  ;;  %v5000_v15 = vld [vmem:[#allocation12 + $0x340] sm:$0xf] }
  0x99   :  { %1243 = vmatpush.bf16.msrb.mxu3 %v4485_v21  ;;  %v4809_v21 = vor.u32 %v6114_v17, %v4808_v16  ;;  %v6162_v16 = vld [vmem:[#allocation12 + $0x34c] sm:$0xf0]  ;;  %v4584_v17 = vld [vmem:[#allocation12] sm:$0xf] }
  0x9b   :  { %1202 = vmatpush.bf16.msrb.mxu0 %v4441_v27  ;;  %1216 = vmatpush.bf16.msrb.mxu1 %v4445_v28  ;;  %v4936_v27 = vld [vmem:[#allocation12 + $0x2c0] sm:$0xf]  ;;  %v6146_v28 = vld [vmem:[#allocation12 + $0x2cc] sm:$0xf0] }
  0x9c   :  { %1230 = vmatpush.bf16.msrb.mxu2 %v4449_v29  ;;  %v4793_v29 = vor.u32 %v6110_v26, %v4792_v24  ;;  %v4937_v30 = vor.u32 %v6146_v28, %v4936_v27  ;;  %v5208_v24 = vld [vmem:[#allocation12 + $0x4e0] sm:$0xf]  ;;  %v6246_v28 = vld [vmem:[#allocation12 + $0x5ec] sm:$0xf0] }
  0x9d   :  { %1244 = vmatpush.bf16.msrb.mxu3 %v4453_v33  ;;  %v4648_v33 = vld [vmem:[#allocation12 + $0x80] sm:$0xf] }
  0x9e   :  { %v4649_v37 = vor.u32 %v6074_v35, %v4648_v33  ;;  %v5336_v26 = vld [vmem:[#allocation12 + $0x5e0] sm:$0xf] }
  0x9f   :  { %1203 = vmatpush.bf16.msrb.mxu0 %v4409_v39  ;;  %1217 = vmatpush.bf16.msrb.mxu1 %v4413_v40  ;;  %v4920_v39 = vld [vmem:[#allocation12 + $0x2a0] sm:$0xf]  ;;  %v6142_v40 = vld [vmem:[#allocation12 + $0x2ac] sm:$0xf0]  ;;  %v5337_v31 = vor.u32 %v6246_v28, %v5336_v26 }
  0xa0   :  { %1231 = vmatpush.bf16.msrb.mxu2 %v4417_v41  ;;  %v5048_v41 = vld [vmem:[#allocation12 + $0x3a0] sm:$0xf]  ;;  %v4921_v42 = vor.u32 %v6142_v40, %v4920_v39  ;;  %v6242_v39 = vld [vmem:[#allocation12 + $0x5cc] sm:$0xf0] }
  0xa1   :  { %1245 = vmatpush.bf16.msrb.mxu3 %v4421_v46  ;;  %v5049_v45 = vor.u32 %v6174_v44, %v5048_v41  ;;  %v4632_v46 = vld [vmem:[#allocation12 + $0x60] sm:$0xf]  ;;  %v6122_v41 = vld [vmem:[#allocation12 + $0x20c] sm:$0xf0] }
  0xa2   :  { %v4633_v48 = vor.u32 %v6070_v47, %v4632_v46  ;;  %v4984_v33 = vld [vmem:[#allocation12 + $0x320] sm:$0xf]  ;;  %v6154_v46 = vld [vmem:[#allocation12 + $0x30c] sm:$0xf0] }
  0xa3   :  { %1204 = vmatpush.bf16.msrb.mxu0 %v4377_v51  ;;  %1218 = vmatpush.bf16.msrb.mxu1 %v4381_v53  ;;  %v6138_v51 = vld [vmem:[#allocation12 + $0x28c] sm:$0xf0]  ;;  %v4840_v40 = vld [vmem:[#allocation12 + $0x200] sm:$0xf] }
  0xa4   :  { %1232 = vmatpush.bf16.msrb.mxu2 %v4385_v54  ;;  %v4905_v53 = vor.u32 %v6138_v51, %v4904_v50  ;;  %v5032_v54 = vld [vmem:[#allocation12 + $0x380] sm:$0xf]  ;;  %v4841_v44 = vor.u32 %v6122_v41, %v4840_v40  ;;  %v6310_v50 = vld [vmem:[#allocation12 + $0x7ec] sm:$0xf0] }
  0xa5   :  { %1246 = vmatpush.bf16.msrb.mxu3 %v4389_v59  ;;  %v5033_v57 = vor.u32 %v6170_v55, %v5032_v54  ;;  %v6066_v59 = vld [vmem:[#allocation12 + $0x4c] sm:$0xf0]  ;;  %v5464_v47 = vld [vmem:[#allocation12 + $0x6e0] sm:$0xf] }
  0xa6   :  { %v4617_v62 = vor.u32 %v6066_v59, %v4616_v56  ;;  %v6206_v54 = vld [vmem:[#allocation12 + $0x4ac] sm:$0xf0]  ;;  %v5304_v55 = vld [vmem:[#allocation12 + $0x5a0] sm:$0xf] }
  0xa7   :  { %1205 = vmatpush.bf16.msrb.mxu0 %v4345_v2  ;;  %1219 = vmatpush.bf16.msrb.mxu1 %v4349_v5  ;;  %v5016_v2 = vld [vmem:[#allocation12 + $0x360] sm:$0xf]  ;;  %v6294_v41 = vld [vmem:[#allocation12 + $0x76c] sm:$0xf0] }
  0xa8   :  { %1233 = vmatpush.bf16.msrb.mxu2 %v4353_v6  ;;  %v5017_v5 = vor.u32 %v6166_v4, %v5016_v2  ;;  %v4600_v6 = vld [vmem:[#allocation12 + $0x20] sm:$0xf] }
  0xa9   :  { %1247 = vmatpush.bf16.msrb.mxu3 %v4357_v7  ;;  %v6062_v7 = vld [vmem:[#allocation12 + $0x2c] sm:$0xf0]  ;;  %v5448_v59 = vld [vmem:[#allocation12 + $0x6c0] sm:$0xf] }
  0xaa   :  { %1206 = vmatmul.bf16.vlgmr.msrb.gmra.mxu0 %v6761_v43  ;;  %1220 = vmatmul.bf16.vlgmr.msrb.gmra.mxu1 %v6761_v43  ;;  %v4601_v9 = vor.u32 %v6062_v7, %v4600_v6  ;;  %v5160_v4 = vld [vmem:[#allocation12 + $0x480] sm:$0xf] }
  0xab   :  { %2909 = vmatpush.bf16.msra.mxu0 %v4697_v8  ;;  %2923 = vmatpush.bf16.msra.mxu1 %v4825_v12  ;;  %v4728_v8 = vld [vmem:[#allocation12 + $0x120] sm:$0xf]  ;;  %v6130_v12 = vld [vmem:[#allocation12 + $0x24c] sm:$0xf0] }
  0xac   :  { %1234 = vmatmul.bf16.vlgmr.msrb.gmra.mxu2 %v6761_v43  ;;  %1248 = vmatmul.bf16.vlgmr.msrb.gmra.mxu3 %v6761_v43  ;;  %v4776_v43 = vld [vmem:[#allocation12 + $0x180] sm:$0xf]  ;;  %v4729_v13 = vor.u32 %v6094_v10, %v4728_v8  ;;  %v4873_v14 = vor.u32 %v6130_v12, %v4872_v11  ;;  %v6234_v8 = vld [vmem:[#allocation12 + $0x58c] sm:$0xf0] }
  0xad   :  { %2937 = vmatpush.bf16.msra.mxu2 %v4953_v18  ;;  %2951 = vmatpush.bf16.msra.mxu3 %v5081_v20  ;;  %v4777_v38 = vor.u32 %v6106_v36, %v4776_v43  ;;  %v5001_v18 = vor.u32 %v6162_v16, %v5000_v15  ;;  %v4712_v20 = vld [vmem:[#allocation12 + $0x100] sm:$0xf]  ;;  %v6210_v36 = vld [vmem:[#allocation12 + $0x4cc] sm:$0xf0] }
  0xae   :  { %v5192_v43 = vld [vmem:[#allocation12 + $0x4c0] sm:$0xf]  ;;  %v6270_v12 = vld [vmem:[#allocation12 + $0x6ac] sm:$0xf0] }
  0xaf   :  { %2910 = vmatpush.bf16.msra.mxu0 %v4681_v19  ;;  %2924 = vmatpush.bf16.msra.mxu1 %v4809_v21  ;;  %v6058_v19 = vld [vmem:[#allocation12 + $0xc] sm:$0xf0]  ;;  %v5288_v6 = vld [vmem:[#allocation12 + $0x580] sm:$0xf] }
  0xb0   :  { %v6090_v21 = vld [vmem:[#allocation12 + $0x10c] sm:$0xf0]  ;;  %v4585_v22 = vor.u32 %v6058_v19, %v4584_v17  ;;  %v5289_v10 = vor.u32 %v6234_v8, %v5288_v6  ;;  %v5432_v11 = vld [vmem:[#allocation12 + $0x6a0] sm:$0xf] }
  0xb1   :  { %2938 = vmatpush.bf16.msra.mxu2 %v4937_v30  ;;  %2952 = vmatpush.bf16.msra.mxu3 %v5065_v34  ;;  %v4713_v23 = vor.u32 %v6090_v21, %v4712_v20  ;;  %v6126_v30 = vld [vmem:[#allocation12 + $0x22c] sm:$0xf0]  ;;  %v5433_v15 = vor.u32 %v6270_v12, %v5432_v11  ;;  %v5560_v16 = vld [vmem:[#allocation12 + $0x7a0] sm:$0xf] }
  0xb2   :  { %v6158_v34 = vld [vmem:[#allocation12 + $0x32c] sm:$0xf0]  ;;  %v5144_v20 = vld [vmem:[#allocation12 + $0x460] sm:$0xf] }
  0xb3   :  { %2911 = vmatpush.bf16.msra.mxu0 %v4665_v25  ;;  %2925 = vmatpush.bf16.msra.mxu1 %v4793_v29  ;;  %v6214_v25 = vld [vmem:[#allocation12 + $0x4ec] sm:$0xf0]  ;;  %v4856_v29 = vld [vmem:[#allocation12 + $0x220] sm:$0xf]  ;;  %v4985_v35 = vor.u32 %v6158_v34, %v4984_v33 }
  0xb4   :  { %v5209_v27 = vor.u32 %v6214_v25, %v5208_v24  ;;  %v4857_v32 = vor.u32 %v6126_v30, %v4856_v29  ;;  %v6302_v17 = vld [vmem:[#allocation12 + $0x7ac] sm:$0xf0]  ;;  %v5416_v26 = vld [vmem:[#allocation12 + $0x680] sm:$0xf] }
  0xb5   :  { %2939 = vmatpush.bf16.msra.mxu2 %v4921_v42  ;;  %2953 = vmatpush.bf16.msra.mxu3 %v5049_v45  ;;  %v4968_v45 = vld [vmem:[#allocation12 + $0x300] sm:$0xf]  ;;  %v5561_v19 = vor.u32 %v6302_v17, %v5560_v16  ;;  %v6198_v21 = vld [vmem:[#allocation12 + $0x46c] sm:$0xf0] }
  0xb6   :  { %v4969_v58 = vor.u32 %v6154_v46, %v4968_v45  ;;  %v6230_v24 = vld [vmem:[#allocation12 + $0x56c] sm:$0xf0]  ;;  %v5544_v28 = vld [vmem:[#allocation12 + $0x780] sm:$0xf] }
  0xb7   :  { %2912 = vmatpush.bf16.msra.mxu0 %v4649_v37  ;;  %2926 = vmatpush.bf16.msra.mxu1 %v4777_v38  ;;  %v5320_v37 = vld [vmem:[#allocation12 + $0x5c0] sm:$0xf]  ;;  %v5193_v38 = vor.u32 %v6210_v36, %v5192_v43  ;;  %v6298_v30 = vld [vmem:[#allocation12 + $0x78c] sm:$0xf0] }
  0xb8   :  { %v5321_v42 = vor.u32 %v6242_v39, %v5320_v37  ;;  %v6194_v33 = vld [vmem:[#allocation12 + $0x44c] sm:$0xf0]  ;;  %v5256_v34 = vld [vmem:[#allocation12 + $0x540] sm:$0xf] }
  0xb9   :  { %2940 = vmatpush.bf16.msra.mxu2 %v4905_v53  ;;  %2954 = vmatpush.bf16.msra.mxu3 %v5033_v57  ;;  %v5176_v53 = vld [vmem:[#allocation12 + $0x4a0] sm:$0xf]  ;;  %v6238_v57 = vld [vmem:[#allocation12 + $0x5ac] sm:$0xf0] }
  0xba   :  { %v5177_v56 = vor.u32 %v6206_v54, %v5176_v53  ;;  %v5305_v61 = vor.u32 %v6238_v57, %v5304_v55  ;;  %v6226_v43 = vld [vmem:[#allocation12 + $0x54c] sm:$0xf0]  ;;  %v5400_v37 = vld [vmem:[#allocation12 + $0x660] sm:$0xf] }
  0xbb   :  { %2913 = vmatpush.bf16.msra.mxu0 %v4633_v48  ;;  %2927 = vmatpush.bf16.msra.mxu1 %v4761_v52  ;;  %v6278_v48 = vld [vmem:[#allocation12 + $0x6ec] sm:$0xf0]  ;;  %v5593_v52 = vor.u32 %v6310_v50, %v5592_v49  ;;  %v5257_v36 = vor.u32 %v6226_v43, %v5256_v34  ;;  %v5528_v40 = vld [vmem:[#allocation12 + $0x760] sm:$0xf] }
  0xbc   :  { %v5465_v51 = vor.u32 %v6278_v48, %v5464_v47  ;;  %v5112_v45 = vld [vmem:[#allocation12 + $0x420] sm:$0xf]  ;;  %v6190_v46 = vld [vmem:[#allocation12 + $0x42c] sm:$0xf0] }
  0xbd   :  { %2941 = vmatpush.bf16.msra.mxu2 %v4889_v3  ;;  %2955 = vmatpush.bf16.msra.mxu3 %v5017_v5  ;;  %v6202_v5 = vld [vmem:[#allocation12 + $0x48c] sm:$0xf0]  ;;  %v5240_v47 = vld [vmem:[#allocation12 + $0x520] sm:$0xf]  ;;  %v5113_v49 = vor.u32 %v6190_v46, %v5112_v45  ;;  %v6116_v46 = vld [vmem:[#allocation12 + $0x1e4] sm:$0xf] }
  0xbe   :  { %v5161_v7 = vor.u32 %v6202_v5, %v5160_v4  ;;  %v6222_v50 = vld [vmem:[#allocation12 + $0x52c] sm:$0xf0]  ;;  %v5384_v53 = vld [vmem:[#allocation12 + $0x640] sm:$0xf] }
  0xbf   :  { %2914 = vmatpush.bf16.msra.mxu0 %v4617_v62  ;;  %2928 = vmatpush.bf16.msra.mxu1 %v4745_v63  ;;  %v5449_v62 = vor.u32 %v6274_v60, %v5448_v59  ;;  %v5576_v63 = vld [vmem:[#allocation12 + $0x7c0] sm:$0xf]  ;;  %v6258_v54 = vld [vmem:[#allocation12 + $0x64c] sm:$0xf0] }
  0xc0   :  { %v5577_v2 = vor.u32 %v6306_v0, %v5576_v63  ;;  %v5512_v55 = vld [vmem:[#allocation12 + $0x740] sm:$0xf]  ;;  %v6290_v57 = vld [vmem:[#allocation12 + $0x74c] sm:$0xf0] }
  0xc1   :  { %2942 = vmatpush.bf16.msra.mxu2 %v4873_v14  ;;  %2956 = vmatpush.bf16.msra.mxu3 %v5001_v18  ;;  %v5513_v59 = vor.u32 %v6290_v57, %v5512_v55  ;;  %v5096_v60 = vld [vmem:[#allocation12 + $0x400] sm:$0xf]  ;;  %v6218_v0 = vld [vmem:[#allocation12 + $0x50c] sm:$0xf0] }
  0xc2   :  { %v5368_v4 = vld [vmem:[#allocation12 + $0x620] sm:$0xf]  ;;  %v6254_v5 = vld [vmem:[#allocation12 + $0x62c] sm:$0xf0] }
  0xc3   :  { %2915 = vmatpush.bf16.msra.mxu0 %v4601_v9  ;;  %2929 = vmatpush.bf16.msra.mxu1 %v4729_v13  ;;  %v5496_v6 = vld [vmem:[#allocation12 + $0x720] sm:$0xf]  ;;  %v5369_v8 = vor.u32 %v6254_v5, %v5368_v4 }
  0xc4   :  { %v5352_v12 = vld [vmem:[#allocation12 + $0x600] sm:$0xf] }
  0xc5   :  { %2943 = vmatpush.bf16.msra.mxu2 %v4857_v32  ;;  %2957 = vmatpush.bf16.msra.mxu3 %v4985_v35  ;;  %v5128_v32 = vld [vmem:[#allocation12 + $0x440] sm:$0xf] }
  0xc6   :  { %v5129_v35 = vor.u32 %v6194_v33, %v5128_v32 }
  0xc7   :  { %2916 = vmatpush.bf16.msra.mxu0 %v4585_v22  ;;  %2930 = vmatpush.bf16.msra.mxu1 %v4713_v23  ;;  %v6771_v1 = vpop.f32.mrf.mxu0  ;;  %v6773_v3 = vpop.f32.mrf.mxu1  ;;  %v5145_v22 = vor.u32 %v6198_v21, %v5144_v20  ;;  %v5272_v23 = vld [vmem:[#allocation12 + $0x560] sm:$0xf]  ;;  %v6282_v21 = vld [vmem:[#allocation12 + $0x70c] sm:$0xf0] }
  0xc8   :  { %v5273_v25 = vor.u32 %v6230_v24, %v5272_v23  ;;  %v5480_v20 = vld [vmem:[#allocation12 + $0x700] sm:$0xf] }
  0xc9   :  { %2944 = vmatpush.bf16.msra.mxu2 %v4841_v44  ;;  %2958 = vmatpush.bf16.msra.mxu3 %v4969_v58  ;;  %v5529_v44 = vor.u32 %v6294_v41, %v5528_v40  ;;  %v5481_v23 = vor.u32 %v6282_v21, %v5480_v20  ;;  %v6084_v41 = vld [vmem:[#allocation12 + $0xe4] sm:$0xf]  ;;  %v4666_v20 = vld [vmem:[#allocation12 + $0xb0] sm:$0xf0] }
  0xcb   :  { %2965 = vmatpush.bf16.msrb.mxu0 %v5209_v27  ;;  %2979 = vmatpush.bf16.msrb.mxu1 %v5337_v31  ;;  %v6266_v27 = vld [vmem:[#allocation12 + $0x68c] sm:$0xf0]  ;;  %v5545_v31 = vor.u32 %v6298_v30, %v5544_v28  ;;  %v6803_v28 = vld [vmem:[#allocation11] sm:$0xff] }
  0xcc   :  { %v5417_v29 = vor.u32 %v6266_v27, %v5416_v26  ;;  %v1307_v30 = vperm.slane %v6803_v28, 0  ;;  %v1308_v32 = vperm.slane %v6803_v28, 1  ;;  %v1309_v45 = vperm.slane %v6803_v28, 2 }
  0xcd   :  { %2993 = vmatpush.bf16.msrb.mxu2 %v5465_v51  ;;  %3007 = vmatpush.bf16.msrb.mxu3 %v5593_v52  ;;  %v5241_v52 = vor.u32 %v6222_v50, %v5240_v47  ;;  %v4826_v47 = vld [vmem:[#allocation12 + $0x1f0] sm:$0xf0] }
  0xce   :  { %v4829_v57 = vor.u32 %v6116_v46, %v4826_v47  ;;  %v6140_v46 = vld [vmem:[#allocation12 + $0x2a4] sm:$0xf]  ;;  %v4922_v47 = vld [vmem:[#allocation12 + $0x2b0] sm:$0xf0] }
  0xcf   :  { %2966 = vmatpush.bf16.msrb.mxu0 %v5193_v38  ;;  %2980 = vmatpush.bf16.msrb.mxu1 %v5321_v42  ;;  %v6777_v13 = vpop.f32.mrf.mxu3  ;;  %v6779_v14 = vpop.f32.mrf.mxu0  ;;  %v6262_v38 = vld [vmem:[#allocation12 + $0x66c] sm:$0xf0] }
  0xd0   :  { %v6775_v9 = vpop.f32.mrf.mxu2  ;;  %v6781_v18 = vpop.f32.mrf.mxu1  ;;  %v5401_v39 = vor.u32 %v6262_v38, %v5400_v37 }
  0xd1   :  { %2994 = vmatpush.bf16.msrb.mxu2 %v5449_v62  ;;  %3008 = vmatpush.bf16.msrb.mxu3 %v5577_v2  ;;  %v5224_v62 = vld [vmem:[#allocation12 + $0x500] sm:$0xf] }
  0xd2   :  { %v5225_v2 = vor.u32 %v6218_v0, %v5224_v62  ;;  %v6112_v0 = vld [vmem:[#allocation12 + $0x1c4] sm:$0xf] }
  0xd3   :  { %2967 = vmatpush.bf16.msrb.mxu0 %v5177_v56  ;;  %2981 = vmatpush.bf16.msrb.mxu1 %v5305_v61  ;;  %v5385_v56 = vor.u32 %v6258_v54, %v5384_v53  ;;  %v6186_v61 = vld [vmem:[#allocation12 + $0x40c] sm:$0xf0] }
  0xd4   :  { %v5097_v63 = vor.u32 %v6186_v61, %v5096_v60 }
  0xd5   :  { %2995 = vmatpush.bf16.msrb.mxu2 %v5433_v15  ;;  %3009 = vmatpush.bf16.msrb.mxu3 %v5561_v19  ;;  %v6250_v15 = vld [vmem:[#allocation12 + $0x60c] sm:$0xf0] }
  0xd6   :  { %v5353_v19 = vor.u32 %v6250_v15, %v5352_v12 }
  0xd7   :  { %2968 = vmatpush.bf16.msrb.mxu0 %v5161_v7  ;;  %2982 = vmatpush.bf16.msrb.mxu1 %v5289_v10  ;;  %v6785_v58 = vpop.f32.mrf.mxu3  ;;  %v6286_v7 = vld [vmem:[#allocation12 + $0x72c] sm:$0xf0] }
  0xd8   :  { %v6783_v42 = vpop.f32.mrf.mxu2  ;;  %v5497_v10 = vor.u32 %v6286_v7, %v5496_v6  ;;  %v6148_v7 = vld [vmem:[#allocation12 + $0x2e4] sm:$0xf] }
  0xd9   :  { %2996 = vmatpush.bf16.msrb.mxu2 %v5417_v29  ;;  %3010 = vmatpush.bf16.msrb.mxu3 %v5545_v31 }
  0xdb   :  { %2969 = vmatpush.bf16.msrb.mxu0 %v5145_v22  ;;  %2983 = vmatpush.bf16.msrb.mxu1 %v5273_v25 }
  0xdd   :  { %2997 = vmatpush.bf16.msrb.mxu2 %v5401_v39  ;;  %3011 = vmatpush.bf16.msrb.mxu3 %v5529_v44  ;;  %v4698_v44 = vld [vmem:[#allocation12 + $0xf0] sm:$0xf0] }
  0xde   :  { %v4701_v55 = vor.u32 %v6084_v41, %v4698_v44  ;;  %v6104_v41 = vld [vmem:[#allocation12 + $0x184] sm:$0xf]  ;;  %v4778_v44 = vld [vmem:[#allocation12 + $0x190] sm:$0xf0] }
  0xdf   :  { %2970 = vmatpush.bf16.msrb.mxu0 %v5129_v35  ;;  %2984 = vmatpush.bf16.msrb.mxu1 %v5257_v36 }
  0xe1   :  { %2998 = vmatpush.bf16.msrb.mxu2 %v5385_v56  ;;  %3012 = vmatpush.bf16.msrb.mxu3 %v5513_v59  ;;  %v6080_v59 = vld [vmem:[#allocation12 + $0xc4] sm:$0xf] }
  0xe3   :  { %2971 = vmatpush.bf16.msrb.mxu0 %v5113_v49  ;;  %2985 = vmatpush.bf16.msrb.mxu1 %v5241_v52  ;;  %v1310_v52 = vperm.slane %v6803_v28, 3 }
  0xe5   :  { %2999 = vmatpush.bf16.msrb.mxu2 %v5369_v8  ;;  %3013 = vmatpush.bf16.msrb.mxu3 %v5497_v10  ;;  %v4954_v8 = vld [vmem:[#allocation12 + $0x2f0] sm:$0xf0]  ;;  %v6180_v10 = vld [vmem:[#allocation12 + $0x3e4] sm:$0xf] }
  0xe7   :  { %v6787_v48 = vpop.f32.mrf.mxu0  ;;  %v6789_v51 = vpop.f32.mrf.mxu1  ;;  %2972 = vmatpush.bf16.msrb.mxu0 %v5097_v63  ;;  %2986 = vmatpush.bf16.msrb.mxu1 %v5225_v2 }
  0xe9   :  { %3000 = vmatpush.bf16.msrb.mxu2 %v5353_v19  ;;  %3014 = vmatpush.bf16.msrb.mxu3 %v5481_v23  ;;  %v6076_v19 = vld [vmem:[#allocation12 + $0xa4] sm:$0xf] }
  0xef   :  { %v6793_v16 = vpop.f32.mrf.mxu3  ;;  %v6795_v17 = vpop.f32.mrf.mxu0 }
  0xf0   :  { %v6791_v11 = vpop.f32.mrf.mxu2  ;;  %v6797_v22 = vpop.f32.mrf.mxu1 }
  0xf7   :  { %v6801_v25 = vpop.f32.mrf.mxu3 }
  0xf8   :  { %v6799_v24 = vpop.f32.mrf.mxu2 }
 0x107   :  { %v1151_v26 = vpop.f32.mrf.mxu0  ;;  %v1165_v27 = vpop.f32.mrf.mxu1 }
 0x108   :  { %v1254_v29 = vadd.f32 %v1151_v26, %v6771_v1  ;;  %v1255_v31 = vadd.f32 %v1165_v27, %v6773_v3  ;;  %v6108_v26 = vld [vmem:[#allocation12 + $0x1a4] sm:$0xf] }
 0x10a   :  { %v1323_v43 = vadd.f32 %v1307_v30, %v1254_v29  ;;  %v1324_v38 = vadd.f32 %v1308_v32, %v1255_v31 }
 0x10c   :  { %v1339_v49 = vmax.f32 %v1323_v43, 0.0  ;;  %v1340_v53 = vmax.f32 %v1324_v38, 0.0  ;;  %v6176_v43 = vld [vmem:[#allocation12 + $0x3c4] sm:$0xf]  ;;  %v5066_v38 = vld [vmem:[#allocation12 + $0x3d0] sm:$0xf0] }
 0x10f   :  { %v1193_v34 = vpop.f32.mrf.mxu3  ;;  %v1153_v35 = vpop.f32.mrf.mxu0 }
 0x110   :  { %v1179_v33 = vpop.f32.mrf.mxu2  ;;  %v1262_v36 = vadd.f32 %v1153_v35, %v6779_v14  ;;  %v1167_v37 = vpop.f32.mrf.mxu1  ;;  %v1257_v50 = vadd.f32 %v1193_v34, %v6777_v13  ;;  %v4810_v13 = vld [vmem:[#allocation12 + $0x1d0] sm:$0xf0]  ;;  %v6144_v34 = vld [vmem:[#allocation12 + $0x2c4] sm:$0xf] }
 0x111   :  { %v1263_v39 = vadd.f32 %v1167_v37, %v6781_v18  ;;  %v1256_v1 = vadd.f32 %v1179_v33, %v6775_v9  ;;  %v4682_v9 = vld [vmem:[#allocation12 + $0xd0] sm:$0xf0]  ;;  %v4813_v15 = vor.u32 %v6112_v0, %v4810_v13  ;;  %v4669_v33 = vor.u32 %v6076_v19, %v4666_v20  ;;  %v6168_v0 = vld [vmem:[#allocation12 + $0x384] sm:$0xf] }
 0x112   :  { %v1331_v40 = vadd.f32 %v1307_v30, %v1262_v36  ;;  %v1326_v2 = vadd.f32 %v1310_v52, %v1257_v50  ;;  %v4685_v6 = vor.u32 %v6080_v59, %v4682_v9  ;;  %v4957_v30 = vor.u32 %v6148_v7, %v4954_v8  ;;  %v4938_v35 = vld [vmem:[#allocation12 + $0x2d0] sm:$0xf0] }
 0x113   :  { %v1332_v3 = vadd.f32 %v1308_v32, %v1263_v39  ;;  %v1325_v60 = vadd.f32 %v1309_v45, %v1256_v1  ;;  %v6072_v39 = vld [vmem:[#allocation12 + $0x84] sm:$0xf]  ;;  %v4941_v1 = vor.u32 %v6144_v34, %v4938_v35  ;;  %v4781_v50 = vor.u32 %v6104_v41, %v4778_v44  ;;  %v4746_v7 = vld [vmem:[#allocation12 + $0x150] sm:$0xf0] }
 0x114   :  { %v1347_v14 = vmax.f32 %v1331_v40, 0.0  ;;  %v1342_v27 = vmax.f32 %v1326_v2, 0.0  ;;  %v4650_v40 = vld [vmem:[#allocation12 + $0x90] sm:$0xf0]  ;;  %v1311_v8 = vperm.slane %v6803_v28, 4 }
 0x115   :  { %v1348_v54 = vmax.f32 %v1332_v3, 0.0  ;;  %v1341_v21 = vmax.f32 %v1325_v60, 0.0  ;;  %v4653_v3 = vor.u32 %v6072_v39, %v4650_v40  ;;  %v5034_v2 = vld [vmem:[#allocation12 + $0x390] sm:$0xf0]  ;;  %v6128_v39 = vld [vmem:[#allocation12 + $0x244] sm:$0xf] }
 0x116   :  { %v6815_v18 = vpack.c.bf16 %v1347_v14, %v1339_v49  ;;  %v6172_v49 = vld [vmem:[#allocation12 + $0x3a4] sm:$0xf]  ;;  %v4890_v20 = vld [vmem:[#allocation12 + $0x270] sm:$0xf0] }
 0x117   :  { %v6817_v61 = vpack.c.bf16 %v1348_v54, %v1340_v53  ;;  %v1195_v63 = vpop.f32.mrf.mxu3  ;;  %v6068_v14 = vld [vmem:[#allocation12 + $0x64] sm:$0xf]  ;;  %v4634_v53 = vld [vmem:[#allocation12 + $0x70] sm:$0xf0] }
 0x118   :  { %v1181_v56 = vpop.f32.mrf.mxu2  ;;  %v1265_v4 = vadd.f32 %v1195_v63, %v6785_v58  ;;  %2917 = vmatmul.bf16.vlgmr.msra.gmra.mxu0 %v6815_v18  ;;  %v4794_v58 = vld [vmem:[#allocation12 + $0x1b0] sm:$0xf0]  ;;  %v6100_v54 = vld [vmem:[#allocation12 + $0x164] sm:$0xf]  ;;  %v4637_v60 = vor.u32 %v6068_v14, %v4634_v53 }
 0x119   :  { %v1264_v62 = vadd.f32 %v1181_v56, %v6783_v42  ;;  %2931 = vmatmul.bf16.vlgmr.msra.gmra.mxu1 %v6817_v61  ;;  %3021 = vmatpush.bf16.msra.mxu0 %v4701_v55  ;;  %v5082_v42 = vld [vmem:[#allocation12 + $0x3f0] sm:$0xf0]  ;;  %v4797_v37 = vor.u32 %v6108_v26, %v4794_v58  ;;  %v1312_v58 = vperm.slane %v6803_v28, 5 }
 0x11a   :  { %v1334_v12 = vadd.f32 %v1310_v52, %v1265_v4  ;;  %3035 = vmatpush.bf16.msra.mxu1 %v4829_v57  ;;  %v5085_v32 = vor.u32 %v6180_v10, %v5082_v42  ;;  %v5050_v52 = vld [vmem:[#allocation12 + $0x3b0] sm:$0xf0]  ;;  %v4925_v57 = vor.u32 %v6140_v46, %v4922_v47  ;;  %v6064_v4 = vld [vmem:[#allocation12 + $0x44] sm:$0xf]  ;;  %v5037_v42 = vor.u32 %v6168_v0, %v5034_v2 }
 0x11b   :  { %v1333_v5 = vadd.f32 %v1309_v45, %v1264_v62  ;;  %v5069_v45 = vor.u32 %v6176_v43, %v5066_v38  ;;  %v4762_v55 = vld [vmem:[#allocation12 + $0x170] sm:$0xf0]  ;;  %v5053_v9 = vor.u32 %v6172_v49, %v5050_v52  ;;  %v6136_v62 = vld [vmem:[#allocation12 + $0x284] sm:$0xf]  ;;  %v1314_v47 = vperm.slane %v6803_v28, 7 }
 0x11c   :  { %v1350_v29 = vmax.f32 %v1334_v12, 0.0  ;;  %v4906_v63 = vld [vmem:[#allocation12 + $0x290] sm:$0xf0]  ;;  %v4765_v13 = vor.u32 %v6100_v54, %v4762_v55  ;;  %v6132_v12 = vld [vmem:[#allocation12 + $0x264] sm:$0xf] }
 0x11d   :  { %v1349_v23 = vmax.f32 %v1333_v5, 0.0  ;;  %3022 = vmatpush.bf16.msra.mxu0 %v4685_v6  ;;  %v4618_v5 = vld [vmem:[#allocation12 + $0x50] sm:$0xf0]  ;;  %v6096_v6 = vld [vmem:[#allocation12 + $0x144] sm:$0xf]  ;;  %v4909_v10 = vor.u32 %v6136_v62, %v4906_v63 }
 0x11e   :  { %v6825_v36 = vpack.c.bf16 %v1350_v29, %v1342_v27  ;;  %3036 = vmatpush.bf16.msra.mxu1 %v4813_v15  ;;  %v4621_v19 = vor.u32 %v6064_v4, %v4618_v5  ;;  %v4749_v27 = vor.u32 %v6096_v6, %v4746_v7  ;;  %v6060_v29 = vld [vmem:[#allocation12 + $0x24] sm:$0xf]  ;;  %v4730_v34 = vld [vmem:[#allocation12 + $0x130] sm:$0xf0] }
 0x11f   :  { %v6823_v31 = vpack.c.bf16 %v1349_v23, %v1341_v21  ;;  %v6164_v21 = vld [vmem:[#allocation12 + $0x364] sm:$0xf]  ;;  %v5018_v23 = vld [vmem:[#allocation12 + $0x370] sm:$0xf0] }
 0x120   :  { %2959 = vmatmul.bf16.vlgmr.msra.gmra.mxu3 %v6825_v36  ;;  %v5021_v38 = vor.u32 %v6164_v21, %v5018_v23  ;;  %v6056_v52 = vld [vmem:[#allocation12 + $0x4] sm:$0xf]  ;;  %v4586_v14 = vld [vmem:[#allocation12 + $0x10] sm:$0xf0] }
 0x121   :  { %2945 = vmatmul.bf16.vlgmr.msra.gmra.mxu2 %v6823_v31  ;;  %3063 = vmatpush.bf16.msra.mxu3 %v5085_v32  ;;  %v6088_v54 = vld [vmem:[#allocation12 + $0x104] sm:$0xf]  ;;  %v4714_v55 = vld [vmem:[#allocation12 + $0x110] sm:$0xf0]  ;;  %v4589_v2 = vor.u32 %v6056_v52, %v4586_v14 }
 0x122   :  { %3049 = vmatpush.bf16.msra.mxu2 %v4957_v30  ;;  %3023 = vmatpush.bf16.msra.mxu0 %v4669_v33  ;;  %v4602_v30 = vld [vmem:[#allocation12 + $0x30] sm:$0xf0]  ;;  %v6092_v33 = vld [vmem:[#allocation12 + $0x124] sm:$0xf] }
 0x123   :  { %3037 = vmatpush.bf16.msra.mxu1 %v4797_v37  ;;  %v4893_v37 = vor.u32 %v6132_v12, %v4890_v20  ;;  %v4605_v44 = vor.u32 %v6060_v29, %v4602_v30  ;;  %v6244_v62 = vld [vmem:[#allocation12 + $0x5e4] sm:$0xf]  ;;  %v5338_v63 = vld [vmem:[#allocation12 + $0x5f0] sm:$0xf0] }
 0x124   :  { %v6124_v4 = vld [vmem:[#allocation12 + $0x224] sm:$0xf]  ;;  %v4858_v5 = vld [vmem:[#allocation12 + $0x230] sm:$0xf0] }
 0x125   :  { %3064 = vmatpush.bf16.msra.mxu3 %v5069_v45  ;;  %v6160_v45 = vld [vmem:[#allocation12 + $0x344] sm:$0xf]  ;;  %v5306_v14 = vld [vmem:[#allocation12 + $0x5b0] sm:$0xf0] }
 0x126   :  { %3050 = vmatpush.bf16.msra.mxu2 %v4941_v1  ;;  %3024 = vmatpush.bf16.msra.mxu0 %v4653_v3  ;;  %v4874_v1 = vld [vmem:[#allocation12 + $0x250] sm:$0xf0]  ;;  %v6240_v29 = vld [vmem:[#allocation12 + $0x5c4] sm:$0xf] }
 0x127   :  { %v1207_v56 = vpop.f32.mrf.mxu0  ;;  %v1221_v59 = vpop.f32.mrf.mxu1  ;;  %3038 = vmatpush.bf16.msra.mxu1 %v4781_v50  ;;  %v5002_v3 = vld [vmem:[#allocation12 + $0x350] sm:$0xf0]  ;;  %v4733_v50 = vor.u32 %v6092_v33, %v4730_v34 }
 0x128   :  { %v1258_v15 = vadd.f32 %v1207_v56, %v6787_v48  ;;  %v1259_v26 = vadd.f32 %v1221_v59, %v6789_v51  ;;  %v1313_v48 = vperm.slane %v6803_v28, 6  ;;  %v6212_v56 = vld [vmem:[#allocation12 + $0x4e4] sm:$0xf]  ;;  %v4877_v59 = vor.u32 %v6128_v39, %v4874_v1  ;;  %v5322_v34 = vld [vmem:[#allocation12 + $0x5d0] sm:$0xf0] }
 0x129   :  { %3065 = vmatpush.bf16.msra.mxu3 %v5053_v9  ;;  %v5005_v9 = vor.u32 %v6160_v45, %v5002_v3  ;;  %v6276_v39 = vld [vmem:[#allocation12 + $0x6e4] sm:$0xf]  ;;  %v5325_v28 = vor.u32 %v6240_v29, %v5322_v34  ;;  %v5130_v34 = vld [vmem:[#allocation12 + $0x450] sm:$0xf0] }
 0x12a   :  { %3051 = vmatpush.bf16.msra.mxu2 %v4925_v57  ;;  %3025 = vmatpush.bf16.msra.mxu0 %v4637_v60  ;;  %v1327_v40 = vadd.f32 %v1311_v8, %v1258_v15  ;;  %v1328_v46 = vadd.f32 %v1312_v58, %v1259_v26  ;;  %v5210_v60 = vld [vmem:[#allocation12 + $0x4f0] sm:$0xf0]  ;;  %v4861_v26 = vor.u32 %v6124_v4, %v4858_v5  ;;  %v6204_v3 = vld [vmem:[#allocation12 + $0x4a4] sm:$0xf] }
 0x12b   :  { %3039 = vmatpush.bf16.msra.mxu1 %v4765_v13 }
 0x12c   :  { %v1343_v0 = vmax.f32 %v1327_v40, 0.0  ;;  %v1344_v6 = vmax.f32 %v1328_v46, 0.0  ;;  %v5178_v46 = vld [vmem:[#allocation12 + $0x4b0] sm:$0xf0] }
 0x12d   :  { %3066 = vmatpush.bf16.msra.mxu3 %v5037_v42  ;;  %v5213_v42 = vor.u32 %v6212_v56, %v5210_v60 }
 0x12e   :  { %3052 = vmatpush.bf16.msra.mxu2 %v4909_v10  ;;  %3026 = vmatpush.bf16.msra.mxu0 %v4621_v19  ;;  %v4986_v10 = vld [vmem:[#allocation12 + $0x330] sm:$0xf0]  ;;  %v5341_v19 = vor.u32 %v6244_v62, %v5338_v63  ;;  %v6200_v63 = vld [vmem:[#allocation12 + $0x484] sm:$0xf] }
 0x12f   :  { %v1235_v32 = vpop.f32.mrf.mxu2  ;;  %v1249_v35 = vpop.f32.mrf.mxu3  ;;  %3040 = vmatpush.bf16.msra.mxu1 %v4749_v27  ;;  %v5194_v27 = vld [vmem:[#allocation12 + $0x4d0] sm:$0xf0] }
 0x130   :  { %v1209_v43 = vpop.f32.mrf.mxu0  ;;  %v1223_v41 = vpop.f32.mrf.mxu1  ;;  %v5578_v62 = vld [vmem:[#allocation12 + $0x7d0] sm:$0xf0] }
 0x131   :  { %v1266_v51 = vadd.f32 %v1209_v43, %v6795_v17  ;;  %v1267_v49 = vadd.f32 %v1223_v41, %v6797_v22  ;;  %v1260_v17 = vadd.f32 %v1235_v32, %v6791_v11  ;;  %v1261_v22 = vadd.f32 %v1249_v35, %v6793_v16  ;;  %3067 = vmatpush.bf16.msra.mxu3 %v5021_v38  ;;  %v6120_v35 = vld [vmem:[#allocation12 + $0x204] sm:$0xf]  ;;  %v4842_v43 = vld [vmem:[#allocation12 + $0x210] sm:$0xf0] }
 0x132   :  { %3053 = vmatpush.bf16.msra.mxu2 %v4893_v37  ;;  %3027 = vmatpush.bf16.msra.mxu0 %v4605_v44  ;;  %v4717_v11 = vor.u32 %v6088_v54, %v4714_v55  ;;  %v4970_v38 = vld [vmem:[#allocation12 + $0x310] sm:$0xf0]  ;;  %v6308_v41 = vld [vmem:[#allocation12 + $0x7e4] sm:$0xf] }
 0x133   :  { %v1335_v53 = vadd.f32 %v1311_v8, %v1266_v51  ;;  %v1336_v57 = vadd.f32 %v1312_v58, %v1267_v49  ;;  %3041 = vmatpush.bf16.msra.mxu1 %v4733_v50  ;;  %v6156_v8 = vld [vmem:[#allocation12 + $0x324] sm:$0xf]  ;;  %v1329_v16 = vadd.f32 %v1313_v48, %v1260_v17  ;;  %v1330_v30 = vadd.f32 %v1314_v47, %v1261_v22  ;;  %v5466_v51 = vld [vmem:[#allocation12 + $0x6f0] sm:$0xf0] }
 0x134   :  { %v6208_v58 = vld [vmem:[#allocation12 + $0x4c4] sm:$0xf]  ;;  %v4989_v33 = vor.u32 %v6156_v8, %v4986_v10  ;;  %v5594_v44 = vld [vmem:[#allocation12 + $0x7f0] sm:$0xf0]  ;;  %v5469_v54 = vor.u32 %v6276_v39, %v5466_v51  ;;  %v5181_v17 = vor.u32 %v6204_v3, %v5178_v46 }
 0x135   :  { %v1351_v13 = vmax.f32 %v1335_v53, 0.0  ;;  %v1352_v7 = vmax.f32 %v1336_v57, 0.0  ;;  %3068 = vmatpush.bf16.msra.mxu3 %v5005_v9  ;;  %v1345_v1 = vmax.f32 %v1329_v16, 0.0  ;;  %v1346_v49 = vmax.f32 %v1330_v30, 0.0  ;;  %v6272_v57 = vld [vmem:[#allocation12 + $0x6c4] sm:$0xf] }
 0x136   :  { %3054 = vmatpush.bf16.msra.mxu2 %v4877_v59  ;;  %3028 = vmatpush.bf16.msra.mxu0 %v4589_v2  ;;  %v5597_v56 = vor.u32 %v6308_v41, %v5594_v44  ;;  %v5450_v59 = vld [vmem:[#allocation12 + $0x6d0] sm:$0xf0]  ;;  %v6304_v9 = vld [vmem:[#allocation12 + $0x7c4] sm:$0xf] }
 0x137   :  { %v6839_v12 = vpack.c.bf16 %v1351_v13, %v1343_v0  ;;  %v1237_v15 = vpop.f32.mrf.mxu2  ;;  %v6843_v20 = vpack.c.bf16 %v1352_v7, %v1344_v6  ;;  %v1251_v23 = vpop.f32.mrf.mxu3  ;;  %3042 = vmatpush.bf16.msra.mxu1 %v4717_v11  ;;  %v5162_v0 = vld [vmem:[#allocation12 + $0x490] sm:$0xf0]  ;;  %v6232_v22 = vld [vmem:[#allocation12 + $0x584] sm:$0xf]  ;;  %v5453_v2 = vor.u32 %v6272_v57, %v5450_v59  ;;  %v5581_v4 = vor.u32 %v6304_v9, %v5578_v62  ;;  %v4704_v59 = vld [vmem:[#allocation12 + $0xe8] sm:$0xf] }
 0x138   :  { %v1268_v21 = vadd.f32 %v1237_v15, %v6799_v24  ;;  %v1269_v32 = vadd.f32 %v1251_v23, %v6801_v25  ;;  %v6152_v24 = vld [vmem:[#allocation12 + $0x304] sm:$0xf]  ;;  %v5197_v25 = vor.u32 %v6208_v58, %v5194_v27  ;;  %v5290_v13 = vld [vmem:[#allocation12 + $0x590] sm:$0xf0]  ;;  %v5165_v5 = vor.u32 %v6200_v63, %v5162_v0  ;;  %v4832_v62 = vld [vmem:[#allocation12 + $0x1e8] sm:$0xf] }
 0x139   :  { %2973 = vmatmul.bf16.vlgmr.msrb.gmra.mxu0 %v6839_v12  ;;  %2987 = vmatmul.bf16.vlgmr.msrb.gmra.mxu1 %v6843_v20  ;;  %v4973_v52 = vor.u32 %v6152_v24, %v4970_v38  ;;  %v6268_v6 = vld [vmem:[#allocation12 + $0x6a4] sm:$0xf]  ;;  %v5434_v7 = vld [vmem:[#allocation12 + $0x6b0] sm:$0xf0]  ;;  %v5293_v11 = vor.u32 %v6232_v22, %v5290_v13  ;;  %v6119_v63 = vld [vmem:[#allocation12 + $0x1f4] sm:$0xf0] }
 0x13a   :  { %v1337_v37 = vadd.f32 %v1313_v48, %v1268_v21  ;;  %v1338_v40 = vadd.f32 %v1314_v47, %v1269_v32  ;;  %3077 = vmatpush.bf16.msrb.mxu0 %v5213_v42  ;;  %3055 = vmatpush.bf16.msra.mxu2 %v4861_v26  ;;  %v4845_v48 = vor.u32 %v6120_v35, %v4842_v43  ;;  %v6236_v47 = vld [vmem:[#allocation12 + $0x5a4] sm:$0xf]  ;;  %v5562_v10 = vld [vmem:[#allocation12 + $0x7b0] sm:$0xf0] }
 0x13b   :  { %3091 = vmatpush.bf16.msrb.mxu1 %v5341_v19  ;;  %3069 = vmatpush.bf16.msra.mxu3 %v4989_v33  ;;  %v5309_v60 = vor.u32 %v6236_v47, %v5306_v14  ;;  %v6300_v8 = vld [vmem:[#allocation12 + $0x7a4] sm:$0xf]  ;;  %v5146_v42 = vld [vmem:[#allocation12 + $0x470] sm:$0xf0]  ;;  %v5437_v21 = vor.u32 %v6268_v6, %v5434_v7 }
 0x13c   :  { %v1353_v45 = vmax.f32 %v1337_v37, 0.0  ;;  %v1354_v50 = vmax.f32 %v1338_v40, 0.0  ;;  %v6196_v15 = vld [vmem:[#allocation12 + $0x464] sm:$0xf]  ;;  %v5274_v16 = vld [vmem:[#allocation12 + $0x570] sm:$0xf0]  ;;  %v5565_v23 = vor.u32 %v6300_v8, %v5562_v10 }
 0x13d   :  { %v6228_v19 = vld [vmem:[#allocation12 + $0x564] sm:$0xf]  ;;  %v5418_v58 = vld [vmem:[#allocation12 + $0x690] sm:$0xf0]  ;;  %v5149_v27 = vor.u32 %v6196_v15, %v5146_v42  ;;  %v4688_v8 = vld [vmem:[#allocation12 + $0xc8] sm:$0xf] }
 0x13e   :  { %v6851_v53 = vpack.c.bf16 %v1353_v45, %v1345_v1  ;;  %v6853_v55 = vpack.c.bf16 %v1354_v50, %v1346_v49  ;;  %3078 = vmatpush.bf16.msrb.mxu0 %v5197_v25  ;;  %3056 = vmatpush.bf16.msra.mxu2 %v4845_v48  ;;  %v6264_v26 = vld [vmem:[#allocation12 + $0x684] sm:$0xf]  ;;  %v5277_v29 = vor.u32 %v6228_v19, %v5274_v16  ;;  %v5546_v32 = vld [vmem:[#allocation12 + $0x790] sm:$0xf0]  ;;  %v6083_v15 = vld [vmem:[#allocation12 + $0xd4] sm:$0xf0] }
 0x13f   :  { %3092 = vmatpush.bf16.msrb.mxu1 %v5325_v28  ;;  %3070 = vmatpush.bf16.msra.mxu3 %v4973_v52  ;;  %v6296_v30 = vld [vmem:[#allocation12 + $0x784] sm:$0xf]  ;;  %v5258_v43 = vld [vmem:[#allocation12 + $0x550] sm:$0xf0]  ;;  %v5421_v37 = vor.u32 %v6264_v26, %v5418_v58  ;;  %v4816_v42 = vld [vmem:[#allocation12 + $0x1c8] sm:$0xf] }
 0x140   :  { %3001 = vmatmul.bf16.vlgmr.msrb.gmra.mxu2 %v6851_v53  ;;  %3015 = vmatmul.bf16.vlgmr.msrb.gmra.mxu3 %v6853_v55  ;;  %v6192_v33 = vld [vmem:[#allocation12 + $0x444] sm:$0xf]  ;;  %v5549_v24 = vor.u32 %v6296_v30, %v5546_v32  ;;  %v5402_v39 = vld [vmem:[#allocation12 + $0x670] sm:$0xf0]  ;;  %v6115_v19 = vld [vmem:[#allocation12 + $0x1d4] sm:$0xf0]  ;;  %v4689_v30 = vor.u32 %v6083_v15, %v4688_v8 }
 0x141   :  { %v6224_v35 = vld [vmem:[#allocation12 + $0x544] sm:$0xf]  ;;  %v5133_v40 = vor.u32 %v6192_v33, %v5130_v34  ;;  %v5530_v41 = vld [vmem:[#allocation12 + $0x770] sm:$0xf0]  ;;  %v4817_v32 = vor.u32 %v6115_v19, %v4816_v42  ;;  %v5088_v33 = vld [vmem:[#allocation12 + $0x3e8] sm:$0xf] }
 0x142   :  { %3105 = vmatpush.bf16.msrb.mxu2 %v5469_v54  ;;  %3079 = vmatpush.bf16.msrb.mxu0 %v5181_v17  ;;  %v6260_v38 = vld [vmem:[#allocation12 + $0x664] sm:$0xf]  ;;  %v5261_v25 = vor.u32 %v6224_v35, %v5258_v43  ;;  %v5114_v1 = vld [vmem:[#allocation12 + $0x430] sm:$0xf0]  ;;  %v6183_v34 = vld [vmem:[#allocation12 + $0x3f4] sm:$0xf0] }
 0x143   :  { %3119 = vmatpush.bf16.msrb.mxu3 %v5597_v56  ;;  %3093 = vmatpush.bf16.msrb.mxu1 %v5309_v60  ;;  %v6292_v51 = vld [vmem:[#allocation12 + $0x764] sm:$0xf]  ;;  %v5242_v28 = vld [vmem:[#allocation12 + $0x530] sm:$0xf0]  ;;  %v5405_v48 = vor.u32 %v6260_v38, %v5402_v39  ;;  %v6087_v60 = vld [vmem:[#allocation12 + $0xf4] sm:$0xf0] }
 0x144   :  { %v6188_v44 = vld [vmem:[#allocation12 + $0x424] sm:$0xf]  ;;  %v5533_v3 = vor.u32 %v6292_v51, %v5530_v41  ;;  %v5386_v49 = vld [vmem:[#allocation12 + $0x650] sm:$0xf0]  ;;  %v4705_v7 = vor.u32 %v6087_v60, %v4704_v59  ;;  %v4672_v35 = vld [vmem:[#allocation12 + $0xa8] sm:$0xf] }
 0x145   :  { %v6220_v45 = vld [vmem:[#allocation12 + $0x524] sm:$0xf]  ;;  %v5117_v52 = vor.u32 %v6188_v44, %v5114_v1  ;;  %v5514_v14 = vld [vmem:[#allocation12 + $0x750] sm:$0xf0]  ;;  %v6111_v38 = vld [vmem:[#allocation12 + $0x1b4] sm:$0xf0] }
 0x146   :  { %3106 = vmatpush.bf16.msrb.mxu2 %v5453_v2  ;;  %3080 = vmatpush.bf16.msrb.mxu0 %v5165_v5  ;;  %v6256_v46 = vld [vmem:[#allocation12 + $0x644] sm:$0xf]  ;;  %v5245_v47 = vor.u32 %v6220_v45, %v5242_v28  ;;  %v5098_v56 = vld [vmem:[#allocation12 + $0x410] sm:$0xf0]  ;;  %v4944_v51 = vld [vmem:[#allocation12 + $0x2c8] sm:$0xf] }
 0x147   :  { %3120 = vmatpush.bf16.msrb.mxu3 %v5581_v4  ;;  %3094 = vmatpush.bf16.msrb.mxu1 %v5293_v11  ;;  %v6288_v50 = vld [vmem:[#allocation12 + $0x744] sm:$0xf]  ;;  %v5226_v57 = vld [vmem:[#allocation12 + $0x510] sm:$0xf0]  ;;  %v5389_v9 = vor.u32 %v6256_v46, %v5386_v49  ;;  %v4833_v11 = vor.u32 %v6119_v63, %v4832_v62  ;;  %v6147_v41 = vld [vmem:[#allocation12 + $0x2d4] sm:$0xf0] }
 0x148   :  { %v6184_v54 = vld [vmem:[#allocation12 + $0x404] sm:$0xf]  ;;  %v5517_v0 = vor.u32 %v6288_v50, %v5514_v14  ;;  %v5370_v13 = vld [vmem:[#allocation12 + $0x630] sm:$0xf0]  ;;  %v5072_v45 = vld [vmem:[#allocation12 + $0x3c8] sm:$0xf]  ;;  %v4945_v50 = vor.u32 %v6147_v41, %v4944_v51 }
 0x149   :  { %3029 = vmatmul.bf16.vlgmr.msra.gmra.mxu0 %v6815_v18  ;;  %3043 = vmatmul.bf16.vlgmr.msra.gmra.mxu1 %v6817_v61  ;;  %v6216_v17 = vld [vmem:[#allocation12 + $0x504] sm:$0xf]  ;;  %v5101_v2 = vor.u32 %v6184_v54, %v5098_v56  ;;  %v5498_v6 = vld [vmem:[#allocation12 + $0x730] sm:$0xf0]  ;;  %v6179_v28 = vld [vmem:[#allocation12 + $0x3d4] sm:$0xf0] }
 0x14a   :  { %3107 = vmatpush.bf16.msrb.mxu2 %v5437_v21  ;;  %3081 = vmatpush.bf16.msrb.mxu0 %v5149_v27  ;;  %v6252_v22 = vld [vmem:[#allocation12 + $0x624] sm:$0xf]  ;;  %v5229_v4 = vor.u32 %v6216_v17, %v5226_v57  ;;  %v5482_v58 = vld [vmem:[#allocation12 + $0x710] sm:$0xf0]  ;;  %v4960_v27 = vld [vmem:[#allocation12 + $0x2e8] sm:$0xf] }
 0x14b   :  { %3121 = vmatpush.bf16.msrb.mxu3 %v5565_v23  ;;  %3095 = vmatpush.bf16.msrb.mxu1 %v5277_v29  ;;  %v6284_v5 = vld [vmem:[#allocation12 + $0x724] sm:$0xf]  ;;  %v5373_v10 = vor.u32 %v6252_v22, %v5370_v13  ;;  %v5354_v23 = vld [vmem:[#allocation12 + $0x610] sm:$0xf0]  ;;  %v6151_v29 = vld [vmem:[#allocation12 + $0x2f4] sm:$0xf0] }
 0x14c   :  { %v5501_v16 = vor.u32 %v6284_v5, %v5498_v6  ;;  %v6248_v21 = vld [vmem:[#allocation12 + $0x604] sm:$0xf]  ;;  %v4784_v46 = vld [vmem:[#allocation12 + $0x188] sm:$0xf]  ;;  %v6107_v49 = vld [vmem:[#allocation12 + $0x194] sm:$0xf0] }
 0x14d   :  { %v6280_v26 = vld [vmem:[#allocation12 + $0x704] sm:$0xf]  ;;  %v5357_v43 = vor.u32 %v6248_v21, %v5354_v23  ;;  %v6143_v14 = vld [vmem:[#allocation12 + $0x2b4] sm:$0xf0]  ;;  %v4785_v56 = vor.u32 %v6107_v49, %v4784_v46  ;;  %v5056_v17 = vld [vmem:[#allocation12 + $0x3a8] sm:$0xf] }
 0x14e   :  { %3108 = vmatpush.bf16.msrb.mxu2 %v5421_v37  ;;  %3082 = vmatpush.bf16.msrb.mxu0 %v5133_v40  ;;  %v6079_v37 = vld [vmem:[#allocation12 + $0xb4] sm:$0xf0]  ;;  %v5485_v39 = vor.u32 %v6280_v26, %v5482_v58  ;;  %v4961_v40 = vor.u32 %v6151_v29, %v4960_v27  ;;  %v4640_v59 = vld [vmem:[#allocation12 + $0x68] sm:$0xf] }
 0x14f   :  { %3122 = vmatpush.bf16.msrb.mxu3 %v5549_v24  ;;  %3096 = vmatpush.bf16.msrb.mxu1 %v5261_v25  ;;  %v4800_v24 = vld [vmem:[#allocation12 + $0x1a8] sm:$0xf]  ;;  %v5089_v25 = vor.u32 %v6183_v34, %v5088_v33  ;;  %v4673_v44 = vor.u32 %v6079_v37, %v4672_v35  ;;  %v6175_v57 = vld [vmem:[#allocation12 + $0x3b4] sm:$0xf0] }
 0x150   :  { %3057 = vmatmul.bf16.vlgmr.msra.gmra.mxu2 %v6823_v31  ;;  %3071 = vmatmul.bf16.vlgmr.msra.gmra.mxu3 %v6825_v36  ;;  %v4801_v1 = vor.u32 %v6111_v38, %v4800_v24  ;;  %v4768_v60 = vld [vmem:[#allocation12 + $0x168] sm:$0xf]  ;;  %v6103_v62 = vld [vmem:[#allocation12 + $0x174] sm:$0xf0] }
 0x151   :  { %v4912_v22 = vld [vmem:[#allocation12 + $0x288] sm:$0xf]  ;;  %v6139_v13 = vld [vmem:[#allocation12 + $0x294] sm:$0xf0] }
 0x152   :  { %3109 = vmatpush.bf16.msrb.mxu2 %v5405_v48  ;;  %3083 = vmatpush.bf16.msrb.mxu0 %v5117_v52  ;;  %v4656_v48 = vld [vmem:[#allocation12 + $0x88] sm:$0xf]  ;;  %v5073_v52 = vor.u32 %v6179_v28, %v5072_v45  ;;  %v6171_v6 = vld [vmem:[#allocation12 + $0x394] sm:$0xf0]  ;;  %v4913_v15 = vor.u32 %v6139_v13, %v4912_v22 }
 0x153   :  { %3123 = vmatpush.bf16.msrb.mxu3 %v5533_v3  ;;  %3097 = vmatpush.bf16.msrb.mxu1 %v5245_v47  ;;  %v6075_v3 = vld [vmem:[#allocation12 + $0x94] sm:$0xf0]  ;;  %v4928_v47 = vld [vmem:[#allocation12 + $0x2a8] sm:$0xf] }
 0x154   :  { %v4657_v54 = vor.u32 %v6075_v3, %v4656_v48  ;;  %v4929_v63 = vor.u32 %v6143_v14, %v4928_v47  ;;  %v5040_v5 = vld [vmem:[#allocation12 + $0x388] sm:$0xf]  ;;  %v6167_v58 = vld [vmem:[#allocation12 + $0x374] sm:$0xf0] }
 0x155   :  { %v4752_v8 = vld [vmem:[#allocation12 + $0x148] sm:$0xf]  ;;  %v5041_v42 = vor.u32 %v6171_v6, %v5040_v5  ;;  %v6063_v29 = vld [vmem:[#allocation12 + $0x34] sm:$0xf0] }
 0x156   :  { %3110 = vmatpush.bf16.msrb.mxu2 %v5389_v9  ;;  %3084 = vmatpush.bf16.msrb.mxu0 %v5101_v2  ;;  %v6071_v9 = vld [vmem:[#allocation12 + $0x74] sm:$0xf0]  ;;  %v4896_v19 = vld [vmem:[#allocation12 + $0x268] sm:$0xf] }
 0x157   :  { %3124 = vmatpush.bf16.msrb.mxu3 %v5517_v0  ;;  %3098 = vmatpush.bf16.msrb.mxu1 %v5229_v4  ;;  %v5057_v0 = vor.u32 %v6175_v57, %v5056_v17  ;;  %v4641_v2 = vor.u32 %v6071_v9, %v4640_v59  ;;  %v4769_v4 = vor.u32 %v6103_v62, %v4768_v60  ;;  %v5024_v26 = vld [vmem:[#allocation12 + $0x368] sm:$0xf]  ;;  %v6091_v41 = vld [vmem:[#allocation12 + $0x114] sm:$0xf0] }
 0x158   :  { %v4608_v27 = vld [vmem:[#allocation12 + $0x28] sm:$0xf]  ;;  %v5025_v34 = vor.u32 %v6167_v58, %v5024_v26  ;;  %v6215_v45 = vld [vmem:[#allocation12 + $0x4f4] sm:$0xf0] }
 0x159   :  { %3085 = vmatmul.bf16.vlgmr.msrb.gmra.mxu0 %v6839_v12  ;;  %v4880_v35 = vld [vmem:[#allocation12 + $0x248] sm:$0xf]  ;;  %v4609_v24 = vor.u32 %v6063_v29, %v4608_v27  ;;  %v6247_v48 = vld [vmem:[#allocation12 + $0x5f4] sm:$0xf0] }
 0x15a   :  { %3133 = vmatpush.bf16.msra.mxu0 %v4705_v7  ;;  %3111 = vmatpush.bf16.msrb.mxu2 %v5373_v10  ;;  %v4624_v7 = vld [vmem:[#allocation12 + $0x48] sm:$0xf]  ;;  %v6099_v10 = vld [vmem:[#allocation12 + $0x154] sm:$0xf0] }
 0x15b   :  { %3147 = vmatpush.bf16.msra.mxu1 %v4833_v11  ;;  %3125 = vmatpush.bf16.msrb.mxu3 %v5501_v16  ;;  %v6067_v11 = vld [vmem:[#allocation12 + $0x54] sm:$0xf0]  ;;  %v4753_v23 = vor.u32 %v6099_v10, %v4752_v8  ;;  %v5008_v37 = vld [vmem:[#allocation12 + $0x348] sm:$0xf] }
 0x15c   :  { %3099 = vmatmul.bf16.vlgmr.msrb.gmra.mxu1 %v6843_v20  ;;  %v6135_v16 = vld [vmem:[#allocation12 + $0x274] sm:$0xf0]  ;;  %v4625_v21 = vor.u32 %v6067_v11, %v4624_v7  ;;  %v4720_v51 = vld [vmem:[#allocation12 + $0x108] sm:$0xf] }
 0x15d   :  { %v4897_v33 = vor.u32 %v6135_v16, %v4896_v19  ;;  %v5344_v28 = vld [vmem:[#allocation12 + $0x5e8] sm:$0xf]  ;;  %v6127_v49 = vld [vmem:[#allocation12 + $0x234] sm:$0xf0] }
 0x15e   :  { %3134 = vmatpush.bf16.msra.mxu0 %v4689_v30  ;;  %3112 = vmatpush.bf16.msrb.mxu2 %v5357_v43  ;;  %v4736_v30 = vld [vmem:[#allocation12 + $0x128] sm:$0xf]  ;;  %v6131_v43 = vld [vmem:[#allocation12 + $0x254] sm:$0xf0] }
 0x15f   :  { %3148 = vmatpush.bf16.msra.mxu1 %v4817_v32  ;;  %3126 = vmatpush.bf16.msrb.mxu3 %v5485_v39  ;;  %v6095_v32 = vld [vmem:[#allocation12 + $0x134] sm:$0xf0]  ;;  %v4864_v46 = vld [vmem:[#allocation12 + $0x228] sm:$0xf] }
 0x160   :  { %v4737_v38 = vor.u32 %v6095_v32, %v4736_v30  ;;  %v6163_v39 = vld [vmem:[#allocation12 + $0x354] sm:$0xf0]  ;;  %v4992_v47 = vld [vmem:[#allocation12 + $0x328] sm:$0xf]  ;;  %v4865_v57 = vor.u32 %v6127_v49, %v4864_v46 }
 0x161   :  { %3113 = vmatmul.bf16.vlgmr.msrb.gmra.mxu2 %v6851_v53  ;;  %v5009_v3 = vor.u32 %v6163_v39, %v5008_v37  ;;  %v6159_v14 = vld [vmem:[#allocation12 + $0x334] sm:$0xf0]  ;;  %v5200_v17 = vld [vmem:[#allocation12 + $0x4c8] sm:$0xf] }
 0x162   :  { %3161 = vmatpush.bf16.msra.mxu2 %v4961_v40  ;;  %3135 = vmatpush.bf16.msra.mxu0 %v4673_v44  ;;  %v4592_v40 = vld [vmem:[#allocation12 + $0x8] sm:$0xf]  ;;  %v6211_v59 = vld [vmem:[#allocation12 + $0x4d4] sm:$0xf0]  ;;  %v4993_v62 = vor.u32 %v6159_v14, %v4992_v47 }
 0x163   :  { %3175 = vmatpush.bf16.msra.mxu3 %v5089_v25  ;;  %3149 = vmatpush.bf16.msra.mxu1 %v4801_v1  ;;  %v6059_v25 = vld [vmem:[#allocation12 + $0x14] sm:$0xf0]  ;;  %v5216_v44 = vld [vmem:[#allocation12 + $0x4e8] sm:$0xf]  ;;  %v4881_v1 = vor.u32 %v6131_v43, %v4880_v35  ;;  %v5201_v5 = vor.u32 %v6211_v59, %v5200_v17 }
 0x164   :  { %3127 = vmatmul.bf16.vlgmr.msrb.gmra.mxu3 %v6853_v55  ;;  %v5328_v9 = vld [vmem:[#allocation12 + $0x5c8] sm:$0xf]  ;;  %v6243_v60 = vld [vmem:[#allocation12 + $0x5d4] sm:$0xf0] }
 0x165   :  { %v4976_v22 = vld [vmem:[#allocation12 + $0x308] sm:$0xf]  ;;  %v6155_v13 = vld [vmem:[#allocation12 + $0x314] sm:$0xf0]  ;;  %v5329_v6 = vor.u32 %v6243_v60, %v5328_v9 }
 0x166   :  { %3162 = vmatpush.bf16.msra.mxu2 %v4945_v50  ;;  %3136 = vmatpush.bf16.msra.mxu0 %v4657_v54  ;;  %v4593_v50 = vor.u32 %v6059_v25, %v4592_v40  ;;  %v5217_v54 = vor.u32 %v6215_v45, %v5216_v44  ;;  %v5600_v7 = vld [vmem:[#allocation12 + $0x7e8] sm:$0xf]  ;;  %v6311_v11 = vld [vmem:[#allocation12 + $0x7f4] sm:$0xf0] }
 0x167   :  { %3176 = vmatpush.bf16.msra.mxu3 %v5073_v52  ;;  %3150 = vmatpush.bf16.msra.mxu1 %v4785_v56  ;;  %v4721_v52 = vor.u32 %v6091_v41, %v4720_v51  ;;  %v5345_v56 = vor.u32 %v6247_v48, %v5344_v28  ;;  %v5184_v10 = vld [vmem:[#allocation12 + $0x4a8] sm:$0xf]  ;;  %v6275_v58 = vld [vmem:[#allocation12 + $0x6d4] sm:$0xf0] }
 0x168   :  { %v5312_v16 = vld [vmem:[#allocation12 + $0x5a8] sm:$0xf]  ;;  %v6307_v30 = vld [vmem:[#allocation12 + $0x7d4] sm:$0xf0] }
 0x169   :  { %v5456_v26 = vld [vmem:[#allocation12 + $0x6c8] sm:$0xf]  ;;  %v6235_v37 = vld [vmem:[#allocation12 + $0x594] sm:$0xf0] }
 0x16a   :  { %3163 = vmatpush.bf16.msra.mxu2 %v4929_v63  ;;  %3137 = vmatpush.bf16.msra.mxu0 %v4641_v2  ;;  %v4848_v63 = vld [vmem:[#allocation12 + $0x208] sm:$0xf]  ;;  %v5457_v35 = vor.u32 %v6275_v58, %v5456_v26  ;;  %v6271_v39 = vld [vmem:[#allocation12 + $0x6b4] sm:$0xf0] }
 0x16b   :  { %3177 = vmatpush.bf16.msra.mxu3 %v5057_v0  ;;  %3151 = vmatpush.bf16.msra.mxu1 %v4769_v4  ;;  %v6123_v0 = vld [vmem:[#allocation12 + $0x214] sm:$0xf0]  ;;  %v5472_v2 = vld [vmem:[#allocation12 + $0x6e8] sm:$0xf] }
 0x16c   :  { %v6279_v4 = vld [vmem:[#allocation12 + $0x6f4] sm:$0xf0]  ;;  %v4849_v8 = vor.u32 %v6123_v0, %v4848_v63  ;;  %v5584_v29 = vld [vmem:[#allocation12 + $0x7c8] sm:$0xf] }
 0x16d   :  { %v5473_v19 = vor.u32 %v6279_v4, %v5472_v2  ;;  %v5296_v43 = vld [vmem:[#allocation12 + $0x588] sm:$0xf]  ;;  %v6303_v51 = vld [vmem:[#allocation12 + $0x7b4] sm:$0xf0] }
 0x16e   :  { %3164 = vmatpush.bf16.msra.mxu2 %v4913_v15  ;;  %3138 = vmatpush.bf16.msra.mxu0 %v4625_v21  ;;  %v6207_v15 = vld [vmem:[#allocation12 + $0x4b4] sm:$0xf0]  ;;  %v5568_v25 = vld [vmem:[#allocation12 + $0x7a8] sm:$0xf]  ;;  %v5297_v41 = vor.u32 %v6235_v37, %v5296_v43 }
 0x16f   :  { %3178 = vmatpush.bf16.msra.mxu3 %v5041_v42  ;;  %3152 = vmatpush.bf16.msra.mxu1 %v4753_v23  ;;  %v4977_v42 = vor.u32 %v6155_v13, %v4976_v22  ;;  %v6239_v21 = vld [vmem:[#allocation12 + $0x5b4] sm:$0xf0]  ;;  %v5601_v23 = vor.u32 %v6311_v11, %v5600_v7  ;;  %v5185_v27 = vor.u32 %v6207_v15, %v5184_v10  ;;  %v5152_v44 = vld [vmem:[#allocation12 + $0x468] sm:$0xf] }
 0x170   :  { %v5313_v32 = vor.u32 %v6239_v21, %v5312_v16  ;;  %v5280_v28 = vld [vmem:[#allocation12 + $0x568] sm:$0xf]  ;;  %v6231_v48 = vld [vmem:[#allocation12 + $0x574] sm:$0xf0] }
 0x171   :  { %v5424_v46 = vld [vmem:[#allocation12 + $0x688] sm:$0xf]  ;;  %v6267_v49 = vld [vmem:[#allocation12 + $0x694] sm:$0xf0]  ;;  %v5281_v14 = vor.u32 %v6231_v48, %v5280_v28 }
 0x172   :  { %3165 = vmatpush.bf16.msra.mxu2 %v4897_v33  ;;  %3139 = vmatpush.bf16.msra.mxu0 %v4609_v24  ;;  %v5168_v33 = vld [vmem:[#allocation12 + $0x488] sm:$0xf]  ;;  %v5585_v24 = vor.u32 %v6307_v30, %v5584_v29  ;;  %v6299_v47 = vld [vmem:[#allocation12 + $0x794] sm:$0xf0]  ;;  %v5425_v17 = vor.u32 %v6267_v49, %v5424_v46  ;;  %v6085_v29 = vld [vmem:[#allocation12 + $0xec] sm:$0xf] }
 0x173   :  { %3179 = vmatpush.bf16.msra.mxu3 %v5025_v34  ;;  %3153 = vmatpush.bf16.msra.mxu1 %v4737_v38  ;;  %v6203_v34 = vld [vmem:[#allocation12 + $0x494] sm:$0xf0]  ;;  %v5440_v38 = vld [vmem:[#allocation12 + $0x6a8] sm:$0xf]  ;;  %v4706_v30 = vld [vmem:[#allocation12 + $0xf8] sm:$0xf0] }
 0x174   :  { %v5169_v40 = vor.u32 %v6203_v34, %v5168_v33  ;;  %v5441_v45 = vor.u32 %v6271_v39, %v5440_v38  ;;  %v6227_v59 = vld [vmem:[#allocation12 + $0x554] sm:$0xf0]  ;;  %v5408_v60 = vld [vmem:[#allocation12 + $0x668] sm:$0xf]  ;;  %v4834_v34 = vld [vmem:[#allocation12 + $0x1f8] sm:$0xf0] }
 0x175   :  { %v5536_v0 = vld [vmem:[#allocation12 + $0x768] sm:$0xf]  ;;  %v6295_v22 = vld [vmem:[#allocation12 + $0x774] sm:$0xf0] }
 0x176   :  { %3166 = vmatpush.bf16.msra.mxu2 %v4881_v1  ;;  %3140 = vmatpush.bf16.msra.mxu0 %v4593_v50  ;;  %v6199_v1 = vld [vmem:[#allocation12 + $0x474] sm:$0xf0]  ;;  %v5120_v2 = vld [vmem:[#allocation12 + $0x428] sm:$0xf]  ;;  %v5537_v11 = vor.u32 %v6295_v22, %v5536_v0  ;;  %v6145_v22 = vld [vmem:[#allocation12 + $0x2cc] sm:$0xf] }
 0x177   :  { %3180 = vmatpush.bf16.msra.mxu3 %v5009_v3  ;;  %3154 = vmatpush.bf16.msra.mxu1 %v4721_v52  ;;  %v5569_v3 = vor.u32 %v6303_v51, %v5568_v25  ;;  %v5153_v50 = vor.u32 %v6199_v1, %v5152_v44  ;;  %v5552_v52 = vld [vmem:[#allocation12 + $0x788] sm:$0xf]  ;;  %v6191_v4 = vld [vmem:[#allocation12 + $0x434] sm:$0xf0]  ;;  %v6081_v25 = vld [vmem:[#allocation12 + $0xcc] sm:$0xf] }
 0x178   :  { %v5553_v9 = vor.u32 %v6299_v47, %v5552_v52  ;;  %v6223_v7 = vld [vmem:[#allocation12 + $0x534] sm:$0xf0]  ;;  %v5121_v15 = vor.u32 %v6191_v4, %v5120_v2  ;;  %v5104_v16 = vld [vmem:[#allocation12 + $0x408] sm:$0xf]  ;;  %v4690_v44 = vld [vmem:[#allocation12 + $0xd8] sm:$0xf0] }
 0x179   :  { %3141 = vmatmul.bf16.vlgmr.msra.gmra.mxu0 %v6815_v18  ;;  %v6259_v10 = vld [vmem:[#allocation12 + $0x654] sm:$0xf0]  ;;  %v5232_v26 = vld [vmem:[#allocation12 + $0x508] sm:$0xf]  ;;  %v6113_v1 = vld [vmem:[#allocation12 + $0x1cc] sm:$0xf]  ;;  %v4693_v47 = vor.u32 %v6081_v25, %v4690_v44 }
 0x17a   :  { %3189 = vmatpush.bf16.msrb.mxu0 %v5217_v54  ;;  %3167 = vmatpush.bf16.msra.mxu2 %v4865_v57  ;;  %v5136_v54 = vld [vmem:[#allocation12 + $0x448] sm:$0xf]  ;;  %v6219_v58 = vld [vmem:[#allocation12 + $0x514] sm:$0xf0]  ;;  %v4962_v52 = vld [vmem:[#allocation12 + $0x2f8] sm:$0xf0] }
 0x17b   :  { %3203 = vmatpush.bf16.msrb.mxu1 %v5345_v56  ;;  %3181 = vmatpush.bf16.msra.mxu3 %v4993_v62  ;;  %v6195_v56 = vld [vmem:[#allocation12 + $0x454] sm:$0xf0]  ;;  %v5264_v57 = vld [vmem:[#allocation12 + $0x548] sm:$0xf]  ;;  %v5233_v39 = vor.u32 %v6219_v58, %v5232_v26  ;;  %v6177_v4 = vld [vmem:[#allocation12 + $0x3cc] sm:$0xf] }
 0x17c   :  { %3155 = vmatmul.bf16.vlgmr.msra.gmra.mxu1 %v6817_v61  ;;  %v6263_v62 = vld [vmem:[#allocation12 + $0x674] sm:$0xf0]  ;;  %v5137_v63 = vor.u32 %v6195_v56, %v5136_v54  ;;  %v5265_v13 = vor.u32 %v6227_v59, %v5264_v57  ;;  %v5360_v48 = vld [vmem:[#allocation12 + $0x608] sm:$0xf]  ;;  %v5090_v54 = vld [vmem:[#allocation12 + $0x3f8] sm:$0xf0] }
 0x17d   :  { %v6255_v43 = vld [vmem:[#allocation12 + $0x634] sm:$0xf0]  ;;  %v5488_v46 = vld [vmem:[#allocation12 + $0x708] sm:$0xf]  ;;  %v6077_v57 = vld [vmem:[#allocation12 + $0xac] sm:$0xf] }
 0x17e   :  { %3190 = vmatpush.bf16.msrb.mxu0 %v5201_v5  ;;  %3168 = vmatpush.bf16.msra.mxu2 %v4849_v8  ;;  %v5409_v5 = vor.u32 %v6263_v62, %v5408_v60  ;;  %v5392_v8 = vld [vmem:[#allocation12 + $0x648] sm:$0xf]  ;;  %v6287_v38 = vld [vmem:[#allocation12 + $0x734] sm:$0xf0]  ;;  %v4674_v59 = vld [vmem:[#allocation12 + $0xb8] sm:$0xf0] }
 0x17f   :  { %3204 = vmatpush.bf16.msrb.mxu1 %v5329_v6  ;;  %3182 = vmatpush.bf16.msra.mxu3 %v4977_v42  ;;  %v5248_v6 = vld [vmem:[#allocation12 + $0x528] sm:$0xf]  ;;  %v6283_v49 = vld [vmem:[#allocation12 + $0x714] sm:$0xf0]  ;;  %v6109_v62 = vld [vmem:[#allocation12 + $0x1ac] sm:$0xf]  ;;  %v4677_v2 = vor.u32 %v6077_v57, %v4674_v59 }
 0x180   :  { %v5520_v42 = vld [vmem:[#allocation12 + $0x748] sm:$0xf]  ;;  %v5249_v21 = vor.u32 %v6223_v7, %v5248_v6  ;;  %v6073_v7 = vld [vmem:[#allocation12 + $0x8c] sm:$0xf]  ;;  %v5058_v26 = vld [vmem:[#allocation12 + $0x3b8] sm:$0xf0] }
 0x181   :  { %3169 = vmatmul.bf16.vlgmr.msra.gmra.mxu2 %v6823_v31  ;;  %v4626_v25 = vld [vmem:[#allocation12 + $0x58] sm:$0xf0]  ;;  %v6129_v57 = vld [vmem:[#allocation12 + $0x24c] sm:$0xf] }
 0x182   :  { %3217 = vmatpush.bf16.msrb.mxu2 %v5473_v19  ;;  %3191 = vmatpush.bf16.msrb.mxu0 %v5185_v27  ;;  %v6291_v19 = vld [vmem:[#allocation12 + $0x754] sm:$0xf0]  ;;  %v5393_v27 = vor.u32 %v6259_v10, %v5392_v8  ;;  %v6105_v10 = vld [vmem:[#allocation12 + $0x18c] sm:$0xf]  ;;  %v4754_v44 = vld [vmem:[#allocation12 + $0x158] sm:$0xf0] }
 0x183   :  { %3231 = vmatpush.bf16.msrb.mxu3 %v5601_v23  ;;  %3205 = vmatpush.bf16.msrb.mxu1 %v5313_v32  ;;  %v6187_v23 = vld [vmem:[#allocation12 + $0x414] sm:$0xf0]  ;;  %v6117_v32 = vld [vmem:[#allocation12 + $0x1ec] sm:$0xf]  ;;  %v5521_v33 = vor.u32 %v6291_v19, %v5520_v42  ;;  %v4882_v59 = vld [vmem:[#allocation12 + $0x258] sm:$0xf0] }
 0x184   :  { %3183 = vmatmul.bf16.vlgmr.msra.gmra.mxu3 %v6825_v36  ;;  %v5105_v37 = vor.u32 %v6187_v23, %v5104_v16  ;;  %v4837_v51 = vor.u32 %v6117_v32, %v4834_v34  ;;  %v6141_v19 = vld [vmem:[#allocation12 + $0x2ac] sm:$0xf]  ;;  %v4930_v16 = vld [vmem:[#allocation12 + $0x2b8] sm:$0xf0] }
 0x185   :  { %v6173_v23 = vld [vmem:[#allocation12 + $0x3ac] sm:$0xf] }
 0x186   :  { %3218 = vmatpush.bf16.msrb.mxu2 %v5457_v35  ;;  %3192 = vmatpush.bf16.msrb.mxu0 %v5169_v40  ;;  %v5376_v35 = vld [vmem:[#allocation12 + $0x628] sm:$0xf]  ;;  %v4709_v40 = vor.u32 %v6085_v29, %v4706_v30  ;;  %v4642_v29 = vld [vmem:[#allocation12 + $0x78] sm:$0xf0]  ;;  %v4933_v30 = vor.u32 %v6141_v19, %v4930_v16  ;;  %v6101_v32 = vld [vmem:[#allocation12 + $0x16c] sm:$0xf]  ;;  %v5061_v34 = vor.u32 %v6173_v23, %v5058_v26 }
 0x187   :  { %3232 = vmatpush.bf16.msrb.mxu3 %v5585_v24  ;;  %3206 = vmatpush.bf16.msrb.mxu1 %v5297_v41  ;;  %v5504_v24 = vld [vmem:[#allocation12 + $0x728] sm:$0xf]  ;;  %v5377_v41 = vor.u32 %v6255_v43, %v5376_v35  ;;  %v6137_v35 = vld [vmem:[#allocation12 + $0x28c] sm:$0xf]  ;;  %v4914_v43 = vld [vmem:[#allocation12 + $0x298] sm:$0xf0] }
 0x188   :  { %v5505_v28 = vor.u32 %v6287_v38, %v5504_v24  ;;  %v6169_v24 = vld [vmem:[#allocation12 + $0x38c] sm:$0xf]  ;;  %v5042_v38 = vld [vmem:[#allocation12 + $0x398] sm:$0xf0] }
 0x189   :  { %v6157_v16 = vld [vmem:[#allocation12 + $0x32c] sm:$0xf] }
 0x18a   :  { %3219 = vmatpush.bf16.msrb.mxu2 %v5441_v45  ;;  %3193 = vmatpush.bf16.msrb.mxu0 %v5153_v50  ;;  %v4818_v45 = vld [vmem:[#allocation12 + $0x1d8] sm:$0xf0]  ;;  %v6149_v50 = vld [vmem:[#allocation12 + $0x2ec] sm:$0xf] }
 0x18b   :  { %3233 = vmatpush.bf16.msrb.mxu3 %v5569_v3  ;;  %3207 = vmatpush.bf16.msrb.mxu1 %v5281_v14  ;;  %v6251_v3 = vld [vmem:[#allocation12 + $0x614] sm:$0xf0]  ;;  %v6181_v14 = vld [vmem:[#allocation12 + $0x3ec] sm:$0xf]  ;;  %v4821_v56 = vor.u32 %v6113_v1, %v4818_v45  ;;  %v4965_v60 = vor.u32 %v6149_v50, %v4962_v52  ;;  %v5045_v1 = vor.u32 %v6169_v24, %v5042_v38  ;;  %v4610_v52 = vld [vmem:[#allocation12 + $0x38] sm:$0xf0] }
 0x18c   :  { %v5093_v0 = vor.u32 %v6181_v14, %v5090_v54  ;;  %v6133_v45 = vld [vmem:[#allocation12 + $0x26c] sm:$0xf]  ;;  %v4978_v38 = vld [vmem:[#allocation12 + $0x318] sm:$0xf0] }
 0x18d   :  { %v6061_v50 = vld [vmem:[#allocation12 + $0x2c] sm:$0xf] }
 0x18e   :  { %3220 = vmatpush.bf16.msrb.mxu2 %v5425_v17  ;;  %3194 = vmatpush.bf16.msrb.mxu0 %v5137_v63  ;;  %v5361_v17 = vor.u32 %v6251_v3, %v5360_v48  ;;  %v4802_v63 = vld [vmem:[#allocation12 + $0x1b8] sm:$0xf0]  ;;  %v6165_v3 = vld [vmem:[#allocation12 + $0x36c] sm:$0xf] }
 0x18f   :  { %3234 = vmatpush.bf16.msrb.mxu3 %v5553_v9  ;;  %3208 = vmatpush.bf16.msrb.mxu1 %v5265_v13  ;;  %v5489_v9 = vor.u32 %v6283_v49, %v5488_v46  ;;  %v4946_v13 = vld [vmem:[#allocation12 + $0x2d8] sm:$0xf0]  ;;  %v4805_v6 = vor.u32 %v6109_v62, %v4802_v63  ;;  %v6093_v54 = vld [vmem:[#allocation12 + $0x12c] sm:$0xf] }
 0x190   :  { %v4949_v8 = vor.u32 %v6145_v22, %v4946_v13  ;;  %v5026_v46 = vld [vmem:[#allocation12 + $0x378] sm:$0xf0]  ;;  %v6161_v62 = vld [vmem:[#allocation12 + $0x34c] sm:$0xf] }
 0x191   :  { %v5010_v63 = vld [vmem:[#allocation12 + $0x358] sm:$0xf0] }
 0x192   :  { %3221 = vmatpush.bf16.msrb.mxu2 %v5409_v5  ;;  %3195 = vmatpush.bf16.msrb.mxu0 %v5121_v15  ;;  %v5074_v5 = vld [vmem:[#allocation12 + $0x3d8] sm:$0xf0] }
 0x193   :  { %3235 = vmatpush.bf16.msrb.mxu3 %v5537_v11  ;;  %3209 = vmatpush.bf16.msrb.mxu1 %v5249_v21  ;;  %v4658_v11 = vld [vmem:[#allocation12 + $0x98] sm:$0xf0]  ;;  %v5077_v42 = vor.u32 %v6177_v4, %v5074_v5  ;;  %v4885_v5 = vor.u32 %v6129_v57, %v4882_v59  ;;  %v6305_v59 = vld [vmem:[#allocation12 + $0x7cc] sm:$0xf] }
 0x194   :  { %v4786_v15 = vld [vmem:[#allocation12 + $0x198] sm:$0xf0]  ;;  %v4661_v21 = vor.u32 %v6073_v7, %v4658_v11  ;;  %v6245_v11 = vld [vmem:[#allocation12 + $0x5ec] sm:$0xf] }
 0x195   :  { %v4789_v58 = vor.u32 %v6105_v10, %v4786_v15  ;;  %v4594_v13 = vld [vmem:[#allocation12 + $0x18] sm:$0xf0]  ;;  %v6125_v15 = vld [vmem:[#allocation12 + $0x22c] sm:$0xf] }
 0x196   :  { %3222 = vmatpush.bf16.msrb.mxu2 %v5393_v27  ;;  %3196 = vmatpush.bf16.msrb.mxu0 %v5105_v37  ;;  %v6069_v27 = vld [vmem:[#allocation12 + $0x6c] sm:$0xf]  ;;  %v4722_v4 = vld [vmem:[#allocation12 + $0x118] sm:$0xf0] }
 0x197   :  { %3236 = vmatpush.bf16.msrb.mxu3 %v5521_v33  ;;  %3210 = vmatpush.bf16.msrb.mxu1 %v5233_v39  ;;  %v4770_v33 = vld [vmem:[#allocation12 + $0x178] sm:$0xf0]  ;;  %v4645_v37 = vor.u32 %v6069_v27, %v4642_v29 }
 0x198   :  { %v4773_v39 = vor.u32 %v6101_v32, %v4770_v33  ;;  %v5218_v7 = vld [vmem:[#allocation12 + $0x4f8] sm:$0xf0]  ;;  %v6241_v32 = vld [vmem:[#allocation12 + $0x5cc] sm:$0xf] }
 0x199   :  { %3197 = vmatmul.bf16.vlgmr.msrb.gmra.mxu0 %v6839_v12  ;;  %v5346_v10 = vld [vmem:[#allocation12 + $0x5f8] sm:$0xf0] }
 0x19a   :  { %3245 = vmatpush.bf16.msra.mxu0 %v4709_v40  ;;  %3223 = vmatpush.bf16.msrb.mxu2 %v5377_v41  ;;  %v6065_v40 = vld [vmem:[#allocation12 + $0x4c] sm:$0xf]  ;;  %v5349_v27 = vor.u32 %v6245_v11, %v5346_v10  ;;  %v5330_v33 = vld [vmem:[#allocation12 + $0x5d8] sm:$0xf0] }
 0x19b   :  { %3259 = vmatpush.bf16.msra.mxu1 %v4837_v51  ;;  %3237 = vmatpush.bf16.msrb.mxu3 %v5505_v28  ;;  %v4917_v51 = vor.u32 %v6137_v35, %v4914_v43  ;;  %v6097_v41 = vld [vmem:[#allocation12 + $0x14c] sm:$0xf]  ;;  %v4898_v28 = vld [vmem:[#allocation12 + $0x278] sm:$0xf0]  ;;  %v4629_v48 = vor.u32 %v6065_v40, %v4626_v25 }
 0x19c   :  { %3211 = vmatmul.bf16.vlgmr.msrb.gmra.mxu1 %v6843_v20  ;;  %v4757_v49 = vor.u32 %v6097_v41, %v4754_v44  ;;  %v4901_v14 = vor.u32 %v6133_v45, %v4898_v28  ;;  %v6121_v35 = vld [vmem:[#allocation12 + $0x20c] sm:$0xf]  ;;  %v4850_v43 = vld [vmem:[#allocation12 + $0x218] sm:$0xf0] }
 0x19d   :  { %v5474_v40 = vld [vmem:[#allocation12 + $0x6f8] sm:$0xf0]  ;;  %v4853_v45 = vor.u32 %v6121_v35, %v4850_v43  ;;  %v6205_v28 = vld [vmem:[#allocation12 + $0x4ac] sm:$0xf] }
 0x19e   :  { %3246 = vmatpush.bf16.msra.mxu0 %v4693_v47  ;;  %3224 = vmatpush.bf16.msrb.mxu2 %v5361_v17  ;;  %v6873_v47 = vpop.f32.mrf.mxu0  ;;  %v5029_v17 = vor.u32 %v6165_v3, %v5026_v46  ;;  %v5602_v41 = vld [vmem:[#allocation12 + $0x7f8] sm:$0xf0]  ;;  %v6225_v43 = vld [vmem:[#allocation12 + $0x54c] sm:$0xf] }
 0x19f   :  { %3260 = vmatpush.bf16.msra.mxu1 %v4821_v56  ;;  %3238 = vmatpush.bf16.msrb.mxu3 %v5489_v9  ;;  %v4738_v56 = vld [vmem:[#allocation12 + $0x138] sm:$0xf0]  ;;  %v6875_v9 = vpop.f32.mrf.mxu1 }
 0x1a0   :  { %v4741_v22 = vor.u32 %v6093_v54, %v4738_v56  ;;  %v6273_v56 = vld [vmem:[#allocation12 + $0x6cc] sm:$0xf]  ;;  %v5570_v11 = vld [vmem:[#allocation12 + $0x7b8] sm:$0xf0] }
 0x1a1   :  { %3225 = vmatmul.bf16.vlgmr.msrb.gmra.mxu2 %v6851_v53 }
 0x1a2   :  { %3273 = vmatpush.bf16.msra.mxu2 %v4965_v60  ;;  %3247 = vmatpush.bf16.msra.mxu0 %v4677_v2  ;;  %v4613_v60 = vor.u32 %v6061_v50, %v4610_v52  ;;  %v6089_v2 = vld [vmem:[#allocation12 + $0x10c] sm:$0xf]  ;;  %v5314_v52 = vld [vmem:[#allocation12 + $0x5b8] sm:$0xf0] }
 0x1a3   :  { %3287 = vmatpush.bf16.msra.mxu3 %v5093_v0  ;;  %3261 = vmatpush.bf16.msra.mxu1 %v4805_v6  ;;  %v6057_v0 = vld [vmem:[#allocation12 + $0xc] sm:$0xf]  ;;  %v4725_v23 = vor.u32 %v6089_v2, %v4722_v4 }
 0x1a4   :  { %3239 = vmatmul.bf16.vlgmr.msrb.gmra.mxu3 %v6853_v55  ;;  %v6213_v6 = vld [vmem:[#allocation12 + $0x4ec] sm:$0xf]  ;;  %v4597_v19 = vor.u32 %v6057_v0, %v4594_v13  ;;  %v6881_v3 = vpop.f32.mrf.mxu2  ;;  %v5298_v13 = vld [vmem:[#allocation12 + $0x598] sm:$0xf0] }
 0x1a5   :  { %v5221_v26 = vor.u32 %v6213_v6, %v5218_v7  ;;  %v6237_v50 = vld [vmem:[#allocation12 + $0x5ac] sm:$0xf] }
 0x1a6   :  { %3274 = vmatpush.bf16.msra.mxu2 %v4949_v8  ;;  %3248 = vmatpush.bf16.msra.mxu0 %v4661_v21  ;;  %v5013_v8 = vor.u32 %v6161_v62, %v5010_v63  ;;  %v4994_v21 = vld [vmem:[#allocation12 + $0x338] sm:$0xf0]  ;;  %v6877_v24 = vpop.f32.mrf.mxu0  ;;  %v5317_v62 = vor.u32 %v6237_v50, %v5314_v52  ;;  %v6201_v63 = vld [vmem:[#allocation12 + $0x48c] sm:$0xf] }
 0x1a7   :  { %3288 = vmatpush.bf16.msra.mxu3 %v5077_v42  ;;  %3262 = vmatpush.bf16.msra.mxu1 %v4789_v58  ;;  %v4866_v42 = vld [vmem:[#allocation12 + $0x238] sm:$0xf0]  ;;  %v6209_v58 = vld [vmem:[#allocation12 + $0x4cc] sm:$0xf]  ;;  %v6879_v44 = vpop.f32.mrf.mxu1 }
 0x1a8   :  { %v4869_v29 = vor.u32 %v6125_v15, %v4866_v42  ;;  %v6269_v4 = vld [vmem:[#allocation12 + $0x6ac] sm:$0xf]  ;;  %v5154_v42 = vld [vmem:[#allocation12 + $0x478] sm:$0xf0] }
 0x1a9   :  { %v6301_v7 = vld [vmem:[#allocation12 + $0x7ac] sm:$0xf]  ;;  %v5250_v50 = vld [vmem:[#allocation12 + $0x538] sm:$0xf0] }
 0x1aa   :  { %3275 = vmatpush.bf16.msra.mxu2 %v4933_v30  ;;  %3249 = vmatpush.bf16.msra.mxu0 %v4645_v37  ;;  %v5202_v30 = vld [vmem:[#allocation12 + $0x4d8] sm:$0xf0]  ;;  %v6153_v37 = vld [vmem:[#allocation12 + $0x30c] sm:$0xf] }
 0x1ab   :  { %3289 = vmatpush.bf16.msra.mxu3 %v5061_v34  ;;  %3263 = vmatpush.bf16.msra.mxu1 %v4773_v39  ;;  %v4997_v34 = vor.u32 %v6157_v16, %v4994_v21  ;;  %v6277_v39 = vld [vmem:[#allocation12 + $0x6ec] sm:$0xf]  ;;  %v5205_v25 = vor.u32 %v6209_v58, %v5202_v30  ;;  %v4981_v46 = vor.u32 %v6153_v37, %v4978_v38  ;;  %v5282_v21 = vld [vmem:[#allocation12 + $0x578] sm:$0xf0] }
 0x1ac   :  { %v6197_v15 = vld [vmem:[#allocation12 + $0x46c] sm:$0xf]  ;;  %v6893_v58 = vpop.f32.mrf.mxu2  ;;  %v5266_v37 = vld [vmem:[#allocation12 + $0x558] sm:$0xf0] }
 0x1ad   :  { %v6229_v16 = vld [vmem:[#allocation12 + $0x56c] sm:$0xf] }
 0x1ae   :  { %3276 = vmatpush.bf16.msra.mxu2 %v4917_v51  ;;  %3250 = vmatpush.bf16.msra.mxu0 %v4629_v48  ;;  %v6309_v51 = vld [vmem:[#allocation12 + $0x7ec] sm:$0xf]  ;;  %v5186_v48 = vld [vmem:[#allocation12 + $0x4b8] sm:$0xf0] }
 0x1af   :  { %3290 = vmatpush.bf16.msra.mxu3 %v5045_v1  ;;  %3264 = vmatpush.bf16.msra.mxu1 %v4757_v49  ;;  %v5333_v1 = vor.u32 %v6241_v32, %v5330_v33  ;;  %v5477_v49 = vor.u32 %v6277_v39, %v5474_v40  ;;  %v5605_v54 = vor.u32 %v6309_v51, %v5602_v41  ;;  %v6193_v33 = vld [vmem:[#allocation12 + $0x44c] sm:$0xf] }
 0x1b0   :  { %v5189_v57 = vor.u32 %v6205_v28, %v5186_v48  ;;  %v5285_v32 = vor.u32 %v6229_v16, %v5282_v21  ;;  %v6261_v40 = vld [vmem:[#allocation12 + $0x66c] sm:$0xf]  ;;  %v5122_v48 = vld [vmem:[#allocation12 + $0x438] sm:$0xf0] }
 0x1b1   :  { %v6293_v41 = vld [vmem:[#allocation12 + $0x76c] sm:$0xf]  ;;  %v5378_v16 = vld [vmem:[#allocation12 + $0x638] sm:$0xf0] }
 0x1b2   :  { %3277 = vmatpush.bf16.msra.mxu2 %v4901_v14  ;;  %3251 = vmatpush.bf16.msra.mxu0 %v4613_v60  ;;  %v6884_v14 = vpop.f32.mrf.mxu3  ;;  %v5586_v60 = vld [vmem:[#allocation12 + $0x7d8] sm:$0xf0]  ;;  %v6189_v28 = vld [vmem:[#allocation12 + $0x42c] sm:$0xf] }
 0x1b3   :  { %3291 = vmatpush.bf16.msra.mxu3 %v5029_v17  ;;  %3265 = vmatpush.bf16.msra.mxu1 %v4741_v22  ;;  %v5458_v17 = vld [vmem:[#allocation12 + $0x6d8] sm:$0xf0]  ;;  %v6233_v22 = vld [vmem:[#allocation12 + $0x58c] sm:$0xf] }
 0x1b4   :  { %v5461_v0 = vor.u32 %v6273_v56, %v5458_v17  ;;  %v5301_v10 = vor.u32 %v6233_v22, %v5298_v13  ;;  %v6257_v56 = vld [vmem:[#allocation12 + $0x64c] sm:$0xf]  ;;  %v5394_v17 = vld [vmem:[#allocation12 + $0x658] sm:$0xf0] }
 0x1b5   :  { %v5106_v13 = vld [vmem:[#allocation12 + $0x418] sm:$0xf0] }
 0x1b6   :  { %3278 = vmatpush.bf16.msra.mxu2 %v4885_v5  ;;  %3252 = vmatpush.bf16.msra.mxu0 %v4597_v19  ;;  %v6887_v2 = vpop.f32.mrf.mxu0  ;;  %v5442_v5 = vld [vmem:[#allocation12 + $0x6b8] sm:$0xf0] }
 0x1b7   :  { %3292 = vmatpush.bf16.msra.mxu3 %v5013_v8  ;;  %3266 = vmatpush.bf16.msra.mxu1 %v4725_v23  ;;  %v6891_v8 = vpop.f32.mrf.mxu1  ;;  %v5445_v19 = vor.u32 %v6269_v4, %v5442_v5  ;;  %v5573_v23 = vor.u32 %v6301_v7, %v5570_v11  ;;  %v5234_v4 = vld [vmem:[#allocation12 + $0x518] sm:$0xf0]  ;;  %v5397_v5 = vor.u32 %v6257_v56, %v5394_v17  ;;  %v6327_v7 = vld [vmem:[#allocation14 + $0x74] sm:$0xf0]  ;;  %v5728_v11 = vld [vmem:[#allocation14 + $0xf0] sm:$0xf] }
 0x1b8   :  { %v6323_v56 = vld [vmem:[#allocation14 + $0x54] sm:$0xf0]  ;;  %v5712_v17 = vld [vmem:[#allocation14 + $0xd0] sm:$0xf] }
 0x1b9   :  { %3253 = vmatmul.bf16.vlgmr.msra.gmra.mxu0 %v6815_v18  ;;  %v5170_v18 = vld [vmem:[#allocation12 + $0x498] sm:$0xf0] }
 0x1ba   :  { %3301 = vmatpush.bf16.msrb.mxu0 %v5221_v26  ;;  %3279 = vmatpush.bf16.msra.mxu2 %v4869_v29  ;;  %v5173_v6 = vor.u32 %v6201_v63, %v5170_v18  ;;  %v6265_v26 = vld [vmem:[#allocation12 + $0x68c] sm:$0xf]  ;;  %v6895_v30 = vpop.f32.mrf.mxu3  ;;  %v5522_v63 = vld [vmem:[#allocation12 + $0x758] sm:$0xf0] }
 0x1bb   :  { %3315 = vmatpush.bf16.msrb.mxu1 %v5349_v27  ;;  %3293 = vmatpush.bf16.msra.mxu3 %v4997_v34  ;;  %v5157_v27 = vor.u32 %v6197_v15, %v5154_v42  ;;  %v6297_v29 = vld [vmem:[#allocation12 + $0x78c] sm:$0xf]  ;;  %v5138_v34 = vld [vmem:[#allocation12 + $0x458] sm:$0xf0]  ;;  %v6343_v42 = vld [vmem:[#allocation14 + $0xf4] sm:$0xf0] }
 0x1bc   :  { %3267 = vmatmul.bf16.vlgmr.msra.gmra.mxu1 %v6817_v61  ;;  %v5589_v61 = vor.u32 %v6305_v59, %v5586_v60  ;;  %v5141_v51 = vor.u32 %v6193_v33, %v5138_v34  ;;  %v5125_v60 = vor.u32 %v6189_v28, %v5122_v48  ;;  %v6185_v18 = vld [vmem:[#allocation12 + $0x40c] sm:$0xf]  ;;  %v5656_v33 = vld [vmem:[#allocation14 + $0x60] sm:$0xf]  ;;  %v6325_v34 = vld [vmem:[#allocation14 + $0x64] sm:$0xf0] }
 0x1bd   :  { %v5109_v21 = vor.u32 %v6185_v18, %v5106_v13  ;;  %v5657_v48 = vor.u32 %v6325_v34, %v5656_v33  ;;  %v6333_v33 = vld [vmem:[#allocation14 + $0xa4] sm:$0xf0] }
 0x1be   :  { %3302 = vmatpush.bf16.msrb.mxu0 %v5205_v25  ;;  %3280 = vmatpush.bf16.msra.mxu2 %v4853_v45  ;;  %v6897_v38 = vpop.f32.mrf.mxu0  ;;  %v5410_v25 = vld [vmem:[#allocation12 + $0x678] sm:$0xf0]  ;;  %v5269_v45 = vor.u32 %v6225_v43, %v5266_v37  ;;  %v6341_v37 = vld [vmem:[#allocation14 + $0xe4] sm:$0xf0] }
 0x1bf   :  { %3316 = vmatpush.bf16.msrb.mxu1 %v5333_v1  ;;  %3294 = vmatpush.bf16.msra.mxu3 %v4981_v46  ;;  %v5538_v1 = vld [vmem:[#allocation12 + $0x778] sm:$0xf0]  ;;  %v5413_v46 = vor.u32 %v6261_v40, %v5410_v25  ;;  %v6899_v52 = vpop.f32.mrf.mxu1 }
 0x1c0   :  { %v5362_v40 = vld [vmem:[#allocation12 + $0x618] sm:$0xf0] }
 0x1c1   :  { %3281 = vmatmul.bf16.vlgmr.msra.gmra.mxu2 %v6823_v31  ;;  %v5426_v31 = vld [vmem:[#allocation12 + $0x698] sm:$0xf0] }
 0x1c2   :  { %3329 = vmatpush.bf16.msrb.mxu2 %v5477_v49  ;;  %3303 = vmatpush.bf16.msrb.mxu0 %v5189_v57  ;;  %v5429_v35 = vor.u32 %v6265_v26, %v5426_v31  ;;  %v6221_v49 = vld [vmem:[#allocation12 + $0x52c] sm:$0xf]  ;;  %v6904_v57 = vld [vmem:[%s6963_s6] sm:$0xf]  ;;  %v5506_v26 = vld [vmem:[#allocation12 + $0x738] sm:$0xf0] }
 0x1c3   :  { %3343 = vmatpush.bf16.msrb.mxu3 %v5605_v54  ;;  %3317 = vmatpush.bf16.msrb.mxu1 %v5317_v62  ;;  %v5541_v54 = vor.u32 %v6293_v41, %v5538_v1  ;;  %v6906_v59 = vpop.f32.mrf.mxu2  ;;  %v6289_v62 = vld [vmem:[#allocation12 + $0x74c] sm:$0xf]  ;;  %v5253_v22 = vor.u32 %v6221_v49, %v5250_v50  ;;  %v1621_v31 = vperm.slane %v6904_v57, 0  ;;  %v5490_v1 = vld [vmem:[#allocation12 + $0x718] sm:$0xf0]  ;;  %v1622_v13 = vperm.slane %v6904_v57, 1 }
 0x1c4   :  { %3295 = vmatmul.bf16.vlgmr.msra.gmra.mxu3 %v6825_v36  ;;  %v5554_v36 = vld [vmem:[#allocation12 + $0x798] sm:$0xf0]  ;;  %v5525_v15 = vor.u32 %v6289_v62, %v5522_v63  ;;  %v6281_v41 = vld [vmem:[#allocation12 + $0x70c] sm:$0xf] }
 0x1c5   :  { %v5557_v39 = vor.u32 %v6297_v29, %v5554_v36  ;;  %v5729_v36 = vor.u32 %v6343_v42, %v5728_v11  ;;  %v2921_v25 = vadd.f32 %v6877_v24, %v1621_v31  ;;  %v5493_v24 = vor.u32 %v6281_v41, %v5490_v1  ;;  %v5632_v42 = vld [vmem:[#allocation14 + $0x30] sm:$0xf]  ;;  %v6315_v41 = vld [vmem:[#allocation14 + $0x14] sm:$0xf0] }
 0x1c6   :  { %3330 = vmatpush.bf16.msrb.mxu2 %v5461_v0  ;;  %3304 = vmatpush.bf16.msrb.mxu0 %v5173_v6  ;;  %v6908_v0 = vpop.f32.mrf.mxu3  ;;  %v5664_v6 = vld [vmem:[#allocation14 + $0x70] sm:$0xf] }
 0x1c7   :  { %3344 = vmatpush.bf16.msrb.mxu3 %v5589_v61  ;;  %3318 = vmatpush.bf16.msrb.mxu1 %v5301_v10  ;;  %v6217_v61 = vld [vmem:[#allocation12 + $0x50c] sm:$0xf]  ;;  %v6910_v10 = vpop.f32.mrf.mxu0  ;;  %v5665_v29 = vor.u32 %v6327_v7, %v5664_v6  ;;  %v2935_v62 = vadd.f32 %v6879_v44, %v2921_v25  ;;  %v6337_v6 = vld [vmem:[#allocation14 + $0xc4] sm:$0xf0]  ;;  %v5616_v25 = vld [vmem:[#allocation14 + $0x10] sm:$0xf] }
 0x1c8   :  { %v3031_v11 = vadd.f32 %v6910_v10, %v1622_v13  ;;  %v5680_v1 = vld [vmem:[#allocation14 + $0x90] sm:$0xf] }
 0x1ca   :  { %3331 = vmatpush.bf16.msrb.mxu2 %v5445_v19  ;;  %3305 = vmatpush.bf16.msrb.mxu0 %v5157_v27  ;;  %v6253_v19 = vld [vmem:[#allocation12 + $0x62c] sm:$0xf]  ;;  %v5237_v27 = vor.u32 %v6217_v61, %v5234_v4  ;;  %v6321_v4 = vld [vmem:[#allocation14 + $0x44] sm:$0xf0] }
 0x1cb   :  { %3345 = vmatpush.bf16.msrb.mxu3 %v5573_v23  ;;  %3319 = vmatpush.bf16.msrb.mxu1 %v5285_v32  ;;  %v6285_v23 = vld [vmem:[#allocation12 + $0x72c] sm:$0xf]  ;;  %v5381_v32 = vor.u32 %v6253_v19, %v5378_v16  ;;  %v6319_v19 = vld [vmem:[#allocation14 + $0x34] sm:$0xf0] }
 0x1cc   :  { %v5509_v43 = vor.u32 %v6285_v23, %v5506_v26  ;;  %v6335_v23 = vld [vmem:[#allocation14 + $0xb4] sm:$0xf0] }
 0x1ce   :  { %3332 = vmatpush.bf16.msrb.mxu2 %v5429_v35  ;;  %3306 = vmatpush.bf16.msrb.mxu0 %v5141_v51  ;;  %v5720_v35 = vld [vmem:[#allocation14 + $0xe0] sm:$0xf]  ;;  %v6914_v51 = vpop.f32.mrf.mxu2  ;;  %v6916_v28 = vpop.f32.mrf.mxu3 }
 0x1cf   :  { %3346 = vmatpush.bf16.msrb.mxu3 %v5557_v39  ;;  %3320 = vmatpush.bf16.msrb.mxu1 %v5269_v45  ;;  %v6249_v39 = vld [vmem:[#allocation12 + $0x60c] sm:$0xf]  ;;  %v3044_v45 = vpop.f32.mrf.mxu1  ;;  %v5721_v49 = vor.u32 %v6341_v37, %v5720_v35  ;;  %v3032_v63 = vpop.f32.mrf.mxu0 }
 0x1d0   :  { %v5365_v50 = vor.u32 %v6249_v39, %v5362_v40 }
 0x1d2   :  { %3333 = vmatpush.bf16.msrb.mxu2 %v5413_v46  ;;  %3307 = vmatpush.bf16.msrb.mxu0 %v5125_v60  ;;  %v2919_v46 = vadd.f32 %v6873_v47, %v1621_v31  ;;  %v6339_v60 = vld [vmem:[#allocation14 + $0xd4] sm:$0xf0] }
 0x1d3   :  { %3347 = vmatpush.bf16.msrb.mxu3 %v5541_v54  ;;  %3321 = vmatpush.bf16.msrb.mxu1 %v5253_v22  ;;  %v5648_v54 = vld [vmem:[#allocation14 + $0x50] sm:$0xf]  ;;  %v2949_v22 = vadd.f32 %v6893_v58, %v2935_v62  ;;  %v5713_v61 = vor.u32 %v6339_v60, %v5712_v17  ;;  %v6313_v17 = vld [vmem:[#allocation14 + $0x4] sm:$0xf0]  ;;  %v5672_v60 = vld [vmem:[#allocation14 + $0x80] sm:$0xf] }
 0x1d4   :  { %v5649_v18 = vor.u32 %v6323_v56, %v5648_v54  ;;  %v2933_v47 = vadd.f32 %v6875_v9, %v2919_v46  ;;  %v5792_v54 = vld [vmem:[#allocation14 + $0x170] sm:$0xf]  ;;  %v6359_v56 = vld [vmem:[#allocation14 + $0x174] sm:$0xf0] }
 0x1d5   :  { %v2963_v58 = vadd.f32 %v6895_v30, %v2949_v22  ;;  %v3045_v30 = vadd.f32 %v3044_v45, %v3031_v11  ;;  %v6331_v45 = vld [vmem:[#allocation14 + $0x94] sm:$0xf0]  ;;  %v5793_v62 = vor.u32 %v6359_v56, %v5792_v54  ;;  %v6324_v11 = vld [vmem:[#allocation14 + $0x64] sm:$0xf] }
 0x1d6   :  { %3334 = vmatpush.bf16.msrb.mxu2 %v5397_v5  ;;  %3308 = vmatpush.bf16.msrb.mxu0 %v5109_v21  ;;  %v5704_v5 = vld [vmem:[#allocation14 + $0xc0] sm:$0xf]  ;;  %v2947_v44 = vadd.f32 %v6881_v3, %v2933_v47  ;;  %v3072_v7 = vpop.f32.mrf.mxu3  ;;  %v5696_v21 = vld [vmem:[#allocation14 + $0xb0] sm:$0xf]  ;;  %v5666_v47 = vld [vmem:[#allocation14 + $0x78] sm:$0xf0] }
 0x1d7   :  { %3348 = vmatpush.bf16.msrb.mxu3 %v5525_v15  ;;  %3322 = vmatpush.bf16.msrb.mxu1 %v5237_v27  ;;  %v5705_v15 = vor.u32 %v6337_v6, %v5704_v5  ;;  %v3046_v16 = vpop.f32.mrf.mxu1  ;;  %v2977_v26 = vadd.f32 %v6897_v38, %v2963_v58  ;;  %v3033_v27 = vadd.f32 %v3032_v63, %v1622_v13  ;;  %v3086_v10 = vpop.f32.mrf.mxu0  ;;  %v6329_v63 = vld [vmem:[#allocation14 + $0x84] sm:$0xf0] }
 0x1d8   :  { %v2961_v3 = vadd.f32 %v6884_v14, %v2947_v44  ;;  %v5784_v44 = vld [vmem:[#allocation14 + $0x160] sm:$0xf] }
 0x1d9   :  { %3309 = vmatmul.bf16.vlgmr.msrb.gmra.mxu0 %v6839_v12  ;;  %v5640_v12 = vld [vmem:[#allocation14 + $0x40] sm:$0xf]  ;;  %v2991_v34 = vadd.f32 %v6899_v52, %v2977_v26  ;;  %v3047_v39 = vadd.f32 %v3046_v16, %v3033_v27 }
 0x1da   :  { %3759 = vmatpush.bf16.msra.mxu0 %v5665_v29  ;;  %3335 = vmatpush.bf16.msrb.mxu2 %v5381_v32  ;;  %v5641_v9 = vor.u32 %v6321_v4, %v5640_v12  ;;  %v2975_v31 = vadd.f32 %v6887_v2, %v2961_v3  ;;  %v5624_v29 = vld [vmem:[#allocation14 + $0x20] sm:$0xf]  ;;  %v6342_v12 = vld [vmem:[#allocation14 + $0xf4] sm:$0xf]  ;;  %v5730_v4 = vld [vmem:[#allocation14 + $0xf8] sm:$0xf0] }
 0x1db   :  { %3773 = vmatpush.bf16.msra.mxu1 %v5729_v36  ;;  %3349 = vmatpush.bf16.msrb.mxu3 %v5509_v43  ;;  %v6317_v36 = vld [vmem:[#allocation14 + $0x24] sm:$0xf0]  ;;  %v5688_v32 = vld [vmem:[#allocation14 + $0xa0] sm:$0xf]  ;;  %v3005_v2 = vadd.f32 %v6914_v51, %v2991_v34  ;;  %v5681_v51 = vor.u32 %v6331_v45, %v5680_v1  ;;  %v5722_v3 = vld [vmem:[#allocation14 + $0xe8] sm:$0xf0] }
 0x1dc   :  { %3323 = vmatmul.bf16.vlgmr.msrb.gmra.mxu1 %v6843_v20  ;;  %v3058_v20 = vpop.f32.mrf.mxu2  ;;  %v5625_v38 = vor.u32 %v6317_v36, %v5624_v29  ;;  %v2989_v37 = vadd.f32 %v6891_v8, %v2975_v31  ;;  %v5689_v40 = vor.u32 %v6333_v33, %v5688_v32  ;;  %v6355_v31 = vld [vmem:[#allocation14 + $0x154] sm:$0xf0]  ;;  %v6322_v36 = vld [vmem:[#allocation14 + $0x54] sm:$0xf]  ;;  %v5650_v32 = vld [vmem:[#allocation14 + $0x58] sm:$0xf0] }
 0x1dd   :  { %v3059_v35 = vadd.f32 %v3058_v20, %v3045_v30  ;;  %v3019_v8 = vadd.f32 %v6916_v28, %v3005_v2  ;;  %v6357_v20 = vld [vmem:[#allocation14 + $0x164] sm:$0xf0]  ;;  %v6338_v33 = vld [vmem:[#allocation14 + $0xd4] sm:$0xf]  ;;  %v6320_v1 = vld [vmem:[#allocation14 + $0x44] sm:$0xf] }
 0x1de   :  { %3760 = vmatpush.bf16.msra.mxu0 %v5657_v48  ;;  %3336 = vmatpush.bf16.msrb.mxu2 %v5365_v50  ;;  %v3074_v14 = vpop.f32.mrf.mxu3  ;;  %v3003_v48 = vadd.f32 %v6906_v59, %v2989_v37  ;;  %v5617_v50 = vor.u32 %v6315_v41, %v5616_v25  ;;  %v5642_v45 = vld [vmem:[#allocation14 + $0x48] sm:$0xf0] }
 0x1df   :  { %3774 = vmatpush.bf16.msra.mxu1 %v5721_v49  ;;  %3350 = vmatpush.bf16.msrb.mxu3 %v5493_v24  ;;  %v3073_v46 = vadd.f32 %v3072_v7, %v3059_v35  ;;  %v3100_v49 = vpop.f32.mrf.mxu1  ;;  %v5608_v24 = vld [vmem:[#allocation14] sm:$0xf]  ;;  %v3361_v7 = vmax.f32 %v3019_v8, 0.0  ;;  %v5714_v35 = vld [vmem:[#allocation14 + $0xd8] sm:$0xf0]  ;;  %v5645_v8 = vor.u32 %v6320_v1, %v5642_v45  ;;  %v1623_v1 = vperm.slane %v6904_v57, 2 }
 0x1e0   :  { %v3017_v59 = vadd.f32 %v6908_v0, %v3003_v48  ;;  %v5609_v28 = vor.u32 %v6313_v17, %v5608_v24  ;;  %v5733_v0 = vor.u32 %v6342_v12, %v5730_v4  ;;  %v5717_v41 = vor.u32 %v6338_v33, %v5714_v35  ;;  %v6318_v17 = vld [vmem:[#allocation14 + $0x34] sm:$0xf]  ;;  %v6316_v12 = vld [vmem:[#allocation14 + $0x24] sm:$0xf]  ;;  %v5626_v4 = vld [vmem:[#allocation14 + $0x28] sm:$0xf0] }
 0x1e1   :  { %3337 = vmatmul.bf16.vlgmr.msrb.gmra.mxu2 %v6851_v53  ;;  %v5633_v53 = vor.u32 %v6319_v19, %v5632_v42  ;;  %v3087_v22 = vadd.f32 %v3086_v10, %v3073_v46  ;;  %v5785_v42 = vor.u32 %v6357_v20, %v5784_v44  ;;  %v6336_v46 = vld [vmem:[#allocation14 + $0xc4] sm:$0xf]  ;;  %v6347_v44 = vld [vmem:[#allocation14 + $0x114] sm:$0xf0]  ;;  %v5629_v20 = vor.u32 %v6316_v12, %v5626_v4  ;;  %v5786_v33 = vld [vmem:[#allocation14 + $0x168] sm:$0xf0] }
 0x1e2   :  { %3761 = vmatpush.bf16.msra.mxu0 %v5649_v18  ;;  %3351 = vmatmul.bf16.vlgmr.msrb.gmra.mxu3 %v6853_v55  ;;  %v5697_v55 = vor.u32 %v6335_v23, %v5696_v21  ;;  %v6326_v18 = vld [vmem:[#allocation14 + $0x74] sm:$0xf]  ;;  %v3357_v19 = vmax.f32 %v3017_v59, 0.0  ;;  %v6340_v23 = vld [vmem:[#allocation14 + $0xe4] sm:$0xf] }
 0x1e3   :  { %3775 = vmatpush.bf16.msra.mxu1 %v5713_v61  ;;  %v3088_v61 = vpop.f32.mrf.mxu0  ;;  %3787 = vmatpush.bf16.msra.mxu2 %v5793_v62  ;;  %v5669_v58 = vor.u32 %v6326_v18, %v5666_v47  ;;  %v3101_v16 = vadd.f32 %v3100_v49, %v3087_v22  ;;  %v5725_v29 = vor.u32 %v6340_v23, %v5722_v3  ;;  %v5760_v49 = vld [vmem:[#allocation14 + $0x130] sm:$0xf]  ;;  %v5698_v18 = vld [vmem:[#allocation14 + $0xb8] sm:$0xf0]  ;;  %v5752_v47 = vld [vmem:[#allocation14 + $0x120] sm:$0xf] }
 0x1e4   :  { %v3060_v43 = vpop.f32.mrf.mxu2  ;;  %v6939_v30 = vpack.c.bf16 %v3361_v7, %v3357_v19  ;;  %v6349_v59 = vld [vmem:[#allocation14 + $0x124] sm:$0xf0]  ;;  %v6358_v23 = vld [vmem:[#allocation14 + $0x174] sm:$0xf]  ;;  %v5794_v3 = vld [vmem:[#allocation14 + $0x178] sm:$0xf0] }
 0x1e5   :  { %v3061_v52 = vadd.f32 %v3060_v43, %v3047_v39  ;;  %v5768_v43 = vld [vmem:[#allocation14 + $0x140] sm:$0xf]  ;;  %v6345_v19 = vld [vmem:[#allocation14 + $0x104] sm:$0xf0] }
 0x1e6   :  { %3762 = vmatpush.bf16.msra.mxu0 %v5641_v9  ;;  %v5673_v9 = vor.u32 %v6329_v63, %v5672_v60  ;;  %v5634_v60 = vld [vmem:[#allocation14 + $0x38] sm:$0xf0]  ;;  %v6334_v63 = vld [vmem:[#allocation14 + $0xb4] sm:$0xf] }
 0x1e7   :  { %3776 = vmatpush.bf16.msra.mxu1 %v5705_v15  ;;  %v3075_v13 = vadd.f32 %v3074_v14, %v3061_v52  ;;  %v3128_v6 = vpop.f32.mrf.mxu3  ;;  %v5658_v15 = vld [vmem:[#allocation14 + $0x68] sm:$0xf0]  ;;  %3788 = vmatpush.bf16.msra.mxu2 %v5785_v42  ;;  %v6353_v14 = vld [vmem:[#allocation14 + $0x144] sm:$0xf0]  ;;  %v5637_v22 = vor.u32 %v6318_v17, %v5634_v60  ;;  %v5682_v42 = vld [vmem:[#allocation14 + $0x98] sm:$0xf0] }
 0x1e8   :  { %v5661_v26 = vor.u32 %v6324_v11, %v5658_v15  ;;  %v5769_v37 = vor.u32 %v6353_v14, %v5768_v43  ;;  %v5706_v52 = vld [vmem:[#allocation14 + $0xc8] sm:$0xf0]  ;;  %v5618_v11 = vld [vmem:[#allocation14 + $0x18] sm:$0xf0]  ;;  %v6330_v15 = vld [vmem:[#allocation14 + $0x94] sm:$0xf] }
 0x1e9   :  { %v3089_v21 = vadd.f32 %v3088_v61, %v3075_v13  ;;  %v5709_v24 = vor.u32 %v6336_v46, %v5706_v52  ;;  %v5753_v13 = vor.u32 %v6349_v59, %v5752_v47  ;;  %v5701_v61 = vor.u32 %v6334_v63, %v5698_v18  ;;  %v6354_v43 = vld [vmem:[#allocation14 + $0x154] sm:$0xf]  ;;  %v5778_v14 = vld [vmem:[#allocation14 + $0x158] sm:$0xf0] }
 0x1ea   :  { %3763 = vmatpush.bf16.msra.mxu0 %v5633_v53  ;;  %v5776_v53 = vld [vmem:[#allocation14 + $0x150] sm:$0xf]  ;;  %v5762_v46 = vld [vmem:[#allocation14 + $0x138] sm:$0xf0]  ;;  %v6346_v60 = vld [vmem:[#allocation14 + $0x114] sm:$0xf] }
 0x1eb   :  { %3777 = vmatpush.bf16.msra.mxu1 %v5697_v55  ;;  %v5777_v10 = vor.u32 %v6355_v31, %v5776_v53  ;;  %v3102_v55 = vpop.f32.mrf.mxu1  ;;  %v6312_v53 = vld [vmem:[#allocation14 + $0x4] sm:$0xf]  ;;  %v5610_v31 = vld [vmem:[#allocation14 + $0x8] sm:$0xf0] }
 0x1ec   :  { %v3114_v5 = vpop.f32.mrf.mxu2  ;;  %v3103_v34 = vadd.f32 %v3102_v55, %v3089_v21  ;;  %v5674_v55 = vld [vmem:[#allocation14 + $0x88] sm:$0xf0] }
 0x1ed   :  { %v3115_v27 = vadd.f32 %v3114_v5, %v3101_v16  ;;  %3789 = vmatpush.bf16.msra.mxu2 %v5777_v10  ;;  %v6332_v5 = vld [vmem:[#allocation14 + $0xa4] sm:$0xf] }
 0x1ee   :  { %3764 = vmatpush.bf16.msra.mxu0 %v5625_v38  ;;  %v6328_v10 = vld [vmem:[#allocation14 + $0x84] sm:$0xf] }
 0x1ef   :  { %3778 = vmatpush.bf16.msra.mxu1 %v5689_v40  ;;  %v3129_v2 = vadd.f32 %v3128_v6, %v3115_v27  ;;  %v5653_v40 = vor.u32 %v6322_v36, %v5650_v32  ;;  %v3130_v25 = vpop.f32.mrf.mxu3  ;;  %v5690_v6 = vld [vmem:[#allocation14 + $0xa8] sm:$0xf0]  ;;  %v5797_v27 = vor.u32 %v6358_v23, %v5794_v3  ;;  %v5613_v36 = vor.u32 %v6312_v53, %v5610_v31  ;;  %v6356_v32 = vld [vmem:[#allocation14 + $0x164] sm:$0xf]  ;;  %v5840_v23 = vld [vmem:[#allocation14 + $0x1d0] sm:$0xf] }
 0x1f0   :  { %v5789_v35 = vor.u32 %v6356_v32, %v5786_v33  ;;  %v6371_v3 = vld [vmem:[#allocation14 + $0x1d4] sm:$0xf0] }
 0x1f1   :  { %3790 = vmatpush.bf16.msra.mxu2 %v5769_v37  ;;  %v3358_v54 = vmax.f32 %v3129_v2, 0.0  ;;  %v6352_v2 = vld [vmem:[#allocation14 + $0x144] sm:$0xf]  ;;  %v5841_v53 = vor.u32 %v6371_v3, %v5840_v23 }
 0x1f2   :  { %3765 = vmatpush.bf16.msra.mxu0 %v5617_v50  ;;  %v6351_v50 = vld [vmem:[#allocation14 + $0x134] sm:$0xf0]  ;;  %v6360_v3 = vld [vmem:[#allocation14 + $0x184] sm:$0xf] }
 0x1f3   :  { %3779 = vmatpush.bf16.msra.mxu1 %v5681_v51  ;;  %v5761_v51 = vor.u32 %v6351_v50, %v5760_v49 }
 0x1f4   :  { %v3116_v38 = vpop.f32.mrf.mxu2 }
 0x1f5   :  { %v3117_v39 = vadd.f32 %v3116_v38, %v3103_v34  ;;  %3791 = vmatpush.bf16.msra.mxu2 %v5761_v51  ;;  %v5677_v34 = vor.u32 %v6328_v10, %v5674_v55  ;;  %v5781_v38 = vor.u32 %v6354_v43, %v5778_v14  ;;  %v5832_v10 = vld [vmem:[#allocation14 + $0x1c0] sm:$0xf]  ;;  %v6369_v55 = vld [vmem:[#allocation14 + $0x1c4] sm:$0xf0]  ;;  %v5824_v14 = vld [vmem:[#allocation14 + $0x1b0] sm:$0xf] }
 0x1f6   :  { %3766 = vmatpush.bf16.msra.mxu0 %v5609_v28  ;;  %v5744_v28 = vld [vmem:[#allocation14 + $0x110] sm:$0xf]  ;;  %v5833_v32 = vor.u32 %v6369_v55, %v5832_v10 }
 0x1f7   :  { %3780 = vmatpush.bf16.msra.mxu1 %v5673_v9  ;;  %v3131_v48 = vadd.f32 %v3130_v25, %v3117_v39  ;;  %v5745_v7 = vor.u32 %v6347_v44, %v5744_v28  ;;  %v5693_v9 = vor.u32 %v6332_v5, %v5690_v6  ;;  %v5770_v39 = vld [vmem:[#allocation14 + $0x148] sm:$0xf0]  ;;  %v5856_v6 = vld [vmem:[#allocation14 + $0x1f0] sm:$0xf]  ;;  %v6375_v28 = vld [vmem:[#allocation14 + $0x1f4] sm:$0xf0] }
 0x1f8   :  { %v5857_v44 = vor.u32 %v6375_v28, %v5856_v6  ;;  %v6364_v6 = vld [vmem:[#allocation14 + $0x1a4] sm:$0xf]  ;;  %v5818_v28 = vld [vmem:[#allocation14 + $0x1a8] sm:$0xf0] }
 0x1f9   :  { %3767 = vmatmul.bf16.vlgmr.msra.gmra.mxu0 %v6939_v30  ;;  %v3362_v56 = vmax.f32 %v3131_v48, 0.0  ;;  %3792 = vmatpush.bf16.msra.mxu2 %v5753_v13  ;;  %v3156_v37 = vpop.f32.mrf.mxu1  ;;  %v6350_v48 = vld [vmem:[#allocation14 + $0x134] sm:$0xf]  ;;  %v6344_v13 = vld [vmem:[#allocation14 + $0x104] sm:$0xf] }
 0x1fa   :  { %3815 = vmatpush.bf16.msrb.mxu0 %v5669_v58  ;;  %v6314_v58 = vld [vmem:[#allocation14 + $0x14] sm:$0xf]  ;;  %v5765_v52 = vor.u32 %v6350_v48, %v5762_v46  ;;  %3801 = vmatpush.bf16.msra.mxu3 %v5857_v44  ;;  %v5800_v48 = vld [vmem:[#allocation14 + $0x180] sm:$0xf]  ;;  %v6361_v46 = vld [vmem:[#allocation14 + $0x184] sm:$0xf0] }
 0x1fb   :  { %3829 = vmatpush.bf16.msrb.mxu1 %v5733_v0  ;;  %v3366_v62 = vpack.c.bf16 %v3362_v56, %v3358_v54  ;;  %v5736_v0 = vld [vmem:[#allocation14 + $0x100] sm:$0xf]  ;;  %v5621_v16 = vor.u32 %v6314_v58, %v5618_v11  ;;  %v6348_v54 = vld [vmem:[#allocation14 + $0x124] sm:$0xf]  ;;  %v5754_v56 = vld [vmem:[#allocation14 + $0x128] sm:$0xf0] }
 0x1fc   :  { %v5737_v21 = vor.u32 %v6345_v19, %v5736_v0 }
 0x1fd   :  { %3781 = vmatmul.bf16.vlgmr.msra.gmra.mxu1 %v3366_v62  ;;  %3793 = vmatpush.bf16.msra.mxu2 %v5745_v7 }
 0x1fe   :  { %3816 = vmatpush.bf16.msrb.mxu0 %v5661_v26  ;;  %v5685_v26 = vor.u32 %v6330_v15, %v5682_v42  ;;  %v5848_v15 = vld [vmem:[#allocation14 + $0x1e0] sm:$0xf]  ;;  %v6373_v42 = vld [vmem:[#allocation14 + $0x1e4] sm:$0xf0] }
 0x1ff   :  { %3830 = vmatpush.bf16.msrb.mxu1 %v5725_v29  ;;  %v3142_v29 = vpop.f32.mrf.mxu0  ;;  %v5849_v0 = vor.u32 %v6373_v42, %v5848_v15  ;;  %v6362_v42 = vld [vmem:[#allocation14 + $0x194] sm:$0xf] }
 0x200   :  { %v3143_v49 = vadd.f32 %v3142_v29, %v1623_v1 }
 0x201   :  { %3794 = vmatpush.bf16.msra.mxu2 %v5737_v21  ;;  %v3158_v50 = vpop.f32.mrf.mxu1  ;;  %3802 = vmatpush.bf16.msra.mxu3 %v5849_v0  ;;  %v5810_v0 = vld [vmem:[#allocation14 + $0x198] sm:$0xf0] }
 0x202   :  { %3817 = vmatpush.bf16.msrb.mxu0 %v5653_v40  ;;  %v5773_v40 = vor.u32 %v6352_v2, %v5770_v39  ;;  %v3157_v51 = vadd.f32 %v3156_v37, %v3143_v49  ;;  %v5816_v39 = vld [vmem:[#allocation14 + $0x1a0] sm:$0xf]  ;;  %v6374_v49 = vld [vmem:[#allocation14 + $0x1f4] sm:$0xf] }
 0x203   :  { %3831 = vmatpush.bf16.msrb.mxu1 %v5717_v41 }
 0x204   :  { %v3170_v41 = vpop.f32.mrf.mxu2 }
 0x205   :  { %3843 = vmatpush.bf16.msrb.mxu2 %v5797_v27  ;;  %v3171_v63 = vadd.f32 %v3170_v41, %v3157_v51  ;;  %3803 = vmatpush.bf16.msra.mxu3 %v5841_v53  ;;  %v5808_v41 = vld [vmem:[#allocation14 + $0x190] sm:$0xf] }
 0x206   :  { %3818 = vmatpush.bf16.msrb.mxu0 %v5645_v8 }
 0x207   :  { %3832 = vmatpush.bf16.msrb.mxu1 %v5709_v24  ;;  %v3144_v25 = vpop.f32.mrf.mxu0  ;;  %v3184_v45 = vpop.f32.mrf.mxu3 }
 0x208   :  { %v3145_v24 = vadd.f32 %v3144_v25, %v1623_v1  ;;  %v3185_v12 = vadd.f32 %v3184_v45, %v3171_v63  ;;  %v6363_v1 = vld [vmem:[#allocation14 + $0x194] sm:$0xf0]  ;;  %v6368_v63 = vld [vmem:[#allocation14 + $0x1c4] sm:$0xf] }
 0x209   :  { %3844 = vmatpush.bf16.msrb.mxu2 %v5789_v35  ;;  %3804 = vmatpush.bf16.msra.mxu3 %v5833_v32  ;;  %v5809_v45 = vor.u32 %v6363_v1, %v5808_v41 }
 0x20a   :  { %3819 = vmatpush.bf16.msrb.mxu0 %v5637_v22  ;;  %v3159_v59 = vadd.f32 %v3158_v50, %v3145_v24  ;;  %v5858_v50 = vld [vmem:[#allocation14 + $0x1f8] sm:$0xf0]  ;;  %v6370_v24 = vld [vmem:[#allocation14 + $0x1d4] sm:$0xf] }
 0x20b   :  { %3833 = vmatpush.bf16.msrb.mxu1 %v5701_v61  ;;  %v5738_v61 = vld [vmem:[#allocation14 + $0x108] sm:$0xf0] }
 0x20c   :  { %v3172_v17 = vpop.f32.mrf.mxu2  ;;  %v5741_v5 = vor.u32 %v6344_v13, %v5738_v61  ;;  %v1624_v13 = vperm.slane %v6904_v57, 3 }
 0x20d   :  { %3845 = vmatpush.bf16.msrb.mxu2 %v5781_v38  ;;  %v3173_v4 = vadd.f32 %v3172_v17, %v3159_v59  ;;  %v6367_v38 = vld [vmem:[#allocation14 + $0x1b4] sm:$0xf0]  ;;  %v5842_v17 = vld [vmem:[#allocation14 + $0x1d8] sm:$0xf0] }
 0x20e   :  { %3820 = vmatpush.bf16.msrb.mxu0 %v5629_v20  ;;  %v5825_v37 = vor.u32 %v6367_v38, %v5824_v14 }
 0x20f   :  { %3834 = vmatpush.bf16.msrb.mxu1 %v5693_v9  ;;  %v3186_v18 = vpop.f32.mrf.mxu3 }
 0x210   :  { %v3187_v58 = vadd.f32 %v3186_v18, %v3173_v4  ;;  %3805 = vmatpush.bf16.msra.mxu3 %v5825_v37  ;;  %v5834_v18 = vld [vmem:[#allocation14 + $0x1c8] sm:$0xf0]  ;;  %v5826_v4 = vld [vmem:[#allocation14 + $0x1b8] sm:$0xf0] }
 0x211   :  { %3846 = vmatpush.bf16.msrb.mxu2 %v5773_v40  ;;  %v6365_v40 = vld [vmem:[#allocation14 + $0x1a4] sm:$0xf0] }
 0x212   :  { %3821 = vmatpush.bf16.msrb.mxu0 %v5621_v16  ;;  %v5817_v25 = vor.u32 %v6365_v40, %v5816_v39 }
 0x213   :  { %3835 = vmatpush.bf16.msrb.mxu1 %v5685_v26 }
 0x214   :  { %3806 = vmatpush.bf16.msra.mxu3 %v5817_v25 }
 0x215   :  { %3847 = vmatpush.bf16.msrb.mxu2 %v5765_v52  ;;  %v5801_v52 = vor.u32 %v6361_v46, %v5800_v48  ;;  %v6382_v48 = vld [vmem:[#allocation15 + $0x30] sm:$0xff]  ;;  %v6381_v46 = vld [vmem:[#allocation15 + $0x28] sm:$0xff] }
 0x216   :  { %3822 = vmatpush.bf16.msrb.mxu0 %v5613_v36  ;;  %v3198_v8 = vpop.f32.mrf.mxu0 }
 0x217   :  { %3836 = vmatpush.bf16.msrb.mxu1 %v5677_v34  ;;  %v3199_v20 = vadd.f32 %v3198_v8, %v3185_v12  ;;  %v5850_v8 = vld [vmem:[#allocation14 + $0x1e8] sm:$0xf0]  ;;  %v6366_v12 = vld [vmem:[#allocation14 + $0x1b4] sm:$0xf] }
 0x218   :  { %3807 = vmatpush.bf16.msra.mxu3 %v5809_v45  ;;  %v6383_v45 = vld [vmem:[#allocation15 + $0x38] sm:$0xff] }
 0x219   :  { %3823 = vmatmul.bf16.vlgmr.msrb.gmra.mxu0 %v6939_v30  ;;  %v5757_v30 = vor.u32 %v6348_v54, %v5754_v56  ;;  %v3212_v22 = vpop.f32.mrf.mxu1  ;;  %v5861_v54 = vor.u32 %v6374_v49, %v5858_v50  ;;  %v6379_v49 = vld [vmem:[#allocation15 + $0x18] sm:$0xff] }
 0x21a   :  { %3837 = vmatmul.bf16.vlgmr.msrb.gmra.mxu1 %v3366_v62  ;;  %v5746_v62 = vld [vmem:[#allocation14 + $0x118] sm:$0xf0]  ;;  %v3213_v19 = vadd.f32 %v3212_v22, %v3199_v20  ;;  %v5821_v20 = vor.u32 %v6364_v6, %v5818_v28  ;;  %4009 = vmatpush.bf16.msra.mxu0 %v6383_v45 }
 0x21b   :  { %3848 = vmatpush.bf16.msrb.mxu2 %v5757_v30  ;;  %v5749_v47 = vor.u32 %v6346_v60, %v5746_v62  ;;  %v6372_v30 = vld [vmem:[#allocation14 + $0x1e4] sm:$0xf]  ;;  %v5845_v60 = vor.u32 %v6370_v24, %v5842_v17  ;;  %v6391_v50 = vld [vmem:[#allocation15 + $0x78] sm:$0xff] }
 0x21c   :  { %3808 = vmatpush.bf16.msra.mxu3 %v5801_v52  ;;  %v5853_v51 = vor.u32 %v6372_v30, %v5850_v8  ;;  %v6380_v52 = vld [vmem:[#allocation15 + $0x20] sm:$0xff]  ;;  %4023 = vmatpush.bf16.msra.mxu1 %v6391_v50  ;;  %v6377_v30 = vld [vmem:[#allocation15 + $0x8] sm:$0xff]  ;;  %v6387_v17 = vld [vmem:[#allocation15 + $0x58] sm:$0xff] }
 0x21d   :  { %v6389_v8 = vld [vmem:[#allocation15 + $0x68] sm:$0xff]  ;;  %v6388_v24 = vld [vmem:[#allocation15 + $0x60] sm:$0xff] }
 0x21e   :  { %v3200_v7 = vpop.f32.mrf.mxu0  ;;  %4010 = vmatpush.bf16.msra.mxu0 %v6382_v48 }
 0x21f   :  { %3849 = vmatpush.bf16.msrb.mxu2 %v5749_v47  ;;  %v3201_v16 = vadd.f32 %v3200_v7, %v3187_v58  ;;  %v5837_v47 = vor.u32 %v6368_v63, %v5834_v18  ;;  %v6385_v18 = vld [vmem:[#allocation15 + $0x48] sm:$0xff] }
 0x220   :  { %3857 = vmatpush.bf16.msrb.mxu3 %v5861_v54  ;;  %v6378_v54 = vld [vmem:[#allocation15 + $0x10] sm:$0xff] }
 0x221   :  { %v3214_v26 = vpop.f32.mrf.mxu1 }
 0x222   :  { %v3215_v31 = vadd.f32 %v3214_v26, %v3201_v16  ;;  %v5813_v16 = vor.u32 %v6362_v42, %v5810_v0  ;;  %v5802_v26 = vld [vmem:[#allocation14 + $0x188] sm:$0xf0]  ;;  %4011 = vmatpush.bf16.msra.mxu0 %v6381_v46 }
 0x223   :  { %3850 = vmatpush.bf16.msrb.mxu2 %v5741_v5  ;;  %v5829_v5 = vor.u32 %v6366_v12, %v5826_v4 }
 0x224   :  { %v3226_v9 = vpop.f32.mrf.mxu2  ;;  %3858 = vmatpush.bf16.msrb.mxu3 %v5853_v51  ;;  %v6376_v51 = vld [vmem:[#allocation15] sm:$0xff] }
 0x225   :  { %v3227_v21 = vadd.f32 %v3226_v9, %v3213_v19 }
 0x226   :  { %4012 = vmatpush.bf16.msra.mxu0 %v6380_v52 }
 0x227   :  { %v3240_v11 = vpop.f32.mrf.mxu3 }
 0x228   :  { %v3241_v29 = vadd.f32 %v3240_v11, %v3227_v21  ;;  %3859 = vmatpush.bf16.msrb.mxu3 %v5845_v60 }
 0x22a   :  { %v3359_v35 = vmax.f32 %v3241_v29, 0.0  ;;  %4013 = vmatpush.bf16.msra.mxu0 %v6379_v49 }
 0x22c   :  { %v3228_v27 = vpop.f32.mrf.mxu2  ;;  %3860 = vmatpush.bf16.msrb.mxu3 %v5837_v47 }
 0x22d   :  { %v3229_v36 = vadd.f32 %v3228_v27, %v3215_v31  ;;  %v5805_v27 = vor.u32 %v6360_v3, %v5802_v26 }
 0x22e   :  { %4014 = vmatpush.bf16.msra.mxu0 %v6378_v54 }
 0x22f   :  { %v3242_v33 = vpop.f32.mrf.mxu3 }
 0x230   :  { %v3243_v34 = vadd.f32 %v3242_v33, %v3229_v36  ;;  %3861 = vmatpush.bf16.msrb.mxu3 %v5829_v5 }
 0x232   :  { %v3363_v43 = vmax.f32 %v3243_v34, 0.0  ;;  %4015 = vmatpush.bf16.msra.mxu0 %v6377_v30 }
 0x234   :  { %v3367_v2 = vpack.c.bf16 %v3363_v43, %v3359_v35  ;;  %3862 = vmatpush.bf16.msrb.mxu3 %v5821_v20 }
 0x236   :  { %3795 = vmatmul.bf16.vlgmr.msra.gmra.mxu2 %v3367_v2  ;;  %v3254_v56 = vpop.f32.mrf.mxu0  ;;  %4016 = vmatpush.bf16.msra.mxu0 %v6376_v51 }
 0x237   :  { %v3255_v44 = vadd.f32 %v3254_v56, %v1624_v13  ;;  %v6390_v56 = vld [vmem:[#allocation15 + $0x70] sm:$0xff] }
 0x238   :  { %3863 = vmatpush.bf16.msrb.mxu3 %v5813_v16  ;;  %4024 = vmatpush.bf16.msra.mxu1 %v6390_v56 }
 0x239   :  { %v3268_v62 = vpop.f32.mrf.mxu1 }
 0x23a   :  { %v3269_v58 = vadd.f32 %v3268_v62, %v3255_v44  ;;  %v6386_v62 = vld [vmem:[#allocation15 + $0x50] sm:$0xff] }
 0x23c   :  { %3864 = vmatpush.bf16.msrb.mxu3 %v5805_v27  ;;  %4025 = vmatpush.bf16.msra.mxu1 %v6389_v8 }
 0x23e   :  { %v3256_v59 = vpop.f32.mrf.mxu0 }
 0x23f   :  { %v3257_v11 = vadd.f32 %v3256_v59, %v1624_v13  ;;  %v3433_v59 = vld [vmem:[%s6965_s8] sm:$0x3] }
 0x240   :  { %4026 = vmatpush.bf16.msra.mxu1 %v6388_v24 }
 0x241   :  { %v3270_v7 = vpop.f32.mrf.mxu1 }
 0x242   :  { %v3271_v21 = vadd.f32 %v3270_v7, %v3257_v11 }
 0x244   :  { %v3282_v22 = vpop.f32.mrf.mxu2  ;;  %4027 = vmatpush.bf16.msra.mxu1 %v6387_v17 }
 0x245   :  { %v3283_v19 = vadd.f32 %v3282_v22, %v3269_v58  ;;  %v6384_v22 = vld [vmem:[#allocation15 + $0x40] sm:$0xff] }
 0x246   :  { %3851 = vmatmul.bf16.vlgmr.msrb.gmra.mxu2 %v3367_v2 }
 0x247   :  { %v3296_v61 = vpop.f32.mrf.mxu3 }
 0x248   :  { %v3297_v53 = vadd.f32 %v3296_v61, %v3283_v19  ;;  %4028 = vmatpush.bf16.msra.mxu1 %v6386_v62  ;;  %v3435_v61 = vperm.slane %v3433_v59, 0 }
 0x24c   :  { %v3284_v15 = vpop.f32.mrf.mxu2  ;;  %4029 = vmatpush.bf16.msra.mxu1 %v6385_v18 }
 0x24d   :  { %v3285_v31 = vadd.f32 %v3284_v15, %v3271_v21 }
 0x24f   :  { %v3298_v57 = vpop.f32.mrf.mxu3 }
 0x250   :  { %v3299_v36 = vadd.f32 %v3298_v57, %v3285_v31  ;;  %4030 = vmatpush.bf16.msra.mxu1 %v6384_v22  ;;  %v3436_v57 = vperm.slane %v3433_v59, 1 }
 0x256   :  { %v3310_v9 = vpop.f32.mrf.mxu0 }
 0x257   :  { %v3311_v10 = vadd.f32 %v3310_v9, %v3297_v53 }
 0x259   :  { %v3324_v23 = vpop.f32.mrf.mxu1 }
 0x25a   :  { %v3325_v33 = vadd.f32 %v3324_v23, %v3311_v10 }
 0x25e   :  { %v3312_v55 = vpop.f32.mrf.mxu0 }
 0x25f   :  { %v3313_v34 = vadd.f32 %v3312_v55, %v3299_v36 }
 0x261   :  { %v3326_v43 = vpop.f32.mrf.mxu1 }
 0x262   :  { %v3327_v14 = vadd.f32 %v3326_v43, %v3313_v34 }
 0x264   :  { %v3338_v29 = vpop.f32.mrf.mxu2 }
 0x265   :  { %v3352_v32 = vpop.f32.mrf.mxu3  ;;  %v3339_v35 = vadd.f32 %v3338_v29, %v3325_v33 }
 0x267   :  { %v3353_v37 = vadd.f32 %v3352_v32, %v3339_v35 }
 0x269   :  { %v3360_v25 = vmax.f32 %v3353_v37, 0.0 }
 0x26c   :  { %v3340_v38 = vpop.f32.mrf.mxu2 }
 0x26d   :  { %v3341_v2 = vadd.f32 %v3340_v38, %v3327_v14  ;;  %v3354_v39 = vpop.f32.mrf.mxu3 }
 0x26f   :  { %v3355_v40 = vadd.f32 %v3354_v39, %v3341_v2  ;;  %v6409_v2 = vld [vmem:[%s6967_s10] ss:$0 sm:$0xff] }
 0x271   :  { %v3364_v41 = vmax.f32 %v3355_v40, 0.0 }
 0x273   :  { %v3368_v1 = vpack.c.bf16 %v3364_v41, %v3360_v25 }
 0x275   :  { %3809 = vmatmul.bf16.vlgmr.msra.gmra.mxu3 %v3368_v1 }
 0x276   :  { %v3768_v60 = vpop.f32.mrf.mxu0 }
 0x277   :  { %v3769_v5 = vadd.f32 %v3768_v60, %v3435_v61 }
 0x27a   :  { %v3782_v47 = vpop.f32.mrf.mxu1 }
 0x27b   :  { %v3783_v44 = vadd.f32 %v3782_v47, %v3769_v5 }
 0x27e   :  { %v3770_v13 = vpop.f32.mrf.mxu0 }
 0x27f   :  { %v3771_v28 = vadd.f32 %v3770_v13, %v3435_v61 }
 0x282   :  { %v3784_v6 = vpop.f32.mrf.mxu1 }
 0x283   :  { %v3785_v7 = vadd.f32 %v3784_v6, %v3771_v28 }
 0x285   :  { %3865 = vmatmul.bf16.vlgmr.msrb.gmra.mxu3 %v3368_v1 }
 0x296   :  { %v3824_v20 = vpop.f32.mrf.mxu0 }
 0x297   :  { %v3838_v0 = vpop.f32.mrf.mxu1  ;;  %v3825_v26 = vadd.f32 %v3824_v20, %v3436_v57 }
 0x299   :  { %v3839_v27 = vadd.f32 %v3838_v0, %v3825_v26 }
 0x29e   :  { %v3826_v3 = vpop.f32.mrf.mxu0 }
 0x29f   :  { %v3827_v31 = vadd.f32 %v3826_v3, %v3436_v57  ;;  %v3840_v10 = vpop.f32.mrf.mxu1 }
 0x2a1   :  { %v3841_v29 = vadd.f32 %v3840_v10, %v3827_v31 }
 0x2b9   :  { %v3796_v63 = vpop.f32.mrf.mxu2 }
 0x2ba   :  { %v3797_v9 = vadd.f32 %v3796_v63, %v3783_v44 }
 0x2c1   :  { %v3798_v12 = vpop.f32.mrf.mxu2 }
 0x2c2   :  { %v3799_v58 = vadd.f32 %v3798_v12, %v3785_v7 }
 0x2c9   :  { %v3852_v19 = vpop.f32.mrf.mxu2 }
 0x2ca   :  { %v3853_v36 = vadd.f32 %v3852_v19, %v3839_v27 }
 0x2d1   :  { %v3854_v55 = vpop.f32.mrf.mxu2 }
 0x2d2   :  { %v3855_v32 = vadd.f32 %v3854_v55, %v3841_v29 }
 0x2f8   :  { %v3810_v4 = vpop.f32.mrf.mxu3 }
 0x2f9   :  { %v3811_v11 = vadd.f32 %v3810_v4, %v3797_v9 }
 0x2fb   :  { %v3871_v16 = vmax.f32 %v3811_v11, 0.0 }
 0x300   :  { %v3812_v15 = vpop.f32.mrf.mxu3 }
 0x301   :  { %v3813_v42 = vadd.f32 %v3812_v15, %v3799_v58 }
 0x303   :  { %v3873_v21 = vmax.f32 %v3813_v42, 0.0 }
 0x305   :  { %v3875_v23 = vpack.c.bf16 %v3873_v21, %v3871_v16 }
 0x307   :  { %4017 = vmatmul.bf16.vlgmr.msra.gmra.mxu0 %v3875_v23 }
 0x308   :  { %v3866_v53 = vpop.f32.mrf.mxu3 }
 0x309   :  { %v3867_v33 = vadd.f32 %v3866_v53, %v3853_v36 }
 0x30b   :  { %v3872_v43 = vmax.f32 %v3867_v33, 0.0 }
 0x310   :  { %v3868_v34 = vpop.f32.mrf.mxu3 }
 0x311   :  { %v3869_v35 = vadd.f32 %v3868_v34, %v3855_v32 }
 0x313   :  { %v3874_v14 = vmax.f32 %v3869_v35, 0.0 }
 0x315   :  { %v3876_v38 = vpack.c.bf16 %v3874_v14, %v3872_v43 }
 0x317   :  { %4031 = vmatmul.bf16.vlgmr.msra.gmra.mxu1 %v3876_v38 }
 0x384   :  { %v4018_v37 = vpop.f32.mrf.mxu0 }
 0x385   :  { %v4019_v39 = vadd.f32 %v6409_v2, %v4018_v37 }
 0x38c   :  { %v4020_v41 = vpop.f32.mrf.mxu0 }
 0x38d   :  { %v4021_v1 = vadd.f32 %v6409_v2, %v4020_v41 }
 0x394   :  { %v4032_v40 = vpop.f32.mrf.mxu1 }
 0x395   :  { %v4033_v25 = vadd.f32 %v4032_v40, %v4019_v39 }
 0x397   :  { %4037 = vst [vmem:[#allocation17] sm:$0xff] %v4033_v25 }
 0x39c   :  { %v4034_v45 = vpop.f32.mrf.mxu1 }
 0x39d   :  { %v4035_v48 = vadd.f32 %v4034_v45, %v4021_v1 }
 0x39f   :  { %4038 = vst [vmem:[#allocation17 + $0x8] sm:$0xff] %v4035_v48 }
 0x3a0   :  { %4051 = dma.vmem_to_hbm [thread:$0]  %s4044_s24, 256, %s4046_s26, [#allocation5], %s6651_s19, %s6651_s19, %s6652_s20  }
 0x3a1   :  { %6636 = dma.done.wait [#allocation5], 256  }
 0x3a2   :  { %6637 = vsyncadd [#allocation5], 4294967040 }
 0x3a3   :  { %4056 = vsyncpa [#allocation4], 1 }
 0x3a4   :  { %4057 = vsyncpa [#allocation7], 1 }
 0x3a5   :  { %4058 = vsyncpa [#allocation10], 1 }
 0x3a6   :  { %4059 = vsyncpa [#allocation13], 1 }
 0x3a7   :  { %4060 = vsyncpa [#allocation16], 1 }
 0x3a8   :  { %4061 = vsyncpa [#allocation5], 1 }

</bundles_post_ra>
